<compile_context>
chip_gen: v7x
topology: tpu7x:2x2x1
jax: 0.10.0
libtpu: 0.0.40
codegen_flags: <defaults>
</compile_context>

<pallas_src>
import math
import numpy as np
import jax
import jax.numpy as jnp
from jax.experimental import pallas as pl
from jax.experimental.pallas import tpu as pltpu

DIM = 512              # hidden width of the discriminator
TIME_EMBED_DIM = 128   # args.time_embed_dim
NUM_RES_BLOCKS = 2
LAYERS_PER_BLOCK = 3
NRES = NUM_RES_BLOCKS * LAYERS_PER_BLOCK


def _leaky_relu(v, slope=0.2):
    return jnp.where(v >= 0, v, slope * v)


def _round_up(a, b):
    return (a + b - 1) // b * b


# ----------------------------- Pallas kernel --------------------------------
def _disc_kernel(x_ref, tout_ref,
                 wmap_ref, bmap_ref,
                 wres_ref, bres_ref,
                 wo1_ref, bo1_ref, wo2_ref, bo2_ref,
                 out_ref):
    f32 = jnp.float32
    bf16 = jnp.bfloat16

    # ---- x_module.map : Linear(2, 512) as a VPU broadcast multiply-add ----
    x = x_ref[...]                                           # [TM, 2] f32
    h = (x[:, 0:1] * wmap_ref[0:1, :]
         + x[:, 1:2] * wmap_ref[1:2, :]
         + bmap_ref[...])                                    # [TM, 512] f32

    # ---- x_module res blocks: 2 x (Linear -> LeakyReLU) x 3, bf16 on MXU ---
    inv_sqrt2 = np.float32(1.0 / math.sqrt(2.0))
    for blk in range(NUM_RES_BLOCKS):
        r = h
        for lyr in range(LAYERS_PER_BLOCK):
            idx = blk * LAYERS_PER_BLOCK + lyr               # static index
            r = _leaky_relu(
                jnp.dot(r.astype(bf16), wres_ref[idx],
                        preferred_element_type=f32) + bres_ref[idx])
        h = (h + r) * inv_sqrt2

    # ---- out_module on (x_out + t_out); t_out broadcast from [1, 512] -----
    o = _leaky_relu(
        jnp.dot((h + tout_ref[...]).astype(bf16), wo1_ref[...],
                preferred_element_type=f32) + bo1_ref[...])  # [TM, 512] f32

    # Final Linear(512, 1) as a cross-lane reduction (no padded matmul).
    out_ref[...] = (jnp.sum(o * wo2_ref[...], axis=-1, keepdims=True)
                    + bo2_ref[...])                          # [TM, 1]


# ------------------------------- glue (JAX) ---------------------------------
def timestep_embedding(timesteps, dim, max_period=10000):
    half = dim // 2
    freqs = jnp.exp(
        -math.log(max_period) * jnp.arange(half, dtype=jnp.float32) / half)
    args = timesteps[:, None].astype(jnp.float32) * freqs[None]
    emb = jnp.concatenate([jnp.cos(args), jnp.sin(args)], axis=-1)
    if dim % 2:
        emb = jnp.concatenate([emb, jnp.zeros_like(emb[:, :1])], axis=-1)
    return emb


def _linear_init(key, fan_in, fan_out):
    """Deterministic PyTorch-style Linear init (uniform +-1/sqrt(fan_in))."""
    kw, kb = jax.random.split(key)
    bound = 1.0 / math.sqrt(fan_in)
    w = jax.random.uniform(kw, (fan_in, fan_out), jnp.float32, -bound, bound)
    b = jax.random.uniform(kb, (1, fan_out), jnp.float32, -bound, bound)
    return w, b


def init_params(key):
    keys = jax.random.split(key, 12)
    p = {}
    # t_module
    p['wt1'], p['bt1'] = _linear_init(keys[0], TIME_EMBED_DIM, DIM)
    p['wt2'], p['bt2'] = _linear_init(keys[1], DIM, DIM)
    # x_module.map : Linear(2, 512)
    p['wmap'], p['bmap'] = _linear_init(keys[2], 2, DIM)
    # x_module res blocks: 2 blocks x 3 Linear(512, 512)
    wres, bres = [], []
    for i in range(NRES):
        w, b = _linear_init(keys[3 + i], DIM, DIM)
        wres.append(w)
        bres.append(b)
    p['wres'] = jnp.stack(wres, axis=0)                      # [6, 512, 512]
    p['bres'] = jnp.stack(bres, axis=0)                      # [6, 1, 512]
    # out_module
    p['wo1'], p['bo1'] = _linear_init(keys[9], DIM, DIM)
    p['wo2'], p['bo2'] = _linear_init(keys[10], DIM, 1)      # [512,1], [1,1]
    return p


def toy_discriminator_forward(params, x_t, t, x_tp1, tm=256):
    n = x_t.shape[0]

    # ---- t_module hoisted out of the kernel (scalar t => identical rows) ----
    # TODO(synk): list-of-timesteps form of timesteps_to_tensor not supported
    #             here; scalar int t only (matches the module's int code path).
    t_vec = jnp.full((1,), t, dtype=jnp.float32)
    t_emb = timestep_embedding(t_vec, TIME_EMBED_DIM)        # [1, 128]
    t_h = _leaky_relu(t_emb @ params['wt1'] + params['bt1'])
    t_out = t_h @ params['wt2'] + params['bt2']              # [1, 512] f32

    # ---- x input: [N, 2], row-padded to a multiple of the batch tile -------
    x_in = jnp.concatenate([x_t, x_tp1], axis=1)             # [N, 2]
    tm = int(min(tm, _round_up(n, 8)))                       # small batches OK
    n_pad = _round_up(n, tm)
    x_pad = jnp.zeros((n_pad, 2), jnp.float32).at[:n, :].set(x_in)

    # ---- bf16 weights for the MXU (f32 accumulation in-kernel) -------------
    wres_bf = params['wres'].astype(jnp.bfloat16)            # [6, 512, 512]
    wo1_bf = params['wo1'].astype(jnp.bfloat16)              # [512, 512]
    wo2_row = params['wo2'].T                                # [1, 512] f32

    grid = (n_pad // tm,)
    in_specs = [
        pl.BlockSpec((tm, 2), lambda i: (i, 0)),             # x tile
        pl.BlockSpec((1, DIM), lambda i: (0, 0)),            # t_out (resident)
        pl.BlockSpec((2, DIM), lambda i: (0, 0)),            # wmap
        pl.BlockSpec((1, DIM), lambda i: (0, 0)),            # bmap
        pl.BlockSpec((NRES, DIM, DIM), lambda i: (0, 0, 0)),  # wres (resident)
        pl.BlockSpec((NRES, 1, DIM), lambda i: (0, 0, 0)),    # bres
        pl.BlockSpec((DIM, DIM), lambda i: (0, 0)),          # wo1 (resident)
        pl.BlockSpec((1, DIM), lambda i: (0, 0)),            # bo1
        pl.BlockSpec((1, DIM), lambda i: (0, 0)),            # wo2 row
        pl.BlockSpec((1, 1), lambda i: (0, 0)),              # bo2
    ]
    out = pl.pallas_call(
        _disc_kernel,
        out_shape=jax.ShapeDtypeStruct((n_pad, 1), jnp.float32),
        grid=grid,
        in_specs=in_specs,
        out_specs=pl.BlockSpec((tm, 1), lambda i: (i, 0)),
        compiler_params=pltpu.CompilerParams(
            dimension_semantics=("parallel",)),               # megacore on v7x
    )(x_pad, t_out, params['wmap'], params['bmap'],
      wres_bf, params['bres'], wo1_bf, params['bo1'], wo2_row, params['bo2'])

    return out[:n, :]                                        # [N, 1]


# --------------------------- pure-JAX reference ------------------------------
def reference_forward(params, x_t, t, x_tp1):
    n = x_t.shape[0]
    t_vec = jnp.full((n,), t, dtype=jnp.float32)
    t_emb = timestep_embedding(t_vec, TIME_EMBED_DIM)
    t_h = _leaky_relu(t_emb @ params['wt1'] + params['bt1'])
    t_out = t_h @ params['wt2'] + params['bt2']

    x_in = jnp.concatenate([x_t, x_tp1], axis=1)             # [N, 2]
    h = x_in @ params['wmap'] + params['bmap']
    for blk in range(NUM_RES_BLOCKS):
        r = h
        for lyr in range(LAYERS_PER_BLOCK):
            idx = blk * LAYERS_PER_BLOCK + lyr
            r = _leaky_relu(r @ params['wres'][idx] + params['bres'][idx])
        h = (h + r) / np.sqrt(2)

    o = _leaky_relu((h + t_out) @ params['wo1'] + params['bo1'])
    return o @ params['wo2'] + params['bo2']                 # [N, 1]


if __name__ == "__main__":
    key = jax.random.PRNGKey(0)
    kp = jax.random.fold_in(key, 0)
    params = init_params(kp)

    t = 3  # scalar int timestep, broadcast to the batch (timesteps_to_tensor)

    # batch=8: single small tile.  batch=384: exercises multi-tile grid with a
    # row-padded last tile (TM=256 -> N_pad=512, 2 grid steps).
    for batch in (8, 384):
        kx1, kx2 = jax.random.split(jax.random.fold_in(key, batch))
        # x_t / x_tp1 each carry one feature: cat([x_t, x_tp1], dim=1) -> [N,2]
        x_t = jax.random.normal(kx1, (batch, 1), jnp.float32)
        x_tp1 = jax.random.normal(kx2, (batch, 1), jnp.float32)

        out = toy_discriminator_forward(params, x_t, t, x_tp1)
        out = jax.block_until_ready(out)
        assert out.shape == (batch, 1)

        ref = reference_forward(params, x_t, t, x_tp1)
        np.testing.assert_allclose(np.asarray(out), np.asarray(ref),
                                   rtol=5e-2, atol=5e-2)

    print("KERNEL_OK")
</pallas_src>

<mosaic_0001>
module attributes {stable_mosaic.version = 11 : i64} {
  func.func @_disc_kernel(%arg0: i32, %arg1: memref<8x2xf32, #tpu.memory_space<vmem>>, %arg2: memref<1x512xf32, #tpu.memory_space<vmem>>, %arg3: memref<2x512xf32, #tpu.memory_space<vmem>>, %arg4: memref<1x512xf32, #tpu.memory_space<vmem>>, %arg5: memref<6x512x512xbf16, #tpu.memory_space<vmem>>, %arg6: memref<6x1x512xf32, #tpu.memory_space<vmem>>, %arg7: memref<512x512xbf16, #tpu.memory_space<vmem>>, %arg8: memref<1x512xf32, #tpu.memory_space<vmem>>, %arg9: memref<1x512xf32, #tpu.memory_space<vmem>>, %arg10: memref<1x1xf32, #tpu.memory_space<vmem>>, %arg11: memref<8x1xf32, #tpu.memory_space<vmem>>) attributes {dimension_semantics = [#tpu.dimension_semantics<parallel>], iteration_bounds = array<i64: 1>, scalar_prefetch = 0 : i64, scratch_operands = 0 : i64, tpu.core_type = #tpu.core_type<tc>, window_params = [{transform_indices = @transform_0, window_bounds = array<i64: 8, 2>}, {pipeline_mode = #tpu.pipeline_mode<synchronous>, transform_indices = @transform_1, window_bounds = array<i64: 1, 512>}, {pipeline_mode = #tpu.pipeline_mode<synchronous>, transform_indices = @transform_2, window_bounds = array<i64: 2, 512>}, {pipeline_mode = #tpu.pipeline_mode<synchronous>, transform_indices = @transform_3, window_bounds = array<i64: 1, 512>}, {pipeline_mode = #tpu.pipeline_mode<synchronous>, transform_indices = @transform_4, window_bounds = array<i64: 6, 512, 512>}, {pipeline_mode = #tpu.pipeline_mode<synchronous>, transform_indices = @transform_5, window_bounds = array<i64: 6, 1, 512>}, {pipeline_mode = #tpu.pipeline_mode<synchronous>, transform_indices = @transform_6, window_bounds = array<i64: 512, 512>}, {pipeline_mode = #tpu.pipeline_mode<synchronous>, transform_indices = @transform_7, window_bounds = array<i64: 1, 512>}, {pipeline_mode = #tpu.pipeline_mode<synchronous>, transform_indices = @transform_8, window_bounds = array<i64: 1, 512>}, {pipeline_mode = #tpu.pipeline_mode<synchronous>, transform_indices = @transform_9, window_bounds = array<i64: 1, 1>}, {transform_indices = @transform_10, window_bounds = array<i64: 8, 1>}]} {
    %c0 = arith.constant 0 : index
    %c0_0 = arith.constant 0 : index
    %0 = vector.load %arg1[%c0, %c0_0] : memref<8x2xf32, #tpu.memory_space<vmem>>, vector<8x2xf32>
    %1 = vector.extract_strided_slice %0 {offsets = [0, 0], sizes = [8, 1], strides = [1, 1]} : vector<8x2xf32> to vector<8x1xf32>
    %c0_1 = arith.constant 0 : index
    %c0_2 = arith.constant 0 : index
    %2 = vector.load %arg3[%c0_1, %c0_2] : memref<2x512xf32, #tpu.memory_space<vmem>>, vector<1x512xf32>
    %3 = vector.broadcast %1 : vector<8x1xf32> to vector<8x512xf32>
    %4 = vector.broadcast %2 : vector<1x512xf32> to vector<8x512xf32>
    %5 = arith.mulf %3, %4 : vector<8x512xf32>
    %6 = vector.extract_strided_slice %0 {offsets = [0, 1], sizes = [8, 1], strides = [1, 1]} : vector<8x2xf32> to vector<8x1xf32>
    %c1 = arith.constant 1 : index
    %c0_3 = arith.constant 0 : index
    %7 = vector.load %arg3[%c1, %c0_3] : memref<2x512xf32, #tpu.memory_space<vmem>>, vector<1x512xf32>
    %8 = vector.broadcast %6 : vector<8x1xf32> to vector<8x512xf32>
    %9 = vector.broadcast %7 : vector<1x512xf32> to vector<8x512xf32>
    %10 = arith.mulf %8, %9 : vector<8x512xf32>
    %11 = arith.addf %5, %10 : vector<8x512xf32>
    %c0_4 = arith.constant 0 : index
    %c0_5 = arith.constant 0 : index
    %12 = vector.load %arg4[%c0_4, %c0_5] : memref<1x512xf32, #tpu.memory_space<vmem>>, vector<1x512xf32>
    %13 = vector.broadcast %12 : vector<1x512xf32> to vector<8x512xf32>
    %14 = arith.addf %11, %13 : vector<8x512xf32>
    %15 = arith.truncf %14 : vector<8x512xf32> to vector<8x512xbf16>
    %c0_6 = arith.constant 0 : index
    %c0_7 = arith.constant 0 : index
    %c0_8 = arith.constant 0 : index
    %16 = vector.load %arg5[%c0_6, %c0_7, %c0_8] : memref<6x512x512xbf16, #tpu.memory_space<vmem>>, vector<1x512x512xbf16>
    %17 = vector.shape_cast %16 : vector<1x512x512xbf16> to vector<512x512xbf16>
    %cst = arith.constant dense<0.000000e+00> : vector<8x512xf32>
    %18 = tpu.matmul %15, %17, %cst {dimension_numbers = #tpu.dot_dimension_numbers<[1], [0], [0], [1], [0, 0, 1, 1], [], []>} : vector<8x512xbf16>, vector<512x512xbf16>, vector<8x512xf32> -> vector<8x512xf32>
    %c0_9 = arith.constant 0 : index
    %c0_10 = arith.constant 0 : index
    %c0_11 = arith.constant 0 : index
    %19 = vector.load %arg6[%c0_9, %c0_10, %c0_11] : memref<6x1x512xf32, #tpu.memory_space<vmem>>, vector<1x1x512xf32>
    %20 = vector.shape_cast %19 : vector<1x1x512xf32> to vector<1x512xf32>
    %21 = vector.broadcast %20 : vector<1x512xf32> to vector<8x512xf32>
    %22 = arith.addf %18, %21 : vector<8x512xf32>
    %cst_12 = arith.constant 0.000000e+00 : f32
    %23 = vector.broadcast %cst_12 : f32 to vector<8x512xf32>
    %24 = arith.cmpf oge, %22, %23 : vector<8x512xf32>
    %cst_13 = arith.constant 2.000000e-01 : f32
    %25 = vector.broadcast %cst_13 : f32 to vector<8x512xf32>
    %26 = arith.mulf %25, %22 : vector<8x512xf32>
    %27 = arith.select %24, %22, %26 : vector<8x512xi1>, vector<8x512xf32>
    %28 = arith.truncf %27 : vector<8x512xf32> to vector<8x512xbf16>
    %c1_14 = arith.constant 1 : index
    %c0_15 = arith.constant 0 : index
    %c0_16 = arith.constant 0 : index
    %29 = vector.load %arg5[%c1_14, %c0_15, %c0_16] : memref<6x512x512xbf16, #tpu.memory_space<vmem>>, vector<1x512x512xbf16>
    %30 = vector.shape_cast %29 : vector<1x512x512xbf16> to vector<512x512xbf16>
    %cst_17 = arith.constant dense<0.000000e+00> : vector<8x512xf32>
    %31 = tpu.matmul %28, %30, %cst_17 {dimension_numbers = #tpu.dot_dimension_numbers<[1], [0], [0], [1], [0, 0, 1, 1], [], []>} : vector<8x512xbf16>, vector<512x512xbf16>, vector<8x512xf32> -> vector<8x512xf32>
    %c1_18 = arith.constant 1 : index
    %c0_19 = arith.constant 0 : index
    %c0_20 = arith.constant 0 : index
    %32 = vector.load %arg6[%c1_18, %c0_19, %c0_20] : memref<6x1x512xf32, #tpu.memory_space<vmem>>, vector<1x1x512xf32>
    %33 = vector.shape_cast %32 : vector<1x1x512xf32> to vector<1x512xf32>
    %34 = vector.broadcast %33 : vector<1x512xf32> to vector<8x512xf32>
    %35 = arith.addf %31, %34 : vector<8x512xf32>
    %cst_21 = arith.constant 0.000000e+00 : f32
    %36 = vector.broadcast %cst_21 : f32 to vector<8x512xf32>
    %37 = arith.cmpf oge, %35, %36 : vector<8x512xf32>
    %cst_22 = arith.constant 2.000000e-01 : f32
    %38 = vector.broadcast %cst_22 : f32 to vector<8x512xf32>
    %39 = arith.mulf %38, %35 : vector<8x512xf32>
    %40 = arith.select %37, %35, %39 : vector<8x512xi1>, vector<8x512xf32>
    %41 = arith.truncf %40 : vector<8x512xf32> to vector<8x512xbf16>
    %c2 = arith.constant 2 : index
    %c0_23 = arith.constant 0 : index
    %c0_24 = arith.constant 0 : index
    %42 = vector.load %arg5[%c2, %c0_23, %c0_24] : memref<6x512x512xbf16, #tpu.memory_space<vmem>>, vector<1x512x512xbf16>
    %43 = vector.shape_cast %42 : vector<1x512x512xbf16> to vector<512x512xbf16>
    %cst_25 = arith.constant dense<0.000000e+00> : vector<8x512xf32>
    %44 = tpu.matmul %41, %43, %cst_25 {dimension_numbers = #tpu.dot_dimension_numbers<[1], [0], [0], [1], [0, 0, 1, 1], [], []>} : vector<8x512xbf16>, vector<512x512xbf16>, vector<8x512xf32> -> vector<8x512xf32>
    %c2_26 = arith.constant 2 : index
    %c0_27 = arith.constant 0 : index
    %c0_28 = arith.constant 0 : index
    %45 = vector.load %arg6[%c2_26, %c0_27, %c0_28] : memref<6x1x512xf32, #tpu.memory_space<vmem>>, vector<1x1x512xf32>
    %46 = vector.shape_cast %45 : vector<1x1x512xf32> to vector<1x512xf32>
    %47 = vector.broadcast %46 : vector<1x512xf32> to vector<8x512xf32>
    %48 = arith.addf %44, %47 : vector<8x512xf32>
    %cst_29 = arith.constant 0.000000e+00 : f32
    %49 = vector.broadcast %cst_29 : f32 to vector<8x512xf32>
    %50 = arith.cmpf oge, %48, %49 : vector<8x512xf32>
    %cst_30 = arith.constant 2.000000e-01 : f32
    %51 = vector.broadcast %cst_30 : f32 to vector<8x512xf32>
    %52 = arith.mulf %51, %48 : vector<8x512xf32>
    %53 = arith.select %50, %48, %52 : vector<8x512xi1>, vector<8x512xf32>
    %54 = arith.addf %14, %53 : vector<8x512xf32>
    %cst_31 = arith.constant 0.707106769 : f32
    %55 = vector.broadcast %cst_31 : f32 to vector<8x512xf32>
    %56 = arith.mulf %54, %55 : vector<8x512xf32>
    %57 = arith.truncf %56 : vector<8x512xf32> to vector<8x512xbf16>
    %c3 = arith.constant 3 : index
    %c0_32 = arith.constant 0 : index
    %c0_33 = arith.constant 0 : index
    %58 = vector.load %arg5[%c3, %c0_32, %c0_33] : memref<6x512x512xbf16, #tpu.memory_space<vmem>>, vector<1x512x512xbf16>
    %59 = vector.shape_cast %58 : vector<1x512x512xbf16> to vector<512x512xbf16>
    %cst_34 = arith.constant dense<0.000000e+00> : vector<8x512xf32>
    %60 = tpu.matmul %57, %59, %cst_34 {dimension_numbers = #tpu.dot_dimension_numbers<[1], [0], [0], [1], [0, 0, 1, 1], [], []>} : vector<8x512xbf16>, vector<512x512xbf16>, vector<8x512xf32> -> vector<8x512xf32>
    %c3_35 = arith.constant 3 : index
    %c0_36 = arith.constant 0 : index
    %c0_37 = arith.constant 0 : index
    %61 = vector.load %arg6[%c3_35, %c0_36, %c0_37] : memref<6x1x512xf32, #tpu.memory_space<vmem>>, vector<1x1x512xf32>
    %62 = vector.shape_cast %61 : vector<1x1x512xf32> to vector<1x512xf32>
    %63 = vector.broadcast %62 : vector<1x512xf32> to vector<8x512xf32>
    %64 = arith.addf %60, %63 : vector<8x512xf32>
    %cst_38 = arith.constant 0.000000e+00 : f32
    %65 = vector.broadcast %cst_38 : f32 to vector<8x512xf32>
    %66 = arith.cmpf oge, %64, %65 : vector<8x512xf32>
    %cst_39 = arith.constant 2.000000e-01 : f32
    %67 = vector.broadcast %cst_39 : f32 to vector<8x512xf32>
    %68 = arith.mulf %67, %64 : vector<8x512xf32>
    %69 = arith.select %66, %64, %68 : vector<8x512xi1>, vector<8x512xf32>
    %70 = arith.truncf %69 : vector<8x512xf32> to vector<8x512xbf16>
    %c4 = arith.constant 4 : index
    %c0_40 = arith.constant 0 : index
    %c0_41 = arith.constant 0 : index
    %71 = vector.load %arg5[%c4, %c0_40, %c0_41] : memref<6x512x512xbf16, #tpu.memory_space<vmem>>, vector<1x512x512xbf16>
    %72 = vector.shape_cast %71 : vector<1x512x512xbf16> to vector<512x512xbf16>
    %cst_42 = arith.constant dense<0.000000e+00> : vector<8x512xf32>
    %73 = tpu.matmul %70, %72, %cst_42 {dimension_numbers = #tpu.dot_dimension_numbers<[1], [0], [0], [1], [0, 0, 1, 1], [], []>} : vector<8x512xbf16>, vector<512x512xbf16>, vector<8x512xf32> -> vector<8x512xf32>
    %c4_43 = arith.constant 4 : index
    %c0_44 = arith.constant 0 : index
    %c0_45 = arith.constant 0 : index
    %74 = vector.load %arg6[%c4_43, %c0_44, %c0_45] : memref<6x1x512xf32, #tpu.memory_space<vmem>>, vector<1x1x512xf32>
    %75 = vector.shape_cast %74 : vector<1x1x512xf32> to vector<1x512xf32>
    %76 = vector.broadcast %75 : vector<1x512xf32> to vector<8x512xf32>
    %77 = arith.addf %73, %76 : vector<8x512xf32>
    %cst_46 = arith.constant 0.000000e+00 : f32
    %78 = vector.broadcast %cst_46 : f32 to vector<8x512xf32>
    %79 = arith.cmpf oge, %77, %78 : vector<8x512xf32>
    %cst_47 = arith.constant 2.000000e-01 : f32
    %80 = vector.broadcast %cst_47 : f32 to vector<8x512xf32>
    %81 = arith.mulf %80, %77 : vector<8x512xf32>
    %82 = arith.select %79, %77, %81 : vector<8x512xi1>, vector<8x512xf32>
    %83 = arith.truncf %82 : vector<8x512xf32> to vector<8x512xbf16>
    %c5 = arith.constant 5 : index
    %c0_48 = arith.constant 0 : index
    %c0_49 = arith.constant 0 : index
    %84 = vector.load %arg5[%c5, %c0_48, %c0_49] : memref<6x512x512xbf16, #tpu.memory_space<vmem>>, vector<1x512x512xbf16>
    %85 = vector.shape_cast %84 : vector<1x512x512xbf16> to vector<512x512xbf16>
    %cst_50 = arith.constant dense<0.000000e+00> : vector<8x512xf32>
    %86 = tpu.matmul %83, %85, %cst_50 {dimension_numbers = #tpu.dot_dimension_numbers<[1], [0], [0], [1], [0, 0, 1, 1], [], []>} : vector<8x512xbf16>, vector<512x512xbf16>, vector<8x512xf32> -> vector<8x512xf32>
    %c5_51 = arith.constant 5 : index
    %c0_52 = arith.constant 0 : index
    %c0_53 = arith.constant 0 : index
    %87 = vector.load %arg6[%c5_51, %c0_52, %c0_53] : memref<6x1x512xf32, #tpu.memory_space<vmem>>, vector<1x1x512xf32>
    %88 = vector.shape_cast %87 : vector<1x1x512xf32> to vector<1x512xf32>
    %89 = vector.broadcast %88 : vector<1x512xf32> to vector<8x512xf32>
    %90 = arith.addf %86, %89 : vector<8x512xf32>
    %cst_54 = arith.constant 0.000000e+00 : f32
    %91 = vector.broadcast %cst_54 : f32 to vector<8x512xf32>
    %92 = arith.cmpf oge, %90, %91 : vector<8x512xf32>
    %cst_55 = arith.constant 2.000000e-01 : f32
    %93 = vector.broadcast %cst_55 : f32 to vector<8x512xf32>
    %94 = arith.mulf %93, %90 : vector<8x512xf32>
    %95 = arith.select %92, %90, %94 : vector<8x512xi1>, vector<8x512xf32>
    %96 = arith.addf %56, %95 : vector<8x512xf32>
    %cst_56 = arith.constant 0.707106769 : f32
    %97 = vector.broadcast %cst_56 : f32 to vector<8x512xf32>
    %98 = arith.mulf %96, %97 : vector<8x512xf32>
    %c0_57 = arith.constant 0 : index
    %c0_58 = arith.constant 0 : index
    %99 = vector.load %arg2[%c0_57, %c0_58] : memref<1x512xf32, #tpu.memory_space<vmem>>, vector<1x512xf32>
    %100 = vector.broadcast %99 : vector<1x512xf32> to vector<8x512xf32>
    %101 = arith.addf %98, %100 : vector<8x512xf32>
    %102 = arith.truncf %101 : vector<8x512xf32> to vector<8x512xbf16>
    %c0_59 = arith.constant 0 : index
    %c0_60 = arith.constant 0 : index
    %103 = vector.load %arg7[%c0_59, %c0_60] : memref<512x512xbf16, #tpu.memory_space<vmem>>, vector<512x512xbf16>
    %cst_61 = arith.constant dense<0.000000e+00> : vector<8x512xf32>
    %104 = tpu.matmul %102, %103, %cst_61 {dimension_numbers = #tpu.dot_dimension_numbers<[1], [0], [0], [1], [0, 0, 1, 1], [], []>} : vector<8x512xbf16>, vector<512x512xbf16>, vector<8x512xf32> -> vector<8x512xf32>
    %c0_62 = arith.constant 0 : index
    %c0_63 = arith.constant 0 : index
    %105 = vector.load %arg8[%c0_62, %c0_63] : memref<1x512xf32, #tpu.memory_space<vmem>>, vector<1x512xf32>
    %106 = vector.broadcast %105 : vector<1x512xf32> to vector<8x512xf32>
    %107 = arith.addf %104, %106 : vector<8x512xf32>
    %cst_64 = arith.constant 0.000000e+00 : f32
    %108 = vector.broadcast %cst_64 : f32 to vector<8x512xf32>
    %109 = arith.cmpf oge, %107, %108 : vector<8x512xf32>
    %cst_65 = arith.constant 2.000000e-01 : f32
    %110 = vector.broadcast %cst_65 : f32 to vector<8x512xf32>
    %111 = arith.mulf %110, %107 : vector<8x512xf32>
    %112 = arith.select %109, %107, %111 : vector<8x512xi1>, vector<8x512xf32>
    %c0_66 = arith.constant 0 : index
    %c0_67 = arith.constant 0 : index
    %113 = vector.load %arg9[%c0_66, %c0_67] : memref<1x512xf32, #tpu.memory_space<vmem>>, vector<1x512xf32>
    %114 = vector.broadcast %113 : vector<1x512xf32> to vector<8x512xf32>
    %115 = arith.mulf %112, %114 : vector<8x512xf32>
    %cst_68 = arith.constant dense<0.000000e+00> : vector<8xf32>
    %116 = vector.multi_reduction <add>, %115, %cst_68 [1] : vector<8x512xf32> to vector<8xf32>
    %117 = vector.shape_cast %116 : vector<8xf32> to vector<8x1xf32>
    %c0_69 = arith.constant 0 : index
    %c0_70 = arith.constant 0 : index
    %118 = vector.load %arg10[%c0_69, %c0_70] : memref<1x1xf32, #tpu.memory_space<vmem>>, vector<1x1xf32>
    %119 = vector.broadcast %118 : vector<1x1xf32> to vector<8x1xf32>
    %120 = arith.addf %117, %119 : vector<8x1xf32>
    %c0_71 = arith.constant 0 : index
    %c0_72 = arith.constant 0 : index
    %121 = vector.load %arg11[%c0_71, %c0_72] : memref<8x1xf32, #tpu.memory_space<vmem>>, vector<8x1xf32>
    tpu.vector_store %arg11[%c0_71, %c0_72], %120 {strides = array<i32>} : memref<8x1xf32, #tpu.memory_space<vmem>>, vector<8x1xf32>,
    return
  }
  func.func @transform_0(%arg0: i32) -> (i32, i32) {
    %c0_i32 = arith.constant 0 : i32
    %c0_i32_0 = arith.constant 0 : i32
    return %arg0, %c0_i32 : i32, i32
  }
  func.func @transform_1(%arg0: i32) -> (i32, i32) {
    %c0_i32 = arith.constant 0 : i32
    %c0_i32_0 = arith.constant 0 : i32
    %c0_i32_1 = arith.constant 0 : i32
    return %c0_i32, %c0_i32_0 : i32, i32
  }
  func.func @transform_2(%arg0: i32) -> (i32, i32) {
    %c0_i32 = arith.constant 0 : i32
    %c0_i32_0 = arith.constant 0 : i32
    %c0_i32_1 = arith.constant 0 : i32
    return %c0_i32, %c0_i32_0 : i32, i32
  }
  func.func @transform_3(%arg0: i32) -> (i32, i32) {
    %c0_i32 = arith.constant 0 : i32
    %c0_i32_0 = arith.constant 0 : i32
    %c0_i32_1 = arith.constant 0 : i32
    return %c0_i32, %c0_i32_0 : i32, i32
  }
  func.func @transform_4(%arg0: i32) -> (i32, i32, i32) {
    %c0_i32 = arith.constant 0 : i32
    %c0_i32_0 = arith.constant 0 : i32
    %c0_i32_1 = arith.constant 0 : i32
    %c0_i32_2 = arith.constant 0 : i32
    return %c0_i32, %c0_i32_0, %c0_i32_1 : i32, i32, i32
  }
  func.func @transform_5(%arg0: i32) -> (i32, i32, i32) {
    %c0_i32 = arith.constant 0 : i32
    %c0_i32_0 = arith.constant 0 : i32
    %c0_i32_1 = arith.constant 0 : i32
    %c0_i32_2 = arith.constant 0 : i32
    return %c0_i32, %c0_i32_0, %c0_i32_1 : i32, i32, i32
  }
  func.func @transform_6(%arg0: i32) -> (i32, i32) {
    %c0_i32 = arith.constant 0 : i32
    %c0_i32_0 = arith.constant 0 : i32
    %c0_i32_1 = arith.constant 0 : i32
    return %c0_i32, %c0_i32_0 : i32, i32
  }
  func.func @transform_7(%arg0: i32) -> (i32, i32) {
    %c0_i32 = arith.constant 0 : i32
    %c0_i32_0 = arith.constant 0 : i32
    %c0_i32_1 = arith.constant 0 : i32
    return %c0_i32, %c0_i32_0 : i32, i32
  }
  func.func @transform_8(%arg0: i32) -> (i32, i32) {
    %c0_i32 = arith.constant 0 : i32
    %c0_i32_0 = arith.constant 0 : i32
    %c0_i32_1 = arith.constant 0 : i32
    return %c0_i32, %c0_i32_0 : i32, i32
  }
  func.func @transform_9(%arg0: i32) -> (i32, i32) {
    %c0_i32 = arith.constant 0 : i32
    %c0_i32_0 = arith.constant 0 : i32
    %c0_i32_1 = arith.constant 0 : i32
    return %c0_i32, %c0_i32_0 : i32, i32
  }
  func.func @transform_10(%arg0: i32) -> (i32, i32) {
    %c0_i32 = arith.constant 0 : i32
    %c0_i32_0 = arith.constant 0 : i32
    return %arg0, %c0_i32 : i32, i32
  }
}

</mosaic_0001>

<bundles_post_ra>
// kernel: tpu_custom_call.1
= control target key start
LH: loop header
LB: loop body
LE: loop exit
PB: predicated region body
PF: predicated region fallthrough
CT: control target
= control target key end

     0   :  { %s9981_s0 = inlined_call_operand.vmem [shape: f32[8,2], index: 0, kind: input, shape index: {}]   ;;  %s9982_s1 = inlined_call_operand.hbm [shape: f32[1,512], index: 1, kind: input, shape index: {}]   ;;  %s9983_s2 = inlined_call_operand.hbm [shape: f32[2,512], index: 2, kind: input, shape index: {}]   ;;  %s9984_s3 = inlined_call_operand.hbm [shape: f32[1,512], index: 3, kind: input, shape index: {}]   ;;  %s9985_s4 = inlined_call_operand.hbm [shape: bf16[6,512,512], index: 4, kind: input, shape index: {}]   ;;  %s9986_s5 = inlined_call_operand.hbm [shape: f32[6,1,512], index: 5, kind: input, shape index: {}]   ;;  %s9987_s6 = inlined_call_operand.hbm [shape: bf16[512,512], index: 6, kind: input, shape index: {}]   ;;  %s9988_s7 = inlined_call_operand.hbm [shape: f32[1,512], index: 7, kind: input, shape index: {}]   ;;  %s9989_s8 = inlined_call_operand.hbm [shape: f32[1,512], index: 8, kind: input, shape index: {}]   ;;  %s9990_s9 = inlined_call_operand.<no memory space> [shape: f32[1,1], index: 9, kind: input, shape index: {}]   ;;  %s9991_s10 = inlined_call_operand.vmem [shape: f32[8,1], index: 10, kind: output, shape index: {}]  }
   0x1   :  { %v15_v0 = vstv %s9990_s9 }
   0x2   :  { %16 = vst [vmem:[#allocation2] sm:$0x1] %v15_v0 }
   0x3   :  { %17 = vsyncpa [#allocation4], 0 }
   0x4   :  { %18 = vsyncpa [#allocation6], 0 }
   0x5   :  { %19 = vsyncpa [#allocation9], 0 }
   0x6   :  { %20 = vsyncpa [#allocation12], 0 }
   0x7   :  { %21 = vsyncpa [#allocation15], 0  ;;  %s9648_s15 = smov [#allocation5]   ;;  %s9649_s17 = smov [#allocation8]  }
   0x8   :  { %s40_s16 = sshll.u32 %s9648_s15, 4  ;;  %s59_s18 = sshll.u32 %s9649_s17, 4  ;;  %s41_s16 = int_to_ptr.vmem [resolvable:$true] %s40_s16  ;;  %s9720_s18 = int_to_ptr.vmem [resolvable:$true] %s59_s18 }
   0x9   :  { %s9462_s21 = scalar_lea.hbm %s9983_s2, 128 }
   0xa   :  { %p9463_p0 = scmp.ne.s32.totalorder %s9983_s2, %s9462_s21  ;;  %p9466_p1 = scmp.lt.u32.totalorder %s9462_s21, %s9983_s2 }
   0xc   :  { %p9468_p2 = pnand %p9466_p1, %p9463_p0 }
   0xe   :  { %9471 = shalt.err (!%p9468_p2)
}
   0xf   :  { %s9472_s25 = scalar_lea.vmem %s41_s16, 128  ;;  %p9477_p4 = scmp.lt.s32.totalorder %s41_s16, %s41_s16 }
  0x10   :  { %p9473_p3 = scmp.ne.s32.totalorder %s41_s16, %s9472_s25  ;;  %p9478_p5 = scmp.lt.s32.totalorder %s9472_s25, %s9472_s25 }
  0x12   :  { %p9479_p6 = por %p9478_p5, %p9477_p4 }
  0x14   :  { %p9480_p7 = pnand %p9479_p6, %p9473_p3 }
  0x16   :  { %9483 = shalt.err (!%p9480_p7)
}
  0x17   :  { %43 = dma.hbm_to_vmem [thread:$0]  %s9983_s2, 128, %s41_s16, [#allocation6]  }
  0x18   :  { %s9484_s30 = scalar_lea.hbm %s9985_s4, 98304 }
  0x19   :  { %p9485_p8 = scmp.ne.s32.totalorder %s9985_s4, %s9484_s30  ;;  %p9488_p9 = scmp.lt.u32.totalorder %s9484_s30, %s9985_s4 }
  0x1b   :  { %p9490_p10 = pnand %p9488_p9, %p9485_p8 }
  0x1d   :  { %9493 = shalt.err (!%p9490_p10)
}
  0x1e   :  { %s9494_s15 = scalar_lea.vmem %s9720_s18, 98304  ;;  %p9499_p12 = scmp.lt.s32.totalorder %s9720_s18, %s9720_s18 }
  0x1f   :  { %p9495_p11 = scmp.ne.s32.totalorder %s9720_s18, %s9494_s15  ;;  %p9500_p13 = scmp.lt.s32.totalorder %s9494_s15, %s9494_s15 }
  0x21   :  { %p9501_p0 = por %p9500_p13, %p9499_p12 }
  0x23   :  { %p9502_p1 = pnand %p9501_p0, %p9495_p11 }
  0x25   :  { %9505 = shalt.err (!%p9502_p1)
}
  0x26   :  { %s9650_s2 = smov 256   ;;  %s9651_s16 = smov 16  }
  0x27   :  { %65 = dma.hbm_to_vmem [thread:$0]  %s9985_s4, 98304, %s9720_s18, [#allocation9], %s9650_s2, %s9650_s2, %s9651_s16  }
  0x28   :  { %s9652_s20 = smov [#allocation11]   ;;  %s9653_s22 = smov [#allocation3]  }
  0x29   :  { %s83_s21 = sshll.u32 %s9652_s20, 4  ;;  %s30_s23 = sshll.u32 %s9653_s22, 4  ;;  %s84_s21 = int_to_ptr.vmem [resolvable:$true] %s83_s21  ;;  %s31_s23 = int_to_ptr.vmem [resolvable:$true] %s30_s23 }
  0x2a   :  { %s9506_s25 = scalar_lea.hbm %s9987_s6, 16384 }
  0x2b   :  { %p9507_p2 = scmp.ne.s32.totalorder %s9987_s6, %s9506_s25  ;;  %p9510_p3 = scmp.lt.u32.totalorder %s9506_s25, %s9987_s6 }
  0x2d   :  { %p9512_p4 = pnand %p9510_p3, %p9507_p2 }
  0x2f   :  { %9515 = shalt.err (!%p9512_p4)
}
  0x30   :  { %s9516_s4 = scalar_lea.vmem %s84_s21, 16384  ;;  %p9521_p6 = scmp.lt.s32.totalorder %s84_s21, %s84_s21 }
  0x31   :  { %p9517_p5 = scmp.ne.s32.totalorder %s84_s21, %s9516_s4  ;;  %p9522_p7 = scmp.lt.s32.totalorder %s9516_s4, %s9516_s4 }
  0x33   :  { %p9523_p8 = por %p9522_p7, %p9521_p6 }
  0x35   :  { %p9524_p9 = pnand %p9523_p8, %p9517_p5 }
  0x37   :  { %9527 = shalt.err (!%p9524_p9)
}
  0x38   :  { %89 = dma.hbm_to_vmem [thread:$0]  %s9987_s6, 16384, %s84_s21, [#allocation12], %s9650_s2, %s9650_s2, %s9651_s16  }
  0x39   :  { %s9528_s13 = scalar_lea.hbm %s9982_s1, 64 }
  0x3a   :  { %p9529_p10 = scmp.ne.s32.totalorder %s9982_s1, %s9528_s13  ;;  %p9532_p11 = scmp.lt.u32.totalorder %s9528_s13, %s9982_s1 }
  0x3c   :  { %p9534_p12 = pnand %p9532_p11, %p9529_p10 }
  0x3e   :  { %9537 = shalt.err (!%p9534_p12)
}
  0x3f   :  { %s9538_s20 = scalar_lea.vmem %s31_s23, 64  ;;  %p9543_p0 = scmp.lt.s32.totalorder %s31_s23, %s31_s23 }
  0x40   :  { %p9539_p13 = scmp.ne.s32.totalorder %s31_s23, %s9538_s20  ;;  %p9544_p1 = scmp.lt.s32.totalorder %s9538_s20, %s9538_s20 }
  0x42   :  { %p9545_p2 = por %p9544_p1, %p9543_p0 }
  0x44   :  { %p9546_p3 = pnand %p9545_p2, %p9539_p13 }
  0x46   :  { %9549 = shalt.err (!%p9546_p3)
}
  0x47   :  { %33 = dma.hbm_to_vmem [thread:$0]  %s9982_s1, 64, %s31_s23, [#allocation4]  }
  0x48   :  { %s9654_s16 = smov [#allocation7]   ;;  %s9655_s22 = smov [#allocation10]  }
  0x49   :  { %s50_s21 = sshll.u32 %s9654_s16, 4  ;;  %s71_s9 = sshll.u32 %s9655_s22, 4  ;;  %s51_s21 = int_to_ptr.vmem [resolvable:$true] %s50_s21  ;;  %s9775_s9 = int_to_ptr.vmem [resolvable:$true] %s71_s9 }
  0x4a   :  { %s9550_s26 = scalar_lea.hbm %s9984_s3, 64 }
  0x4b   :  { %p9551_p4 = scmp.ne.s32.totalorder %s9984_s3, %s9550_s26  ;;  %p9554_p5 = scmp.lt.u32.totalorder %s9550_s26, %s9984_s3 }
  0x4d   :  { %p9556_p6 = pnand %p9554_p5, %p9551_p4 }
  0x4f   :  { %9559 = shalt.err (!%p9556_p6)
}
  0x50   :  { %s9560_s1 = scalar_lea.vmem %s51_s21, 64  ;;  %p9565_p8 = scmp.lt.s32.totalorder %s51_s21, %s51_s21 }
  0x51   :  { %p9561_p7 = scmp.ne.s32.totalorder %s51_s21, %s9560_s1  ;;  %p9566_p9 = scmp.lt.s32.totalorder %s9560_s1, %s9560_s1 }
  0x53   :  { %p9567_p10 = por %p9566_p9, %p9565_p8 }
  0x55   :  { %p9568_p11 = pnand %p9567_p10, %p9561_p7 }
  0x57   :  { %9571 = shalt.err (!%p9568_p11)
}
  0x58   :  { %53 = dma.hbm_to_vmem [thread:$0]  %s9984_s3, 64, %s51_s21, [#allocation6]  }
  0x59   :  { %s9572_s12 = scalar_lea.hbm %s9986_s5, 384 }
  0x5a   :  { %p9573_p12 = scmp.ne.s32.totalorder %s9986_s5, %s9572_s12  ;;  %p9576_p13 = scmp.lt.u32.totalorder %s9572_s12, %s9986_s5 }
  0x5c   :  { %p9578_p0 = pnand %p9576_p13, %p9573_p12 }
  0x5e   :  { %9581 = shalt.err (!%p9578_p0)
}
  0x5f   :  { %s9582_s19 = scalar_lea.vmem %s9775_s9, 384  ;;  %p9587_p2 = scmp.lt.s32.totalorder %s9775_s9, %s9775_s9 }
  0x60   :  { %p9583_p1 = scmp.ne.s32.totalorder %s9775_s9, %s9582_s19  ;;  %p9588_p3 = scmp.lt.s32.totalorder %s9582_s19, %s9582_s19 }
  0x62   :  { %p9589_p4 = por %p9588_p3, %p9587_p2 }
  0x64   :  { %p9590_p5 = pnand %p9589_p4, %p9583_p1 }
  0x66   :  { %9593 = shalt.err (!%p9590_p5)
}
  0x67   :  { %s9656_s3 = smov 64   ;;  %s9657_s20 = smov 4  }
  0x68   :  { %77 = dma.hbm_to_vmem [thread:$0]  %s9986_s5, 384, %s9775_s9, [#allocation9], %s9656_s3, %s9656_s3, %s9657_s20  }
  0x69   :  { %s9658_s16 = smov [#allocation13]   ;;  %s9659_s22 = smov [#allocation14]  }
  0x6a   :  { %s96_s21 = sshll.u32 %s9658_s16, 4  ;;  %s106_s24 = sshll.u32 %s9659_s22, 4  ;;  %s97_s21 = int_to_ptr.vmem [resolvable:$true] %s96_s21  ;;  %s107_s24 = int_to_ptr.vmem [resolvable:$true] %s106_s24 }
  0x6b   :  { %s9594_s27 = scalar_lea.hbm %s9988_s7, 64 }
  0x6c   :  { %p9595_p6 = scmp.ne.s32.totalorder %s9988_s7, %s9594_s27  ;;  %p9598_p7 = scmp.lt.u32.totalorder %s9594_s27, %s9988_s7 }
  0x6e   :  { %p9600_p8 = pnand %p9598_p7, %p9595_p6 }
  0x70   :  { %9603 = shalt.err (!%p9600_p8)
}
  0x71   :  { %s9604_s5 = scalar_lea.vmem %s97_s21, 64  ;;  %p9609_p10 = scmp.lt.s32.totalorder %s97_s21, %s97_s21 }
  0x72   :  { %p9605_p9 = scmp.ne.s32.totalorder %s97_s21, %s9604_s5  ;;  %p9610_p11 = scmp.lt.s32.totalorder %s9604_s5, %s9604_s5 }
  0x74   :  { %p9611_p12 = por %p9610_p11, %p9609_p10 }
  0x76   :  { %p9612_p13 = pnand %p9611_p12, %p9605_p9 }
  0x78   :  { %9615 = shalt.err (!%p9612_p13)
}
  0x79   :  { %99 = dma.hbm_to_vmem [thread:$0]  %s9988_s7, 64, %s97_s21, [#allocation12]  }
  0x7a   :  { %s9616_s11 = scalar_lea.hbm %s9989_s8, 64 }
  0x7b   :  { %p9617_p0 = scmp.ne.s32.totalorder %s9989_s8, %s9616_s11  ;;  %p9620_p1 = scmp.lt.u32.totalorder %s9616_s11, %s9989_s8 }
  0x7d   :  { %p9622_p2 = pnand %p9620_p1, %p9617_p0 }
  0x7f   :  { %9625 = shalt.err (!%p9622_p2)
}
  0x80   :  { %s9626_s17 = scalar_lea.vmem %s107_s24, 64  ;;  %p9631_p4 = scmp.lt.s32.totalorder %s107_s24, %s107_s24 }
  0x81   :  { %p9627_p3 = scmp.ne.s32.totalorder %s107_s24, %s9626_s17  ;;  %p9632_p5 = scmp.lt.s32.totalorder %s9626_s17, %s9626_s17 }
  0x83   :  { %p9633_p6 = por %p9632_p5, %p9631_p4 }
  0x85   :  { %p9634_p7 = pnand %p9633_p6, %p9627_p3 }
  0x87   :  { %9637 = shalt.err (!%p9634_p7)
}
  0x88   :  { %109 = dma.hbm_to_vmem [thread:$0]  %s9989_s8, 64, %s107_s24, [#allocation15]  }
  0x89   :  { %9638 = dma.done.wait [#allocation4], 64  }
  0x8a   :  { %9639 = vsyncadd [#allocation4], 4294967232 }
  0x8b   :  { %9640 = dma.done.wait [#allocation6], 192  }
  0x8c   :  { %9641 = vsyncadd [#allocation6], 4294967104 }
  0x8d   :  { %9642 = dma.done.wait [#allocation9], 98688  }
  0x8e   :  { %9643 = vsyncadd [#allocation9], 4294868608 }
  0x8f   :  { %9644 = dma.done.wait [#allocation12], 16448  }
  0x90   :  { %9645 = vsyncadd [#allocation12], 4294950848 }
  0x91   :  { %9646 = dma.done.wait [#allocation15], 64  }
  0x92   :  { %9647 = vsyncadd [#allocation15], 4294967232  ;;  %v9660_v1 = vmov 0   ;;  %v136_v2 = vld [vmem:[%s9981_s0] sm:$0xff]  ;;  %v8123_v6 = vld [vmem:[#allocation8 + $0x8] ss:$16 sps:$4 sm:$0xff]  }
  0x93   :  { %8116 = vset.pattern.permute.xlu0 %v9660_v1  ;;  %v8118_v3 = vld [vmem:[#allocation8 + $0x4] ss:$16 sps:$4 sm:$0xff]   ;;  %v8120_v4 = vld [vmem:[#allocation8 + $0xc] ss:$16 sps:$4 sm:$0xff]   ;;  %v8122_v5 = vld [vmem:[#allocation8] ss:$16 sps:$4 sm:$0xff]  }
  0x94   :  { %140 = vperm.xlu0 %8116, %v136_v2   ;;  %1023 = vmatprep.subr.bf16.mxu0 %v8118_v3  ;;  %v8124_v7 = vld [vmem:[#allocation8 + $0x24] ss:$16 sps:$4 sm:$0xff]   ;;  %v8126_v8 = vld [vmem:[#allocation8 + $0x2c] ss:$16 sps:$4 sm:$0xff]   ;;  %v9661_v9 = vmov 1  }
  0x95   :  { %1105 = vmatprep.subr.bf16.mxu1 %v8120_v4  ;;  %1024 = vmatpush1.bf16.msra.mxu0 %v8122_v5  ;;  %v8128_v10 = vld [vmem:[#allocation8 + $0x20] ss:$16 sps:$4 sm:$0xff]   ;;  %v8129_v11 = vld [vmem:[#allocation8 + $0x28] ss:$16 sps:$4 sm:$0xff]   ;;  %v8130_v12 = vld [vmem:[#allocation8 + $0x44] ss:$16 sps:$4 sm:$0xff]  }
  0x96   :  { %1106 = vmatpush1.bf16.msra.mxu1 %v8123_v6  ;;  %1025 = vmatprep.subr.bf16.mxu0 %v8124_v7  ;;  %v8132_v13 = vld [vmem:[#allocation8 + $0x4c] ss:$16 sps:$4 sm:$0xff]   ;;  %v8134_v14 = vld [vmem:[#allocation8 + $0x40] ss:$16 sps:$4 sm:$0xff]   ;;  %v8135_v15 = vld [vmem:[#allocation8 + $0x48] ss:$16 sps:$4 sm:$0xff]   ;;  %v144_v6 = vlaneseq }
  0x97   :  { %1107 = vmatprep.subr.bf16.mxu1 %v8126_v8  ;;  %v8136_v16 = vld [vmem:[#allocation8 + $0x64] ss:$16 sps:$4 sm:$0xff]   ;;  %v8138_v17 = vld [vmem:[#allocation8 + $0x6c] ss:$16 sps:$4 sm:$0xff]   ;;  %v8140_v18 = vld [vmem:[#allocation8 + $0x60] ss:$16 sps:$4 sm:$0xff]  }
  0x98   :  { %8117 = vset.pattern.permute.xlu0 %v9661_v9  ;;  %v8141_v19 = vld [vmem:[#allocation8 + $0x68] ss:$16 sps:$4 sm:$0xff]   ;;  %v8142_v20 = vld [vmem:[#allocation8 + $0x84] ss:$16 sps:$4 sm:$0xff]   ;;  %v8144_v21 = vld [vmem:[#allocation8 + $0x8c] ss:$16 sps:$4 sm:$0xff]  }
  0x99   :  { %171 = vperm.xlu0 %8117, %v136_v2   ;;  %1026 = vmatpush1.bf16.msra.mxu0 %v8128_v10  ;;  %v8146_v22 = vld [vmem:[#allocation8 + $0x80] ss:$16 sps:$4 sm:$0xff]   ;;  %v8147_v23 = vld [vmem:[#allocation8 + $0x88] ss:$16 sps:$4 sm:$0xff]   ;;  %v8148_v24 = vld [vmem:[#allocation8 + $0xa4] ss:$16 sps:$4 sm:$0xff]  }
  0x9a   :  { %1108 = vmatpush1.bf16.msra.mxu1 %v8129_v11  ;;  %1027 = vmatprep.subr.bf16.mxu0 %v8130_v12  ;;  %v8150_v25 = vld [vmem:[#allocation8 + $0xac] ss:$16 sps:$4 sm:$0xff]   ;;  %v8152_v26 = vld [vmem:[#allocation8 + $0xa0] ss:$16 sps:$4 sm:$0xff]   ;;  %v8153_v27 = vld [vmem:[#allocation8 + $0xa8] ss:$16 sps:$4 sm:$0xff]  }
  0x9b   :  { %1109 = vmatprep.subr.bf16.mxu1 %v8132_v13  ;;  %v8154_v28 = vld [vmem:[#allocation8 + $0xc4] ss:$16 sps:$4 sm:$0xff]   ;;  %v8156_v29 = vld [vmem:[#allocation8 + $0xcc] ss:$16 sps:$4 sm:$0xff]   ;;  %v8158_v30 = vld [vmem:[#allocation8 + $0xc0] ss:$16 sps:$4 sm:$0xff]  }
  0x9c   :  { %v8159_v31 = vld [vmem:[#allocation8 + $0xc8] ss:$16 sps:$4 sm:$0xff]   ;;  %v8160_v32 = vld [vmem:[#allocation8 + $0xe4] ss:$16 sps:$4 sm:$0xff]   ;;  %v8162_v33 = vld [vmem:[#allocation8 + $0xec] ss:$16 sps:$4 sm:$0xff]  }
  0x9d   :  { %1028 = vmatpush1.bf16.msra.mxu0 %v8134_v14  ;;  %v8164_v34 = vld [vmem:[#allocation8 + $0xe0] ss:$16 sps:$4 sm:$0xff]   ;;  %v8165_v35 = vld [vmem:[#allocation8 + $0xe8] ss:$16 sps:$4 sm:$0xff]   ;;  %v8166_v36 = vld [vmem:[#allocation8 + $0x104] ss:$16 sps:$4 sm:$0xff]  }
  0x9e   :  { %1110 = vmatpush1.bf16.msra.mxu1 %v8135_v15  ;;  %1029 = vmatprep.subr.bf16.mxu0 %v8136_v16  ;;  %v8168_v37 = vld [vmem:[#allocation8 + $0x10c] ss:$16 sps:$4 sm:$0xff]   ;;  %v8170_v38 = vld [vmem:[#allocation8 + $0x100] ss:$16 sps:$4 sm:$0xff]   ;;  %v8171_v39 = vld [vmem:[#allocation8 + $0x108] ss:$16 sps:$4 sm:$0xff]  }
  0x9f   :  { %1111 = vmatprep.subr.bf16.mxu1 %v8138_v17  ;;  %v8172_v40 = vld [vmem:[#allocation8 + $0x124] ss:$16 sps:$4 sm:$0xff]   ;;  %v8174_v41 = vld [vmem:[#allocation8 + $0x12c] ss:$16 sps:$4 sm:$0xff]   ;;  %v8176_v42 = vld [vmem:[#allocation8 + $0x120] ss:$16 sps:$4 sm:$0xff]  }
  0xa0   :  { %v8177_v43 = vld [vmem:[#allocation8 + $0x128] ss:$16 sps:$4 sm:$0xff]   ;;  %v8178_v44 = vld [vmem:[#allocation8 + $0x144] ss:$16 sps:$4 sm:$0xff]   ;;  %v8180_v45 = vld [vmem:[#allocation8 + $0x14c] ss:$16 sps:$4 sm:$0xff]  }
  0xa1   :  { %1030 = vmatpush1.bf16.msra.mxu0 %v8140_v18  ;;  %v8182_v46 = vld [vmem:[#allocation8 + $0x140] ss:$16 sps:$4 sm:$0xff]   ;;  %v8183_v47 = vld [vmem:[#allocation8 + $0x148] ss:$16 sps:$4 sm:$0xff]   ;;  %v8184_v48 = vld [vmem:[#allocation8 + $0x164] ss:$16 sps:$4 sm:$0xff]  }
  0xa2   :  { %1112 = vmatpush1.bf16.msra.mxu1 %v8141_v19  ;;  %1031 = vmatprep.subr.bf16.mxu0 %v8142_v20  ;;  %v8186_v49 = vld [vmem:[#allocation8 + $0x16c] ss:$16 sps:$4 sm:$0xff]   ;;  %v8188_v50 = vld [vmem:[#allocation8 + $0x160] ss:$16 sps:$4 sm:$0xff]   ;;  %v8189_v51 = vld [vmem:[#allocation8 + $0x168] ss:$16 sps:$4 sm:$0xff]  }
  0xa3   :  { %1113 = vmatprep.subr.bf16.mxu1 %v8144_v21  ;;  %v8190_v52 = vld [vmem:[#allocation8 + $0x184] ss:$16 sps:$4 sm:$0xff]   ;;  %v8192_v53 = vld [vmem:[#allocation8 + $0x18c] ss:$16 sps:$4 sm:$0xff]   ;;  %v8194_v54 = vld [vmem:[#allocation8 + $0x180] ss:$16 sps:$4 sm:$0xff]  }
  0xa4   :  { %v8195_v55 = vld [vmem:[#allocation8 + $0x188] ss:$16 sps:$4 sm:$0xff]   ;;  %v8196_v56 = vld [vmem:[#allocation8 + $0x1a4] ss:$16 sps:$4 sm:$0xff]   ;;  %v8198_v57 = vld [vmem:[#allocation8 + $0x1ac] ss:$16 sps:$4 sm:$0xff]  }
  0xa5   :  { %1032 = vmatpush1.bf16.msra.mxu0 %v8146_v22  ;;  %v8200_v58 = vld [vmem:[#allocation8 + $0x1a0] ss:$16 sps:$4 sm:$0xff]   ;;  %v8201_v59 = vld [vmem:[#allocation8 + $0x1a8] ss:$16 sps:$4 sm:$0xff]   ;;  %v8202_v60 = vld [vmem:[#allocation8 + $0x1c4] ss:$16 sps:$4 sm:$0xff]  }
  0xa6   :  { %1114 = vmatpush1.bf16.msra.mxu1 %v8147_v23  ;;  %1033 = vmatprep.subr.bf16.mxu0 %v8148_v24  ;;  %v8204_v61 = vld [vmem:[#allocation8 + $0x1cc] ss:$16 sps:$4 sm:$0xff]   ;;  %v8206_v62 = vld [vmem:[#allocation8 + $0x1c0] ss:$16 sps:$4 sm:$0xff]   ;;  %v8207_v63 = vld [vmem:[#allocation8 + $0x1c8] ss:$16 sps:$4 sm:$0xff]  }
  0xa7   :  { %1115 = vmatprep.subr.bf16.mxu1 %v8150_v25  ;;  %v8208_v0 = vld [vmem:[#allocation8 + $0x1e4] ss:$16 sps:$4 sm:$0xff]   ;;  %v8210_v1 = vld [vmem:[#allocation8 + $0x1ec] ss:$16 sps:$4 sm:$0xff]   ;;  %v8212_v2 = vld [vmem:[#allocation8 + $0x1e0] ss:$16 sps:$4 sm:$0xff]  }
  0xa8   :  { %v8213_v3 = vld [vmem:[#allocation8 + $0x1e8] ss:$16 sps:$4 sm:$0xff]   ;;  %v8216_v4 = vld [vmem:[#allocation8 + $0x204] ss:$16 sps:$4 sm:$0xff]   ;;  %v8219_v5 = vld [vmem:[#allocation8 + $0x20c] ss:$16 sps:$4 sm:$0xff]  }
  0xa9   :  { %1034 = vmatpush1.bf16.msra.mxu0 %v8152_v26  ;;  %v145_v7 = vshrl.u32 %v144_v6, 7  ;;  %v137_v8 = vld [vmem:[#allocation5] ss:$2 sm:$0xf]  ;;  %v203_v20 = vld [vmem:[#allocation7] sm:$0xf] }
  0xaa   :  { %1116 = vmatpush1.bf16.msra.mxu1 %v8153_v27  ;;  %1035 = vmatprep.subr.bf16.mxu0 %v8154_v28  ;;  %v169_v14 = vld [vmem:[#allocation5 + $0x1] ss:$2 sm:$0xf] }
  0xab   :  { %1117 = vmatprep.subr.bf16.mxu1 %v8156_v29  ;;  %v9833_v9 = vsub.s32 2, %v145_v7  ;;  %v9835_v10 = vsub.s32 0, %v145_v7  ;;  %v9837_v11 = vsub.s32 1, %v145_v7  ;;  %v9840_v13 = vsub.s32 3, %v145_v7  ;;  %v8252_v6 = vld [vmem:[#allocation8 + $0x2c4] ss:$16 sps:$4 sm:$0xff]  }
  0xac   :  { %v8255_v7 = vld [vmem:[#allocation8 + $0x2cc] ss:$16 sps:$4 sm:$0xff]  }
  0xad   :  { %1036 = vmatpush1.bf16.msra.mxu0 %v8158_v30  ;;  %v155_v12 = vrot.slane %v137_v8, %v9833_v9  ;;  %v147_v16 = vrot.slane %v137_v8, %v9835_v10  ;;  %v151_v17 = vrot.slane %v137_v8, %v9837_v11  ;;  %v159_v18 = vrot.slane %v137_v8, %v9840_v13  ;;  %v8250_v8 = vld [vmem:[#allocation8 + $0x2c0] ss:$16 sps:$4 sm:$0xff]  }
  0xae   :  { %1118 = vmatpush1.bf16.msra.mxu1 %v8159_v31  ;;  %1037 = vmatprep.subr.bf16.mxu0 %v8160_v32  ;;  %v178_v21 = vrot.slane %v169_v14, %v9835_v10  ;;  %v182_v22 = vrot.slane %v169_v14, %v9837_v11  ;;  %v186_v23 = vrot.slane %v169_v14, %v9833_v9 }
  0xaf   :  { %1119 = vmatprep.subr.bf16.mxu1 %v8162_v33  ;;  %v190_v24 = vrot.slane %v169_v14, %v9840_v13  ;;  %v216_v25 = vrot.slane %v203_v20, %v9833_v9  ;;  %v212_v26 = vrot.slane %v203_v20, %v9837_v11  ;;  %v208_v31 = vrot.slane %v203_v20, %v9835_v10  ;;  %v8258_v14 = vld [vmem:[#allocation8 + $0x2e4] ss:$16 sps:$4 sm:$0xff]  }
  0xb1   :  { %1038 = vmatpush1.bf16.msra.mxu0 %v8164_v34 }
  0xb2   :  { %1120 = vmatpush1.bf16.msra.mxu1 %v8165_v35  ;;  %1039 = vmatprep.subr.bf16.mxu0 %v8166_v36  ;;  %v220_v36 = vrot.slane %v203_v20, %v9840_v13  ;;  %v8262_v20 = vld [vmem:[#allocation8 + $0x300] ss:$16 sps:$4 sm:$0xff]  }
  0xb3   :  { %1121 = vmatprep.subr.bf16.mxu1 %v8168_v37 }
  0xb5   :  { %1040 = vmatpush1.bf16.msra.mxu0 %v8170_v38 }
  0xb6   :  { %1122 = vmatpush1.bf16.msra.mxu1 %v8171_v39  ;;  %1041 = vmatprep.subr.bf16.mxu0 %v8172_v40 }
  0xb7   :  { %1123 = vmatprep.subr.bf16.mxu1 %v8174_v41 }
  0xb9   :  { %1042 = vmatpush1.bf16.msra.mxu0 %v8176_v42 }
  0xba   :  { %1124 = vmatpush1.bf16.msra.mxu1 %v8177_v43  ;;  %1043 = vmatprep.subr.bf16.mxu0 %v8178_v44  ;;  %v8214_v43 = vld [vmem:[#allocation8 + $0x200] ss:$16 sps:$4 sm:$0xff]   ;;  %v8217_v44 = vld [vmem:[#allocation8 + $0x208] ss:$16 sps:$4 sm:$0xff]  }
  0xbb   :  { %1125 = vmatprep.subr.bf16.mxu1 %v8180_v45 }
  0xbd   :  { %1044 = vmatpush1.bf16.msra.mxu0 %v8182_v46 }
  0xbe   :  { %1126 = vmatpush1.bf16.msra.mxu1 %v8183_v47  ;;  %1045 = vmatprep.subr.bf16.mxu0 %v8184_v48 }
  0xbf   :  { %1127 = vmatprep.subr.bf16.mxu1 %v8186_v49  ;;  %v8222_v49 = vld [vmem:[#allocation8 + $0x224] ss:$16 sps:$4 sm:$0xff]  }
  0xc1   :  { %1046 = vmatpush1.bf16.msra.mxu0 %v8188_v50  ;;  %v8225_v50 = vld [vmem:[#allocation8 + $0x22c] ss:$16 sps:$4 sm:$0xff]  }
  0xc2   :  { %1128 = vmatpush1.bf16.msra.mxu1 %v8189_v51  ;;  %1047 = vmatprep.subr.bf16.mxu0 %v8190_v52  ;;  %v8220_v51 = vld [vmem:[#allocation8 + $0x220] ss:$16 sps:$4 sm:$0xff]   ;;  %v8223_v52 = vld [vmem:[#allocation8 + $0x228] ss:$16 sps:$4 sm:$0xff]  }
  0xc3   :  { %1129 = vmatprep.subr.bf16.mxu1 %v8192_v53 }
  0xc5   :  { %1048 = vmatpush1.bf16.msra.mxu0 %v8194_v54  ;;  %v8228_v54 = vld [vmem:[#allocation8 + $0x244] ss:$16 sps:$4 sm:$0xff]  }
  0xc6   :  { %1130 = vmatpush1.bf16.msra.mxu1 %v8195_v55  ;;  %1049 = vmatprep.subr.bf16.mxu0 %v8196_v56  ;;  %v8231_v55 = vld [vmem:[#allocation8 + $0x24c] ss:$16 sps:$4 sm:$0xff]   ;;  %v8226_v56 = vld [vmem:[#allocation8 + $0x240] ss:$16 sps:$4 sm:$0xff]  }
  0xc7   :  { %1131 = vmatprep.subr.bf16.mxu1 %v8198_v57  ;;  %v8229_v57 = vld [vmem:[#allocation8 + $0x248] ss:$16 sps:$4 sm:$0xff]  }
  0xc9   :  { %1050 = vmatpush1.bf16.msra.mxu0 %v8200_v58  ;;  %v8234_v58 = vld [vmem:[#allocation8 + $0x264] ss:$16 sps:$4 sm:$0xff]  }
  0xca   :  { %1132 = vmatpush1.bf16.msra.mxu1 %v8201_v59  ;;  %1051 = vmatprep.subr.bf16.mxu0 %v8202_v60  ;;  %v8237_v59 = vld [vmem:[#allocation8 + $0x26c] ss:$16 sps:$4 sm:$0xff]   ;;  %v8232_v60 = vld [vmem:[#allocation8 + $0x260] ss:$16 sps:$4 sm:$0xff]  }
  0xcb   :  { %1133 = vmatprep.subr.bf16.mxu1 %v8204_v61  ;;  %v8235_v61 = vld [vmem:[#allocation8 + $0x268] ss:$16 sps:$4 sm:$0xff]  }
  0xcd   :  { %1052 = vmatpush1.bf16.msra.mxu0 %v8206_v62  ;;  %v8240_v62 = vld [vmem:[#allocation8 + $0x284] ss:$16 sps:$4 sm:$0xff]  }
  0xce   :  { %1134 = vmatpush1.bf16.msra.mxu1 %v8207_v63  ;;  %1053 = vmatprep.subr.bf16.mxu0 %v8208_v0  ;;  %v8243_v63 = vld [vmem:[#allocation8 + $0x28c] ss:$16 sps:$4 sm:$0xff]   ;;  %v8238_v0 = vld [vmem:[#allocation8 + $0x280] ss:$16 sps:$4 sm:$0xff]  }
  0xcf   :  { %1135 = vmatprep.subr.bf16.mxu1 %v8210_v1  ;;  %v8241_v1 = vld [vmem:[#allocation8 + $0x288] ss:$16 sps:$4 sm:$0xff]  }
  0xd1   :  { %1054 = vmatpush1.bf16.msra.mxu0 %v8212_v2  ;;  %v8246_v2 = vld [vmem:[#allocation8 + $0x2a4] ss:$16 sps:$4 sm:$0xff]  }
  0xd2   :  { %1136 = vmatpush1.bf16.msra.mxu1 %v8213_v3  ;;  %1064 = vmatprep.subr.bf16.mxu0 %v8216_v4  ;;  %v8249_v3 = vld [vmem:[#allocation8 + $0x2ac] ss:$16 sps:$4 sm:$0xff]   ;;  %v8244_v4 = vld [vmem:[#allocation8 + $0x2a0] ss:$16 sps:$4 sm:$0xff]  }
  0xd3   :  { %1146 = vmatprep.subr.bf16.mxu1 %v8219_v5  ;;  %v8247_v5 = vld [vmem:[#allocation8 + $0x2a8] ss:$16 sps:$4 sm:$0xff]  }
 0x113   :  { %v141_v15 = vpop.permute.xlu0 %140 }
 0x114   :  { %v166_v19 = vmul.f32 %v155_v12, %v141_v15  ;;  %v164_v27 = vmul.f32 %v147_v16, %v141_v15  ;;  %v165_v28 = vmul.f32 %v151_v17, %v141_v15  ;;  %v167_v29 = vmul.f32 %v159_v18, %v141_v15  ;;  %v8253_v12 = vld [vmem:[#allocation8 + $0x2c8] ss:$16 sps:$4 sm:$0xff]   ;;  %v8261_v15 = vld [vmem:[#allocation8 + $0x2ec] ss:$16 sps:$4 sm:$0xff]   ;;  %v8256_v16 = vld [vmem:[#allocation8 + $0x2e0] ss:$16 sps:$4 sm:$0xff]  }
 0x115   :  { %v8259_v17 = vld [vmem:[#allocation8 + $0x2e8] ss:$16 sps:$4 sm:$0xff]   ;;  %v8264_v18 = vld [vmem:[#allocation8 + $0x304] ss:$16 sps:$4 sm:$0xff]  }
 0x118   :  { %v172_v30 = vpop.permute.xlu0 %171 }
 0x119   :  { %v195_v32 = vmul.f32 %v178_v21, %v172_v30  ;;  %v196_v33 = vmul.f32 %v182_v22, %v172_v30  ;;  %v197_v34 = vmul.f32 %v186_v23, %v172_v30  ;;  %v198_v35 = vmul.f32 %v190_v24, %v172_v30  ;;  %v8265_v21 = vld [vmem:[#allocation8 + $0x308] ss:$16 sps:$4 sm:$0xff]   ;;  %v8270_v22 = vld [vmem:[#allocation8 + $0x324] ss:$16 sps:$4 sm:$0xff]   ;;  %v8273_v23 = vld [vmem:[#allocation8 + $0x32c] ss:$16 sps:$4 sm:$0xff]  }
 0x11a   :  { %v8268_v24 = vld [vmem:[#allocation8 + $0x320] ss:$16 sps:$4 sm:$0xff]   ;;  %v8282_v30 = vld [vmem:[#allocation8 + $0x364] ss:$16 sps:$4 sm:$0xff]  }
 0x11b   :  { %v199_v37 = vadd.f32 %v195_v32, %v164_v27  ;;  %v201_v38 = vadd.f32 %v197_v34, %v166_v19  ;;  %v202_v39 = vadd.f32 %v198_v35, %v167_v29  ;;  %v200_v40 = vadd.f32 %v196_v33, %v165_v28  ;;  %v8267_v19 = vld [vmem:[#allocation8 + $0x30c] ss:$16 sps:$4 sm:$0xff]   ;;  %v8274_v28 = vld [vmem:[#allocation8 + $0x340] ss:$16 sps:$4 sm:$0xff]   ;;  %v8277_v29 = vld [vmem:[#allocation8 + $0x348] ss:$16 sps:$4 sm:$0xff]  }
 0x11c   :  { %v8279_v27 = vld [vmem:[#allocation8 + $0x34c] ss:$16 sps:$4 sm:$0xff]   ;;  %v8280_v32 = vld [vmem:[#allocation8 + $0x360] ss:$16 sps:$4 sm:$0xff]   ;;  %v8283_v33 = vld [vmem:[#allocation8 + $0x368] ss:$16 sps:$4 sm:$0xff]  }
 0x11d   :  { %v9853_v41 = vadd.f32 %v216_v25, %v201_v38  ;;  %v9855_v42 = vadd.f32 %v212_v26, %v200_v40  ;;  %v9857_v45 = vadd.f32 %v208_v31, %v199_v37  ;;  %v9859_v46 = vadd.f32 %v220_v36, %v202_v39  ;;  %v8271_v25 = vld [vmem:[#allocation8 + $0x328] ss:$16 sps:$4 sm:$0xff]   ;;  %v8276_v26 = vld [vmem:[#allocation8 + $0x344] ss:$16 sps:$4 sm:$0xff]   ;;  %v8285_v31 = vld [vmem:[#allocation8 + $0x36c] ss:$16 sps:$4 sm:$0xff]  }
 0x11e   :  { %v8288_v34 = vld [vmem:[#allocation8 + $0x384] ss:$16 sps:$4 sm:$0xff]   ;;  %v8291_v35 = vld [vmem:[#allocation8 + $0x38c] ss:$16 sps:$4 sm:$0xff]   ;;  %v8286_v36 = vld [vmem:[#allocation8 + $0x380] ss:$16 sps:$4 sm:$0xff]  }
 0x11f   :  { %v230_v47 = vpack.c.bf16 %v9855_v42, %v9855_v42  ;;  %v229_v48 = vpack.c.bf16 %v9857_v45, %v9857_v45  ;;  %v232_v53 = vpack.c.bf16 %v9859_v46, %v9859_v46  ;;  %v8289_v37 = vld [vmem:[#allocation8 + $0x388] ss:$16 sps:$4 sm:$0xff]   ;;  %v8294_v38 = vld [vmem:[#allocation8 + $0x3a4] ss:$16 sps:$4 sm:$0xff]   ;;  %v8297_v39 = vld [vmem:[#allocation8 + $0x3ac] ss:$16 sps:$4 sm:$0xff]  }
 0x120   :  { %v8292_v40 = vld [vmem:[#allocation8 + $0x3a0] ss:$16 sps:$4 sm:$0xff]  }
 0x121   :  { %1055 = vmatprep.mubr.bf16.mxu0 %v230_v47  ;;  %1137 = vmatprep.mubr.bf16.mxu1 %v230_v47  ;;  %v8303_v47 = vld [vmem:[#allocation8 + $0x3cc] ss:$16 sps:$4 sm:$0xff]  }
 0x122   :  { %1056 = vmatmul.mubr.bf16.vlgmr.msra.gmra.mrb[0].mxu0 %v229_v48  ;;  %1138 = vmatmul.mubr.bf16.vlgmr.msra.gmra.mrb[0].mxu1 %v229_v48  ;;  %v8298_v48 = vld [vmem:[#allocation8 + $0x3c0] ss:$16 sps:$4 sm:$0xff]  }
 0x123   :  { %1065 = vmatpush1.bf16.msra.mxu0 %v8214_v43  ;;  %1147 = vmatpush1.bf16.msra.mxu1 %v8217_v44  ;;  %v8295_v43 = vld [vmem:[#allocation8 + $0x3a8] ss:$16 sps:$4 sm:$0xff]   ;;  %v8300_v44 = vld [vmem:[#allocation8 + $0x3c4] ss:$16 sps:$4 sm:$0xff]  }
 0x124   :  { %1096 = vmatprep.mubr.bf16.mxu0 %v232_v53  ;;  %1178 = vmatprep.mubr.bf16.mxu1 %v232_v53  ;;  %v8307_v53 = vld [vmem:[#allocation8 + $0x3e8] ss:$16 sps:$4 sm:$0xff]  }
 0x125   :  { %1066 = vmatprep.subr.bf16.mxu0 %v8222_v49  ;;  %1148 = vmatprep.subr.bf16.mxu1 %v8225_v50  ;;  %v8301_v49 = vld [vmem:[#allocation8 + $0x3c8] ss:$16 sps:$4 sm:$0xff]   ;;  %v8306_v50 = vld [vmem:[#allocation8 + $0x3e4] ss:$16 sps:$4 sm:$0xff]  }
 0x127   :  { %1067 = vmatpush1.bf16.msra.mxu0 %v8220_v51  ;;  %1149 = vmatpush1.bf16.msra.mxu1 %v8223_v52  ;;  %v8309_v51 = vld [vmem:[#allocation8 + $0x3ec] ss:$16 sps:$4 sm:$0xff]   ;;  %v8304_v52 = vld [vmem:[#allocation8 + $0x3e0] ss:$16 sps:$4 sm:$0xff]  }
 0x128   :  { %1068 = vmatprep.subr.bf16.mxu0 %v8228_v54  ;;  %1150 = vmatprep.subr.bf16.mxu1 %v8231_v55  ;;  %v8312_v54 = vld [vmem:[#allocation8 + $0x404] ss:$16 sps:$4 sm:$0xff]   ;;  %v8315_v55 = vld [vmem:[#allocation8 + $0x40c] ss:$16 sps:$4 sm:$0xff]  }
 0x12b   :  { %1069 = vmatpush1.bf16.msra.mxu0 %v8226_v56  ;;  %1151 = vmatpush1.bf16.msra.mxu1 %v8229_v57  ;;  %v8310_v56 = vld [vmem:[#allocation8 + $0x400] ss:$16 sps:$4 sm:$0xff]   ;;  %v8313_v57 = vld [vmem:[#allocation8 + $0x408] ss:$16 sps:$4 sm:$0xff]  }
 0x12c   :  { %1070 = vmatprep.subr.bf16.mxu0 %v8234_v58  ;;  %1152 = vmatprep.subr.bf16.mxu1 %v8237_v59  ;;  %v8318_v58 = vld [vmem:[#allocation8 + $0x424] ss:$16 sps:$4 sm:$0xff]   ;;  %v8321_v59 = vld [vmem:[#allocation8 + $0x42c] ss:$16 sps:$4 sm:$0xff]  }
 0x12f   :  { %1071 = vmatpush1.bf16.msra.mxu0 %v8232_v60  ;;  %1153 = vmatpush1.bf16.msra.mxu1 %v8235_v61  ;;  %v231_v60 = vpack.c.bf16 %v9853_v41, %v9853_v41  ;;  %v8316_v61 = vld [vmem:[#allocation8 + $0x420] ss:$16 sps:$4 sm:$0xff]  }
 0x130   :  { %1072 = vmatprep.subr.bf16.mxu0 %v8240_v62  ;;  %1154 = vmatprep.subr.bf16.mxu1 %v8243_v63  ;;  %v8319_v62 = vld [vmem:[#allocation8 + $0x428] ss:$16 sps:$4 sm:$0xff]   ;;  %v8324_v63 = vld [vmem:[#allocation8 + $0x444] ss:$16 sps:$4 sm:$0xff]  }
 0x133   :  { %1073 = vmatpush1.bf16.msra.mxu0 %v8238_v0  ;;  %1155 = vmatpush1.bf16.msra.mxu1 %v8241_v1  ;;  %v8327_v0 = vld [vmem:[#allocation8 + $0x44c] ss:$16 sps:$4 sm:$0xff]   ;;  %v8322_v1 = vld [vmem:[#allocation8 + $0x440] ss:$16 sps:$4 sm:$0xff]  }
 0x134   :  { %1074 = vmatprep.subr.bf16.mxu0 %v8246_v2  ;;  %1156 = vmatprep.subr.bf16.mxu1 %v8249_v3  ;;  %v8325_v2 = vld [vmem:[#allocation8 + $0x448] ss:$16 sps:$4 sm:$0xff]   ;;  %v8330_v3 = vld [vmem:[#allocation8 + $0x464] ss:$16 sps:$4 sm:$0xff]  }
 0x137   :  { %1075 = vmatpush1.bf16.msra.mxu0 %v8244_v4  ;;  %1157 = vmatpush1.bf16.msra.mxu1 %v8247_v5  ;;  %v8333_v4 = vld [vmem:[#allocation8 + $0x46c] ss:$16 sps:$4 sm:$0xff]   ;;  %v8328_v5 = vld [vmem:[#allocation8 + $0x460] ss:$16 sps:$4 sm:$0xff]  }
 0x138   :  { %1076 = vmatprep.subr.bf16.mxu0 %v8252_v6  ;;  %1158 = vmatprep.subr.bf16.mxu1 %v8255_v7  ;;  %v8331_v6 = vld [vmem:[#allocation8 + $0x468] ss:$16 sps:$4 sm:$0xff]   ;;  %v8336_v7 = vld [vmem:[#allocation8 + $0x484] ss:$16 sps:$4 sm:$0xff]  }
 0x13b   :  { %1077 = vmatpush1.bf16.msra.mxu0 %v8250_v8  ;;  %1159 = vmatpush1.bf16.msra.mxu1 %v8253_v12  ;;  %v8339_v8 = vld [vmem:[#allocation8 + $0x48c] ss:$16 sps:$4 sm:$0xff]   ;;  %v8334_v12 = vld [vmem:[#allocation8 + $0x480] ss:$16 sps:$4 sm:$0xff]  }
 0x13c   :  { %1078 = vmatprep.subr.bf16.mxu0 %v8258_v14  ;;  %1160 = vmatprep.subr.bf16.mxu1 %v8261_v15  ;;  %v8337_v14 = vld [vmem:[#allocation8 + $0x488] ss:$16 sps:$4 sm:$0xff]   ;;  %v8342_v15 = vld [vmem:[#allocation8 + $0x4a4] ss:$16 sps:$4 sm:$0xff]  }
 0x13f   :  { %1079 = vmatpush1.bf16.msra.mxu0 %v8256_v16  ;;  %1161 = vmatpush1.bf16.msra.mxu1 %v8259_v17  ;;  %v8345_v16 = vld [vmem:[#allocation8 + $0x4ac] ss:$16 sps:$4 sm:$0xff]   ;;  %v8340_v17 = vld [vmem:[#allocation8 + $0x4a0] ss:$16 sps:$4 sm:$0xff]  }
 0x140   :  { %1080 = vmatprep.subr.bf16.mxu0 %v8264_v18  ;;  %1162 = vmatprep.subr.bf16.mxu1 %v8267_v19  ;;  %v8343_v18 = vld [vmem:[#allocation8 + $0x4a8] ss:$16 sps:$4 sm:$0xff]   ;;  %v8348_v19 = vld [vmem:[#allocation8 + $0x4c4] ss:$16 sps:$4 sm:$0xff]  }
 0x143   :  { %1081 = vmatpush1.bf16.msra.mxu0 %v8262_v20  ;;  %1163 = vmatpush1.bf16.msra.mxu1 %v8265_v21  ;;  %v8351_v20 = vld [vmem:[#allocation8 + $0x4cc] ss:$16 sps:$4 sm:$0xff]   ;;  %v8346_v21 = vld [vmem:[#allocation8 + $0x4c0] ss:$16 sps:$4 sm:$0xff]  }
 0x144   :  { %1082 = vmatprep.subr.bf16.mxu0 %v8270_v22  ;;  %1164 = vmatprep.subr.bf16.mxu1 %v8273_v23  ;;  %v8349_v22 = vld [vmem:[#allocation8 + $0x4c8] ss:$16 sps:$4 sm:$0xff]   ;;  %v8354_v23 = vld [vmem:[#allocation8 + $0x4e4] ss:$16 sps:$4 sm:$0xff]  }
 0x147   :  { %1083 = vmatpush1.bf16.msra.mxu0 %v8268_v24  ;;  %1165 = vmatpush1.bf16.msra.mxu1 %v8271_v25  ;;  %v8357_v24 = vld [vmem:[#allocation8 + $0x4ec] ss:$16 sps:$4 sm:$0xff]   ;;  %v8352_v25 = vld [vmem:[#allocation8 + $0x4e0] ss:$16 sps:$4 sm:$0xff]  }
 0x148   :  { %1084 = vmatprep.subr.bf16.mxu0 %v8276_v26  ;;  %1166 = vmatprep.subr.bf16.mxu1 %v8279_v27  ;;  %v8355_v26 = vld [vmem:[#allocation8 + $0x4e8] ss:$16 sps:$4 sm:$0xff]   ;;  %v8360_v27 = vld [vmem:[#allocation8 + $0x504] ss:$16 sps:$4 sm:$0xff]  }
 0x14b   :  { %1085 = vmatpush1.bf16.msra.mxu0 %v8274_v28  ;;  %1167 = vmatpush1.bf16.msra.mxu1 %v8277_v29  ;;  %v8363_v28 = vld [vmem:[#allocation8 + $0x50c] ss:$16 sps:$4 sm:$0xff]   ;;  %v8358_v29 = vld [vmem:[#allocation8 + $0x500] ss:$16 sps:$4 sm:$0xff]  }
 0x14c   :  { %1086 = vmatprep.subr.bf16.mxu0 %v8282_v30  ;;  %1168 = vmatprep.subr.bf16.mxu1 %v8285_v31  ;;  %v8361_v30 = vld [vmem:[#allocation8 + $0x508] ss:$16 sps:$4 sm:$0xff]   ;;  %v8366_v31 = vld [vmem:[#allocation8 + $0x524] ss:$16 sps:$4 sm:$0xff]  }
 0x14f   :  { %1087 = vmatpush1.bf16.msra.mxu0 %v8280_v32  ;;  %1169 = vmatpush1.bf16.msra.mxu1 %v8283_v33  ;;  %v8369_v32 = vld [vmem:[#allocation8 + $0x52c] ss:$16 sps:$4 sm:$0xff]   ;;  %v8364_v33 = vld [vmem:[#allocation8 + $0x520] ss:$16 sps:$4 sm:$0xff]  }
 0x150   :  { %1088 = vmatprep.subr.bf16.mxu0 %v8288_v34  ;;  %1170 = vmatprep.subr.bf16.mxu1 %v8291_v35  ;;  %v8367_v34 = vld [vmem:[#allocation8 + $0x528] ss:$16 sps:$4 sm:$0xff]   ;;  %v8372_v35 = vld [vmem:[#allocation8 + $0x544] ss:$16 sps:$4 sm:$0xff]  }
 0x153   :  { %1089 = vmatpush1.bf16.msra.mxu0 %v8286_v36  ;;  %1171 = vmatpush1.bf16.msra.mxu1 %v8289_v37  ;;  %v8375_v36 = vld [vmem:[#allocation8 + $0x54c] ss:$16 sps:$4 sm:$0xff]   ;;  %v8370_v37 = vld [vmem:[#allocation8 + $0x540] ss:$16 sps:$4 sm:$0xff]  }
 0x154   :  { %1090 = vmatprep.subr.bf16.mxu0 %v8294_v38  ;;  %1172 = vmatprep.subr.bf16.mxu1 %v8297_v39  ;;  %v8373_v38 = vld [vmem:[#allocation8 + $0x548] ss:$16 sps:$4 sm:$0xff]   ;;  %v8378_v39 = vld [vmem:[#allocation8 + $0x564] ss:$16 sps:$4 sm:$0xff]  }
 0x157   :  { %1091 = vmatpush1.bf16.msra.mxu0 %v8292_v40  ;;  %1173 = vmatpush1.bf16.msra.mxu1 %v8295_v43  ;;  %v8381_v40 = vld [vmem:[#allocation8 + $0x56c] ss:$16 sps:$4 sm:$0xff]   ;;  %v8376_v43 = vld [vmem:[#allocation8 + $0x560] ss:$16 sps:$4 sm:$0xff]  }
 0x158   :  { %1092 = vmatprep.subr.bf16.mxu0 %v8300_v44  ;;  %1174 = vmatprep.subr.bf16.mxu1 %v8303_v47  ;;  %v8379_v44 = vld [vmem:[#allocation8 + $0x568] ss:$16 sps:$4 sm:$0xff]   ;;  %v8384_v47 = vld [vmem:[#allocation8 + $0x584] ss:$16 sps:$4 sm:$0xff]  }
 0x15b   :  { %1093 = vmatpush1.bf16.msra.mxu0 %v8298_v48  ;;  %1175 = vmatpush1.bf16.msra.mxu1 %v8301_v49  ;;  %v8387_v48 = vld [vmem:[#allocation8 + $0x58c] ss:$16 sps:$4 sm:$0xff]   ;;  %v8382_v49 = vld [vmem:[#allocation8 + $0x580] ss:$16 sps:$4 sm:$0xff]  }
 0x15c   :  { %1094 = vmatprep.subr.bf16.mxu0 %v8306_v50  ;;  %1176 = vmatprep.subr.bf16.mxu1 %v8309_v51  ;;  %v8385_v50 = vld [vmem:[#allocation8 + $0x588] ss:$16 sps:$4 sm:$0xff]   ;;  %v8390_v51 = vld [vmem:[#allocation8 + $0x5a4] ss:$16 sps:$4 sm:$0xff]  }
 0x15f   :  { %1095 = vmatpush1.bf16.msra.mxu0 %v8304_v52  ;;  %1177 = vmatpush1.bf16.msra.mxu1 %v8307_v53  ;;  %v8393_v52 = vld [vmem:[#allocation8 + $0x5ac] ss:$16 sps:$4 sm:$0xff]   ;;  %v8388_v53 = vld [vmem:[#allocation8 + $0x5a0] ss:$16 sps:$4 sm:$0xff]  }
 0x160   :  { %1995 = vmatprep.subr.bf16.mxu0 %v8312_v54  ;;  %2077 = vmatprep.subr.bf16.mxu1 %v8315_v55  ;;  %v8391_v54 = vld [vmem:[#allocation8 + $0x5a8] ss:$16 sps:$4 sm:$0xff]   ;;  %v8396_v55 = vld [vmem:[#allocation8 + $0x5c4] ss:$16 sps:$4 sm:$0xff]  }
 0x162   :  { %1097 = vmatmul.mubr.bf16.vlgmr.msra.gmra.mrb[0].mxu0 %v231_v60  ;;  %1179 = vmatmul.mubr.bf16.vlgmr.msra.gmra.mrb[0].mxu1 %v231_v60  ;;  %v8405_v60 = vld [vmem:[#allocation8 + $0x5ec] ss:$16 sps:$4 sm:$0xff]  }
 0x163   :  { %1996 = vmatpush1.bf16.msra.mxu0 %v8310_v56  ;;  %2078 = vmatpush1.bf16.msra.mxu1 %v8313_v57  ;;  %v8399_v56 = vld [vmem:[#allocation8 + $0x5cc] ss:$16 sps:$4 sm:$0xff]   ;;  %v8394_v57 = vld [vmem:[#allocation8 + $0x5c0] ss:$16 sps:$4 sm:$0xff]  }
 0x164   :  { %1997 = vmatprep.subr.bf16.mxu0 %v8318_v58  ;;  %2079 = vmatprep.subr.bf16.mxu1 %v8321_v59  ;;  %v8397_v58 = vld [vmem:[#allocation8 + $0x5c8] ss:$16 sps:$4 sm:$0xff]   ;;  %v8402_v59 = vld [vmem:[#allocation8 + $0x5e4] ss:$16 sps:$4 sm:$0xff]  }
 0x167   :  { %1998 = vmatpush1.bf16.msra.mxu0 %v8316_v61  ;;  %2080 = vmatpush1.bf16.msra.mxu1 %v8319_v62  ;;  %v8400_v61 = vld [vmem:[#allocation8 + $0x5e0] ss:$16 sps:$4 sm:$0xff]   ;;  %v8403_v62 = vld [vmem:[#allocation8 + $0x5e8] ss:$16 sps:$4 sm:$0xff]  }
 0x168   :  { %1999 = vmatprep.subr.bf16.mxu0 %v8324_v63  ;;  %2081 = vmatprep.subr.bf16.mxu1 %v8327_v0  ;;  %v8408_v63 = vld [vmem:[#allocation8 + $0x604] ss:$16 sps:$4 sm:$0xff]   ;;  %v8411_v0 = vld [vmem:[#allocation8 + $0x60c] ss:$16 sps:$4 sm:$0xff]  }
 0x16b   :  { %2000 = vmatpush1.bf16.msra.mxu0 %v8322_v1  ;;  %2082 = vmatpush1.bf16.msra.mxu1 %v8325_v2  ;;  %v9869_v1 = vld [vmem:[#allocation10] sm:$0xf] }
 0x16c   :  { %2001 = vmatprep.subr.bf16.mxu0 %v8330_v3  ;;  %2083 = vmatprep.subr.bf16.mxu1 %v8333_v4  ;;  %v366_v2 = vrot.slane %v9869_v1, %v9835_v10  ;;  %v370_v3 = vrot.slane %v9869_v1, %v9837_v11  ;;  %v378_v4 = vrot.slane %v9869_v1, %v9840_v13 }
 0x16f   :  { %2002 = vmatpush1.bf16.msra.mxu0 %v8328_v5  ;;  %2084 = vmatpush1.bf16.msra.mxu1 %v8331_v6 }
 0x170   :  { %2003 = vmatprep.subr.bf16.mxu0 %v8336_v7  ;;  %2085 = vmatprep.subr.bf16.mxu1 %v8339_v8 }
 0x173   :  { %2004 = vmatpush1.bf16.msra.mxu0 %v8334_v12  ;;  %2086 = vmatpush1.bf16.msra.mxu1 %v8337_v14 }
 0x174   :  { %2005 = vmatprep.subr.bf16.mxu0 %v8342_v15  ;;  %2087 = vmatprep.subr.bf16.mxu1 %v8345_v16 }
 0x177   :  { %2006 = vmatpush1.bf16.msra.mxu0 %v8340_v17  ;;  %2088 = vmatpush1.bf16.msra.mxu1 %v8343_v18 }
 0x178   :  { %2007 = vmatprep.subr.bf16.mxu0 %v8348_v19  ;;  %2089 = vmatprep.subr.bf16.mxu1 %v8351_v20 }
 0x17b   :  { %2008 = vmatpush1.bf16.msra.mxu0 %v8346_v21  ;;  %2090 = vmatpush1.bf16.msra.mxu1 %v8349_v22 }
 0x17c   :  { %2009 = vmatprep.subr.bf16.mxu0 %v8354_v23  ;;  %2091 = vmatprep.subr.bf16.mxu1 %v8357_v24 }
 0x17f   :  { %2010 = vmatpush1.bf16.msra.mxu0 %v8352_v25  ;;  %2092 = vmatpush1.bf16.msra.mxu1 %v8355_v26  ;;  %v8406_v26 = vld [vmem:[#allocation8 + $0x600] ss:$16 sps:$4 sm:$0xff]  }
 0x180   :  { %2011 = vmatprep.subr.bf16.mxu0 %v8360_v27  ;;  %2093 = vmatprep.subr.bf16.mxu1 %v8363_v28  ;;  %v8409_v27 = vld [vmem:[#allocation8 + $0x608] ss:$16 sps:$4 sm:$0xff]  }
 0x183   :  { %2012 = vmatpush1.bf16.msra.mxu0 %v8358_v29  ;;  %2094 = vmatpush1.bf16.msra.mxu1 %v8361_v30  ;;  %v8414_v30 = vld [vmem:[#allocation8 + $0x624] ss:$16 sps:$4 sm:$0xff]  }
 0x184   :  { %2013 = vmatprep.subr.bf16.mxu0 %v8366_v31  ;;  %2095 = vmatprep.subr.bf16.mxu1 %v8369_v32  ;;  %v8417_v31 = vld [vmem:[#allocation8 + $0x62c] ss:$16 sps:$4 sm:$0xff]  }
 0x187   :  { %2014 = vmatpush1.bf16.msra.mxu0 %v8364_v33  ;;  %2096 = vmatpush1.bf16.msra.mxu1 %v8367_v34  ;;  %v8412_v33 = vld [vmem:[#allocation8 + $0x620] ss:$16 sps:$4 sm:$0xff]   ;;  %v8415_v34 = vld [vmem:[#allocation8 + $0x628] ss:$16 sps:$4 sm:$0xff]  }
 0x188   :  { %2015 = vmatprep.subr.bf16.mxu0 %v8372_v35  ;;  %2097 = vmatprep.subr.bf16.mxu1 %v8375_v36  ;;  %v8420_v35 = vld [vmem:[#allocation8 + $0x644] ss:$16 sps:$4 sm:$0xff]   ;;  %v8423_v36 = vld [vmem:[#allocation8 + $0x64c] ss:$16 sps:$4 sm:$0xff]  }
 0x18b   :  { %2016 = vmatpush1.bf16.msra.mxu0 %v8370_v37  ;;  %2098 = vmatpush1.bf16.msra.mxu1 %v8373_v38  ;;  %v8418_v37 = vld [vmem:[#allocation8 + $0x640] ss:$16 sps:$4 sm:$0xff]   ;;  %v8421_v38 = vld [vmem:[#allocation8 + $0x648] ss:$16 sps:$4 sm:$0xff]  }
 0x18c   :  { %2017 = vmatprep.subr.bf16.mxu0 %v8378_v39  ;;  %2099 = vmatprep.subr.bf16.mxu1 %v8381_v40  ;;  %v8426_v39 = vld [vmem:[#allocation8 + $0x664] ss:$16 sps:$4 sm:$0xff]   ;;  %v8429_v40 = vld [vmem:[#allocation8 + $0x66c] ss:$16 sps:$4 sm:$0xff]  }
 0x18f   :  { %2018 = vmatpush1.bf16.msra.mxu0 %v8376_v43  ;;  %2100 = vmatpush1.bf16.msra.mxu1 %v8379_v44  ;;  %v8424_v43 = vld [vmem:[#allocation8 + $0x660] ss:$16 sps:$4 sm:$0xff]   ;;  %v8427_v44 = vld [vmem:[#allocation8 + $0x668] ss:$16 sps:$4 sm:$0xff]  }
 0x190   :  { %2019 = vmatprep.subr.bf16.mxu0 %v8384_v47  ;;  %2101 = vmatprep.subr.bf16.mxu1 %v8387_v48  ;;  %v8432_v47 = vld [vmem:[#allocation8 + $0x684] ss:$16 sps:$4 sm:$0xff]   ;;  %v8435_v48 = vld [vmem:[#allocation8 + $0x68c] ss:$16 sps:$4 sm:$0xff]  }
 0x193   :  { %2020 = vmatpush1.bf16.msra.mxu0 %v8382_v49  ;;  %2102 = vmatpush1.bf16.msra.mxu1 %v8385_v50  ;;  %v8430_v49 = vld [vmem:[#allocation8 + $0x680] ss:$16 sps:$4 sm:$0xff]   ;;  %v8433_v50 = vld [vmem:[#allocation8 + $0x688] ss:$16 sps:$4 sm:$0xff]  }
 0x194   :  { %2021 = vmatprep.subr.bf16.mxu0 %v8390_v51  ;;  %2103 = vmatprep.subr.bf16.mxu1 %v8393_v52  ;;  %v8438_v51 = vld [vmem:[#allocation8 + $0x6a4] ss:$16 sps:$4 sm:$0xff]   ;;  %v8441_v52 = vld [vmem:[#allocation8 + $0x6ac] ss:$16 sps:$4 sm:$0xff]  }
 0x197   :  { %2022 = vmatpush1.bf16.msra.mxu0 %v8388_v53  ;;  %2104 = vmatpush1.bf16.msra.mxu1 %v8391_v54  ;;  %v8436_v53 = vld [vmem:[#allocation8 + $0x6a0] ss:$16 sps:$4 sm:$0xff]   ;;  %v8439_v54 = vld [vmem:[#allocation8 + $0x6a8] ss:$16 sps:$4 sm:$0xff]  }
 0x198   :  { %2023 = vmatprep.subr.bf16.mxu0 %v8396_v55  ;;  %2105 = vmatprep.subr.bf16.mxu1 %v8399_v56  ;;  %v8444_v55 = vld [vmem:[#allocation8 + $0x6c4] ss:$16 sps:$4 sm:$0xff]   ;;  %v8447_v56 = vld [vmem:[#allocation8 + $0x6cc] ss:$16 sps:$4 sm:$0xff]  }
 0x19b   :  { %2024 = vmatpush1.bf16.msra.mxu0 %v8394_v57  ;;  %2106 = vmatpush1.bf16.msra.mxu1 %v8397_v58  ;;  %v8442_v57 = vld [vmem:[#allocation8 + $0x6c0] ss:$16 sps:$4 sm:$0xff]   ;;  %v8445_v58 = vld [vmem:[#allocation8 + $0x6c8] ss:$16 sps:$4 sm:$0xff]  }
 0x19c   :  { %2025 = vmatprep.subr.bf16.mxu0 %v8402_v59  ;;  %2107 = vmatprep.subr.bf16.mxu1 %v8405_v60  ;;  %v8450_v59 = vld [vmem:[#allocation8 + $0x6e4] ss:$16 sps:$4 sm:$0xff]   ;;  %v8453_v60 = vld [vmem:[#allocation8 + $0x6ec] ss:$16 sps:$4 sm:$0xff]  }
 0x19f   :  { %2026 = vmatpush1.bf16.msra.mxu0 %v8400_v61  ;;  %2108 = vmatpush1.bf16.msra.mxu1 %v8403_v62  ;;  %v8448_v61 = vld [vmem:[#allocation8 + $0x6e0] ss:$16 sps:$4 sm:$0xff]   ;;  %v8451_v62 = vld [vmem:[#allocation8 + $0x6e8] ss:$16 sps:$4 sm:$0xff]  }
 0x1a0   :  { %2036 = vmatprep.subr.bf16.mxu0 %v8408_v63  ;;  %2118 = vmatprep.subr.bf16.mxu1 %v8411_v0  ;;  %v8456_v63 = vld [vmem:[#allocation8 + $0x704] ss:$16 sps:$4 sm:$0xff]   ;;  %v8459_v0 = vld [vmem:[#allocation8 + $0x70c] ss:$16 sps:$4 sm:$0xff]  }
 0x235   :  { %v1098_v5 = vpop.f32.mrb[0].mxu0  ;;  %v9877_v6 = vpop.f32.mrb[0].mxu1 }
 0x236   :  { %v8018_v7 = vadd.f32 %v1098_v5, %v366_v2  ;;  %v1100_v8 = vpop.f32.mrb[1].mxu0  ;;  %v1182_v12 = vpop.f32.mrb[1].mxu1  ;;  %v8454_v2 = vld [vmem:[#allocation8 + $0x700] ss:$16 sps:$4 sm:$0xff]   ;;  %v8465_v5 = vld [vmem:[#allocation8 + $0x72c] ss:$16 sps:$4 sm:$0xff]  }
 0x237   :  { %v8019_v14 = vadd.f32 %v1100_v8, %v370_v3  ;;  %v8021_v15 = vadd.f32 %v1182_v12, %v378_v4  ;;  %v1102_v16 = vpop.f32.mrb[2].mxu0  ;;  %v1184_v17 = vpop.f32.mrb[2].mxu1  ;;  %v8457_v3 = vld [vmem:[#allocation8 + $0x708] ss:$16 sps:$4 sm:$0xff]   ;;  %v8462_v4 = vld [vmem:[#allocation8 + $0x724] ss:$16 sps:$4 sm:$0xff]  }
 0x238   :  { %vm1187_vm0 = vcmp.ge.f32.partialorder %v8018_v7, 0.0  ;;  %v1191_v18 = vmul.f32 0.2, %v8018_v7  ;;  %v1103_v22 = vpop.f32.mrb[3].mxu0  ;;  %v1185_v23 = vpop.f32.mrb[3].mxu1 }
 0x239   :  { %vm1188_vm1 = vcmp.ge.f32.partialorder %v8019_v14, 0.0  ;;  %v1192_v19 = vmul.f32 0.2, %v8019_v14  ;;  %vm1190_vm2 = vcmp.ge.f32.partialorder %v8021_v15, 0.0  ;;  %v1194_v20 = vmul.f32 0.2, %v8021_v15 }
 0x23a   :  { %v1195_v21 = vsel %vm1187_vm0, %v8018_v7, %v1191_v18  ;;  %v8460_v7 = vld [vmem:[#allocation8 + $0x720] ss:$16 sps:$4 sm:$0xff]   ;;  %v8463_v8 = vld [vmem:[#allocation8 + $0x728] ss:$16 sps:$4 sm:$0xff]   ;;  %v8468_v12 = vld [vmem:[#allocation8 + $0x744] ss:$16 sps:$4 sm:$0xff]  }
 0x23b   :  { %v1196_v24 = vsel %vm1188_vm1, %v8019_v14, %v1192_v19  ;;  %v1198_v28 = vsel %vm1190_vm2, %v8021_v15, %v1194_v20  ;;  %v1199_v29 = vpack.c.bf16 %v1195_v21, %v1195_v21  ;;  %v8471_v14 = vld [vmem:[#allocation8 + $0x74c] ss:$16 sps:$4 sm:$0xff]   ;;  %v8466_v15 = vld [vmem:[#allocation8 + $0x740] ss:$16 sps:$4 sm:$0xff]   ;;  %v8469_v16 = vld [vmem:[#allocation8 + $0x748] ss:$16 sps:$4 sm:$0xff]  }
 0x23c   :  { %v1200_v25 = vpack.c.bf16 %v1196_v24, %v1196_v24  ;;  %v1202_v32 = vpack.c.bf16 %v1198_v28, %v1198_v28  ;;  %v8474_v17 = vld [vmem:[#allocation8 + $0x764] ss:$16 sps:$4 sm:$0xff]   ;;  %v8477_v18 = vld [vmem:[#allocation8 + $0x76c] ss:$16 sps:$4 sm:$0xff]   ;;  %v8472_v19 = vld [vmem:[#allocation8 + $0x760] ss:$16 sps:$4 sm:$0xff]  }
 0x23d   :  { %v8475_v20 = vld [vmem:[#allocation8 + $0x768] ss:$16 sps:$4 sm:$0xff]   ;;  %v8480_v21 = vld [vmem:[#allocation8 + $0x784] ss:$16 sps:$4 sm:$0xff]   ;;  %v8483_v22 = vld [vmem:[#allocation8 + $0x78c] ss:$16 sps:$4 sm:$0xff]  }
 0x23e   :  { %2027 = vmatprep.mubr.bf16.mxu0 %v1200_v25  ;;  %2109 = vmatprep.mubr.bf16.mxu1 %v1200_v25  ;;  %v8478_v23 = vld [vmem:[#allocation8 + $0x780] ss:$16 sps:$4 sm:$0xff]   ;;  %v8481_v24 = vld [vmem:[#allocation8 + $0x788] ss:$16 sps:$4 sm:$0xff]   ;;  %v8486_v25 = vld [vmem:[#allocation8 + $0x7a4] ss:$16 sps:$4 sm:$0xff]  }
 0x23f   :  { %2028 = vmatmul.mubr.bf16.vlgmr.msra.gmra.mrb[4].mxu0 %v1199_v29  ;;  %2110 = vmatmul.mubr.bf16.vlgmr.msra.gmra.mrb[4].mxu1 %v1199_v29  ;;  %v8484_v28 = vld [vmem:[#allocation8 + $0x7a0] ss:$16 sps:$4 sm:$0xff]   ;;  %v8487_v29 = vld [vmem:[#allocation8 + $0x7a8] ss:$16 sps:$4 sm:$0xff]  }
 0x240   :  { %2037 = vmatpush1.bf16.msra.mxu0 %v8406_v26  ;;  %2119 = vmatpush1.bf16.msra.mxu1 %v8409_v27  ;;  %v8489_v26 = vld [vmem:[#allocation8 + $0x7ac] ss:$16 sps:$4 sm:$0xff]   ;;  %v374_v27 = vrot.slane %v9869_v1, %v9833_v9  ;;  %v8496_v1 = vld [vmem:[#allocation8 + $0x7e0] ss:$16 sps:$4 sm:$0xff]  }
 0x241   :  { %2068 = vmatprep.mubr.bf16.mxu0 %v1202_v32  ;;  %2150 = vmatprep.mubr.bf16.mxu1 %v1202_v32 }
 0x242   :  { %2038 = vmatprep.subr.bf16.mxu0 %v8414_v30  ;;  %2120 = vmatprep.subr.bf16.mxu1 %v8417_v31  ;;  %v8492_v30 = vld [vmem:[#allocation8 + $0x7c4] ss:$16 sps:$4 sm:$0xff]   ;;  %v8495_v31 = vld [vmem:[#allocation8 + $0x7cc] ss:$16 sps:$4 sm:$0xff]   ;;  %v8020_v32 = vadd.f32 %v9877_v6, %v374_v27  ;;  %v8502_v6 = vld [vmem:[#allocation8 + $0x800] ss:$16 sps:$4 sm:$0xff]  }
 0x243   :  { %v8567_v27 = vld [vmem:[#allocation8 + $0x94c] ss:$16 sps:$4 sm:$0xff]  }
 0x244   :  { %2039 = vmatpush1.bf16.msra.mxu0 %v8412_v33  ;;  %2121 = vmatpush1.bf16.msra.mxu1 %v8415_v34  ;;  %v8490_v33 = vld [vmem:[#allocation8 + $0x7c0] ss:$16 sps:$4 sm:$0xff]   ;;  %v8493_v34 = vld [vmem:[#allocation8 + $0x7c8] ss:$16 sps:$4 sm:$0xff]   ;;  %vm1189_vm3 = vcmp.ge.f32.partialorder %v8020_v32, 0.0 }
 0x245   :  { %2040 = vmatprep.subr.bf16.mxu0 %v8420_v35  ;;  %2122 = vmatprep.subr.bf16.mxu1 %v8423_v36  ;;  %v8498_v35 = vld [vmem:[#allocation8 + $0x7e4] ss:$16 sps:$4 sm:$0xff]   ;;  %v8501_v36 = vld [vmem:[#allocation8 + $0x7ec] ss:$16 sps:$4 sm:$0xff]  }
 0x248   :  { %2041 = vmatpush1.bf16.msra.mxu0 %v8418_v37  ;;  %2123 = vmatpush1.bf16.msra.mxu1 %v8421_v38  ;;  %v1193_v37 = vmul.f32 0.2, %v8020_v32  ;;  %v8499_v38 = vld [vmem:[#allocation8 + $0x7e8] ss:$16 sps:$4 sm:$0xff]  }
 0x249   :  { %2042 = vmatprep.subr.bf16.mxu0 %v8426_v39  ;;  %2124 = vmatprep.subr.bf16.mxu1 %v8429_v40  ;;  %v8504_v39 = vld [vmem:[#allocation8 + $0x804] ss:$16 sps:$4 sm:$0xff]   ;;  %v8507_v40 = vld [vmem:[#allocation8 + $0x80c] ss:$16 sps:$4 sm:$0xff]  }
 0x24c   :  { %2043 = vmatpush1.bf16.msra.mxu0 %v8424_v43  ;;  %2125 = vmatpush1.bf16.msra.mxu1 %v8427_v44  ;;  %v1197_v43 = vsel %vm1189_vm3, %v8020_v32, %v1193_v37  ;;  %v8505_v44 = vld [vmem:[#allocation8 + $0x808] ss:$16 sps:$4 sm:$0xff]   ;;  %v8568_v32 = vld [vmem:[#allocation8 + $0x960] ss:$16 sps:$4 sm:$0xff]  }
 0x24d   :  { %2044 = vmatprep.subr.bf16.mxu0 %v8432_v47  ;;  %2126 = vmatprep.subr.bf16.mxu1 %v8435_v48  ;;  %v1201_v47 = vpack.c.bf16 %v1197_v43, %v1197_v43  ;;  %v8510_v48 = vld [vmem:[#allocation8 + $0x824] ss:$16 sps:$4 sm:$0xff]   ;;  %v8577_v37 = vld [vmem:[#allocation8 + $0x988] ss:$16 sps:$4 sm:$0xff]  }
 0x24e   :  { %v8588_v43 = vld [vmem:[#allocation8 + $0x9c4] ss:$16 sps:$4 sm:$0xff]  }
 0x250   :  { %2045 = vmatpush1.bf16.msra.mxu0 %v8430_v49  ;;  %2127 = vmatpush1.bf16.msra.mxu1 %v8433_v50  ;;  %v8513_v49 = vld [vmem:[#allocation8 + $0x82c] ss:$16 sps:$4 sm:$0xff]   ;;  %v8508_v50 = vld [vmem:[#allocation8 + $0x820] ss:$16 sps:$4 sm:$0xff]  }
 0x251   :  { %2046 = vmatprep.subr.bf16.mxu0 %v8438_v51  ;;  %2128 = vmatprep.subr.bf16.mxu1 %v8441_v52  ;;  %v8511_v51 = vld [vmem:[#allocation8 + $0x828] ss:$16 sps:$4 sm:$0xff]   ;;  %v8516_v52 = vld [vmem:[#allocation8 + $0x844] ss:$16 sps:$4 sm:$0xff]  }
 0x254   :  { %2047 = vmatpush1.bf16.msra.mxu0 %v8436_v53  ;;  %2129 = vmatpush1.bf16.msra.mxu1 %v8439_v54  ;;  %v8519_v53 = vld [vmem:[#allocation8 + $0x84c] ss:$16 sps:$4 sm:$0xff]   ;;  %v8514_v54 = vld [vmem:[#allocation8 + $0x840] ss:$16 sps:$4 sm:$0xff]  }
 0x255   :  { %2048 = vmatprep.subr.bf16.mxu0 %v8444_v55  ;;  %2130 = vmatprep.subr.bf16.mxu1 %v8447_v56  ;;  %v8517_v55 = vld [vmem:[#allocation8 + $0x848] ss:$16 sps:$4 sm:$0xff]   ;;  %v8522_v56 = vld [vmem:[#allocation8 + $0x864] ss:$16 sps:$4 sm:$0xff]  }
 0x258   :  { %2049 = vmatpush1.bf16.msra.mxu0 %v8442_v57  ;;  %2131 = vmatpush1.bf16.msra.mxu1 %v8445_v58  ;;  %v8525_v57 = vld [vmem:[#allocation8 + $0x86c] ss:$16 sps:$4 sm:$0xff]   ;;  %v8520_v58 = vld [vmem:[#allocation8 + $0x860] ss:$16 sps:$4 sm:$0xff]  }
 0x259   :  { %2050 = vmatprep.subr.bf16.mxu0 %v8450_v59  ;;  %2132 = vmatprep.subr.bf16.mxu1 %v8453_v60  ;;  %v8523_v59 = vld [vmem:[#allocation8 + $0x868] ss:$16 sps:$4 sm:$0xff]   ;;  %v8528_v60 = vld [vmem:[#allocation8 + $0x884] ss:$16 sps:$4 sm:$0xff]  }
 0x25c   :  { %2051 = vmatpush1.bf16.msra.mxu0 %v8448_v61  ;;  %2133 = vmatpush1.bf16.msra.mxu1 %v8451_v62  ;;  %v8531_v61 = vld [vmem:[#allocation8 + $0x88c] ss:$16 sps:$4 sm:$0xff]   ;;  %v8526_v62 = vld [vmem:[#allocation8 + $0x880] ss:$16 sps:$4 sm:$0xff]  }
 0x25d   :  { %2052 = vmatprep.subr.bf16.mxu0 %v8456_v63  ;;  %2134 = vmatprep.subr.bf16.mxu1 %v8459_v0  ;;  %v8529_v63 = vld [vmem:[#allocation8 + $0x888] ss:$16 sps:$4 sm:$0xff]   ;;  %v8534_v0 = vld [vmem:[#allocation8 + $0x8a4] ss:$16 sps:$4 sm:$0xff]  }
 0x260   :  { %2053 = vmatpush1.bf16.msra.mxu0 %v8454_v2  ;;  %2135 = vmatpush1.bf16.msra.mxu1 %v8457_v3  ;;  %v8537_v2 = vld [vmem:[#allocation8 + $0x8ac] ss:$16 sps:$4 sm:$0xff]   ;;  %v8532_v3 = vld [vmem:[#allocation8 + $0x8a0] ss:$16 sps:$4 sm:$0xff]  }
 0x261   :  { %2054 = vmatprep.subr.bf16.mxu0 %v8462_v4  ;;  %2136 = vmatprep.subr.bf16.mxu1 %v8465_v5  ;;  %v8535_v4 = vld [vmem:[#allocation8 + $0x8a8] ss:$16 sps:$4 sm:$0xff]   ;;  %v8540_v5 = vld [vmem:[#allocation8 + $0x8c4] ss:$16 sps:$4 sm:$0xff]  }
 0x264   :  { %2055 = vmatpush1.bf16.msra.mxu0 %v8460_v7  ;;  %2137 = vmatpush1.bf16.msra.mxu1 %v8463_v8  ;;  %v8543_v7 = vld [vmem:[#allocation8 + $0x8cc] ss:$16 sps:$4 sm:$0xff]   ;;  %v8538_v8 = vld [vmem:[#allocation8 + $0x8c0] ss:$16 sps:$4 sm:$0xff]  }
 0x265   :  { %2056 = vmatprep.subr.bf16.mxu0 %v8468_v12  ;;  %2138 = vmatprep.subr.bf16.mxu1 %v8471_v14  ;;  %v8541_v12 = vld [vmem:[#allocation8 + $0x8c8] ss:$16 sps:$4 sm:$0xff]   ;;  %v8546_v14 = vld [vmem:[#allocation8 + $0x8e4] ss:$16 sps:$4 sm:$0xff]  }
 0x268   :  { %2057 = vmatpush1.bf16.msra.mxu0 %v8466_v15  ;;  %2139 = vmatpush1.bf16.msra.mxu1 %v8469_v16  ;;  %v8549_v15 = vld [vmem:[#allocation8 + $0x8ec] ss:$16 sps:$4 sm:$0xff]   ;;  %v8544_v16 = vld [vmem:[#allocation8 + $0x8e0] ss:$16 sps:$4 sm:$0xff]  }
 0x269   :  { %2058 = vmatprep.subr.bf16.mxu0 %v8474_v17  ;;  %2140 = vmatprep.subr.bf16.mxu1 %v8477_v18  ;;  %v8547_v17 = vld [vmem:[#allocation8 + $0x8e8] ss:$16 sps:$4 sm:$0xff]   ;;  %v8552_v18 = vld [vmem:[#allocation8 + $0x904] ss:$16 sps:$4 sm:$0xff]  }
 0x26c   :  { %2059 = vmatpush1.bf16.msra.mxu0 %v8472_v19  ;;  %2141 = vmatpush1.bf16.msra.mxu1 %v8475_v20  ;;  %v8555_v19 = vld [vmem:[#allocation8 + $0x90c] ss:$16 sps:$4 sm:$0xff]   ;;  %v8550_v20 = vld [vmem:[#allocation8 + $0x900] ss:$16 sps:$4 sm:$0xff]  }
 0x26d   :  { %2060 = vmatprep.subr.bf16.mxu0 %v8480_v21  ;;  %2142 = vmatprep.subr.bf16.mxu1 %v8483_v22  ;;  %v8553_v21 = vld [vmem:[#allocation8 + $0x908] ss:$16 sps:$4 sm:$0xff]   ;;  %v8558_v22 = vld [vmem:[#allocation8 + $0x924] ss:$16 sps:$4 sm:$0xff]  }
 0x270   :  { %2061 = vmatpush1.bf16.msra.mxu0 %v8478_v23  ;;  %2143 = vmatpush1.bf16.msra.mxu1 %v8481_v24  ;;  %v8561_v23 = vld [vmem:[#allocation8 + $0x92c] ss:$16 sps:$4 sm:$0xff]   ;;  %v8556_v24 = vld [vmem:[#allocation8 + $0x920] ss:$16 sps:$4 sm:$0xff]  }
 0x271   :  { %2062 = vmatprep.subr.bf16.mxu0 %v8486_v25  ;;  %2144 = vmatprep.subr.bf16.mxu1 %v8489_v26  ;;  %v8559_v25 = vld [vmem:[#allocation8 + $0x928] ss:$16 sps:$4 sm:$0xff]   ;;  %v8564_v26 = vld [vmem:[#allocation8 + $0x944] ss:$16 sps:$4 sm:$0xff]  }
 0x274   :  { %2063 = vmatpush1.bf16.msra.mxu0 %v8484_v28  ;;  %2145 = vmatpush1.bf16.msra.mxu1 %v8487_v29  ;;  %v8562_v28 = vld [vmem:[#allocation8 + $0x940] ss:$16 sps:$4 sm:$0xff]   ;;  %v8565_v29 = vld [vmem:[#allocation8 + $0x948] ss:$16 sps:$4 sm:$0xff]  }
 0x275   :  { %2064 = vmatprep.subr.bf16.mxu0 %v8492_v30  ;;  %2146 = vmatprep.subr.bf16.mxu1 %v8495_v31  ;;  %v8570_v30 = vld [vmem:[#allocation8 + $0x964] ss:$16 sps:$4 sm:$0xff]   ;;  %v8573_v31 = vld [vmem:[#allocation8 + $0x96c] ss:$16 sps:$4 sm:$0xff]  }
 0x278   :  { %2065 = vmatpush1.bf16.msra.mxu0 %v8490_v33  ;;  %2147 = vmatpush1.bf16.msra.mxu1 %v8493_v34  ;;  %v8571_v33 = vld [vmem:[#allocation8 + $0x968] ss:$16 sps:$4 sm:$0xff]   ;;  %v8576_v34 = vld [vmem:[#allocation8 + $0x984] ss:$16 sps:$4 sm:$0xff]  }
 0x279   :  { %2066 = vmatprep.subr.bf16.mxu0 %v8498_v35  ;;  %2148 = vmatprep.subr.bf16.mxu1 %v8501_v36  ;;  %v8579_v35 = vld [vmem:[#allocation8 + $0x98c] ss:$16 sps:$4 sm:$0xff]   ;;  %v8574_v36 = vld [vmem:[#allocation8 + $0x980] ss:$16 sps:$4 sm:$0xff]  }
 0x27c   :  { %2067 = vmatpush1.bf16.msra.mxu0 %v8496_v1  ;;  %2149 = vmatpush1.bf16.msra.mxu1 %v8499_v38  ;;  %v8582_v1 = vld [vmem:[#allocation8 + $0x9a4] ss:$16 sps:$4 sm:$0xff]   ;;  %v8585_v38 = vld [vmem:[#allocation8 + $0x9ac] ss:$16 sps:$4 sm:$0xff]  }
 0x27d   :  { %2967 = vmatprep.subr.bf16.mxu0 %v8504_v39  ;;  %3049 = vmatprep.subr.bf16.mxu1 %v8507_v40  ;;  %v8580_v39 = vld [vmem:[#allocation8 + $0x9a0] ss:$16 sps:$4 sm:$0xff]   ;;  %v8583_v40 = vld [vmem:[#allocation8 + $0x9a8] ss:$16 sps:$4 sm:$0xff]  }
 0x27f   :  { %2069 = vmatmul.mubr.bf16.vlgmr.msra.gmra.mrb[4].mxu0 %v1201_v47  ;;  %2151 = vmatmul.mubr.bf16.vlgmr.msra.gmra.mrb[4].mxu1 %v1201_v47  ;;  %v8589_v47 = vld [vmem:[#allocation8 + $0x9c8] ss:$16 sps:$4 sm:$0xff]  }
 0x280   :  { %2968 = vmatpush1.bf16.msra.mxu0 %v8502_v6  ;;  %3050 = vmatpush1.bf16.msra.mxu1 %v8505_v44  ;;  %v8591_v6 = vld [vmem:[#allocation8 + $0x9cc] ss:$16 sps:$4 sm:$0xff]   ;;  %v8586_v44 = vld [vmem:[#allocation8 + $0x9c0] ss:$16 sps:$4 sm:$0xff]  }
 0x281   :  { %2969 = vmatprep.subr.bf16.mxu0 %v8510_v48  ;;  %3051 = vmatprep.subr.bf16.mxu1 %v8513_v49  ;;  %v8594_v48 = vld [vmem:[#allocation8 + $0x9e4] ss:$16 sps:$4 sm:$0xff]   ;;  %v8597_v49 = vld [vmem:[#allocation8 + $0x9ec] ss:$16 sps:$4 sm:$0xff]  }
 0x284   :  { %2970 = vmatpush1.bf16.msra.mxu0 %v8508_v50  ;;  %3052 = vmatpush1.bf16.msra.mxu1 %v8511_v51  ;;  %v8592_v50 = vld [vmem:[#allocation8 + $0x9e0] ss:$16 sps:$4 sm:$0xff]   ;;  %v8595_v51 = vld [vmem:[#allocation8 + $0x9e8] ss:$16 sps:$4 sm:$0xff]  }
 0x285   :  { %2971 = vmatprep.subr.bf16.mxu0 %v8516_v52  ;;  %3053 = vmatprep.subr.bf16.mxu1 %v8519_v53  ;;  %v8600_v52 = vld [vmem:[#allocation8 + $0xa04] ss:$16 sps:$4 sm:$0xff]   ;;  %v8603_v53 = vld [vmem:[#allocation8 + $0xa0c] ss:$16 sps:$4 sm:$0xff]  }
 0x288   :  { %2972 = vmatpush1.bf16.msra.mxu0 %v8514_v54  ;;  %3054 = vmatpush1.bf16.msra.mxu1 %v8517_v55  ;;  %v9882_v54 = vld [vmem:[#allocation10 + $0x4] sm:$0xf] }
 0x289   :  { %2973 = vmatprep.subr.bf16.mxu0 %v8522_v56  ;;  %3055 = vmatprep.subr.bf16.mxu1 %v8525_v57  ;;  %v1338_v55 = vrot.slane %v9882_v54, %v9835_v10  ;;  %v1342_v56 = vrot.slane %v9882_v54, %v9837_v11  ;;  %v1350_v57 = vrot.slane %v9882_v54, %v9840_v13 }
 0x28c   :  { %2974 = vmatpush1.bf16.msra.mxu0 %v8520_v58  ;;  %3056 = vmatpush1.bf16.msra.mxu1 %v8523_v59 }
 0x28d   :  { %2975 = vmatprep.subr.bf16.mxu0 %v8528_v60  ;;  %3057 = vmatprep.subr.bf16.mxu1 %v8531_v61 }
 0x290   :  { %2976 = vmatpush1.bf16.msra.mxu0 %v8526_v62  ;;  %3058 = vmatpush1.bf16.msra.mxu1 %v8529_v63 }
 0x291   :  { %2977 = vmatprep.subr.bf16.mxu0 %v8534_v0  ;;  %3059 = vmatprep.subr.bf16.mxu1 %v8537_v2 }
 0x294   :  { %2978 = vmatpush1.bf16.msra.mxu0 %v8532_v3  ;;  %3060 = vmatpush1.bf16.msra.mxu1 %v8535_v4 }
 0x295   :  { %2979 = vmatprep.subr.bf16.mxu0 %v8540_v5  ;;  %3061 = vmatprep.subr.bf16.mxu1 %v8543_v7 }
 0x298   :  { %2980 = vmatpush1.bf16.msra.mxu0 %v8538_v8  ;;  %3062 = vmatpush1.bf16.msra.mxu1 %v8541_v12 }
 0x299   :  { %2981 = vmatprep.subr.bf16.mxu0 %v8546_v14  ;;  %3063 = vmatprep.subr.bf16.mxu1 %v8549_v15 }
 0x29c   :  { %2982 = vmatpush1.bf16.msra.mxu0 %v8544_v16  ;;  %3064 = vmatpush1.bf16.msra.mxu1 %v8547_v17  ;;  %v8598_v17 = vld [vmem:[#allocation8 + $0xa00] ss:$16 sps:$4 sm:$0xff]  }
 0x29d   :  { %2983 = vmatprep.subr.bf16.mxu0 %v8552_v18  ;;  %3065 = vmatprep.subr.bf16.mxu1 %v8555_v19  ;;  %v8601_v18 = vld [vmem:[#allocation8 + $0xa08] ss:$16 sps:$4 sm:$0xff]  }
 0x2a0   :  { %2984 = vmatpush1.bf16.msra.mxu0 %v8550_v20  ;;  %3066 = vmatpush1.bf16.msra.mxu1 %v8553_v21  ;;  %v8606_v21 = vld [vmem:[#allocation8 + $0xa24] ss:$16 sps:$4 sm:$0xff]  }
 0x2a1   :  { %2985 = vmatprep.subr.bf16.mxu0 %v8558_v22  ;;  %3067 = vmatprep.subr.bf16.mxu1 %v8561_v23  ;;  %v8609_v22 = vld [vmem:[#allocation8 + $0xa2c] ss:$16 sps:$4 sm:$0xff]  }
 0x2a4   :  { %2986 = vmatpush1.bf16.msra.mxu0 %v8556_v24  ;;  %3068 = vmatpush1.bf16.msra.mxu1 %v8559_v25  ;;  %v8604_v24 = vld [vmem:[#allocation8 + $0xa20] ss:$16 sps:$4 sm:$0xff]   ;;  %v8607_v25 = vld [vmem:[#allocation8 + $0xa28] ss:$16 sps:$4 sm:$0xff]  }
 0x2a5   :  { %2987 = vmatprep.subr.bf16.mxu0 %v8564_v26  ;;  %3069 = vmatprep.subr.bf16.mxu1 %v8567_v27  ;;  %v8612_v26 = vld [vmem:[#allocation8 + $0xa44] ss:$16 sps:$4 sm:$0xff]   ;;  %v8615_v27 = vld [vmem:[#allocation8 + $0xa4c] ss:$16 sps:$4 sm:$0xff]  }
 0x2a8   :  { %2988 = vmatpush1.bf16.msra.mxu0 %v8562_v28  ;;  %3070 = vmatpush1.bf16.msra.mxu1 %v8565_v29  ;;  %v8610_v28 = vld [vmem:[#allocation8 + $0xa40] ss:$16 sps:$4 sm:$0xff]   ;;  %v8613_v29 = vld [vmem:[#allocation8 + $0xa48] ss:$16 sps:$4 sm:$0xff]  }
 0x2a9   :  { %2989 = vmatprep.subr.bf16.mxu0 %v8570_v30  ;;  %3071 = vmatprep.subr.bf16.mxu1 %v8573_v31  ;;  %v8618_v30 = vld [vmem:[#allocation8 + $0xa64] ss:$16 sps:$4 sm:$0xff]   ;;  %v8621_v31 = vld [vmem:[#allocation8 + $0xa6c] ss:$16 sps:$4 sm:$0xff]  }
 0x2ac   :  { %2990 = vmatpush1.bf16.msra.mxu0 %v8568_v32  ;;  %3072 = vmatpush1.bf16.msra.mxu1 %v8571_v33  ;;  %v8616_v32 = vld [vmem:[#allocation8 + $0xa60] ss:$16 sps:$4 sm:$0xff]   ;;  %v8619_v33 = vld [vmem:[#allocation8 + $0xa68] ss:$16 sps:$4 sm:$0xff]  }
 0x2ad   :  { %2991 = vmatprep.subr.bf16.mxu0 %v8576_v34  ;;  %3073 = vmatprep.subr.bf16.mxu1 %v8579_v35  ;;  %v8624_v34 = vld [vmem:[#allocation8 + $0xa84] ss:$16 sps:$4 sm:$0xff]   ;;  %v8627_v35 = vld [vmem:[#allocation8 + $0xa8c] ss:$16 sps:$4 sm:$0xff]  }
 0x2b0   :  { %2992 = vmatpush1.bf16.msra.mxu0 %v8574_v36  ;;  %3074 = vmatpush1.bf16.msra.mxu1 %v8577_v37  ;;  %v8622_v36 = vld [vmem:[#allocation8 + $0xa80] ss:$16 sps:$4 sm:$0xff]   ;;  %v8625_v37 = vld [vmem:[#allocation8 + $0xa88] ss:$16 sps:$4 sm:$0xff]  }
 0x2b1   :  { %2993 = vmatprep.subr.bf16.mxu0 %v8582_v1  ;;  %3075 = vmatprep.subr.bf16.mxu1 %v8585_v38  ;;  %v8630_v1 = vld [vmem:[#allocation8 + $0xaa4] ss:$16 sps:$4 sm:$0xff]   ;;  %v8633_v38 = vld [vmem:[#allocation8 + $0xaac] ss:$16 sps:$4 sm:$0xff]  }
 0x2b4   :  { %2994 = vmatpush1.bf16.msra.mxu0 %v8580_v39  ;;  %3076 = vmatpush1.bf16.msra.mxu1 %v8583_v40  ;;  %v8628_v39 = vld [vmem:[#allocation8 + $0xaa0] ss:$16 sps:$4 sm:$0xff]   ;;  %v8631_v40 = vld [vmem:[#allocation8 + $0xaa8] ss:$16 sps:$4 sm:$0xff]  }
 0x2b5   :  { %2995 = vmatprep.subr.bf16.mxu0 %v8588_v43  ;;  %3077 = vmatprep.subr.bf16.mxu1 %v8591_v6  ;;  %v8636_v43 = vld [vmem:[#allocation8 + $0xac4] ss:$16 sps:$4 sm:$0xff]   ;;  %v8639_v6 = vld [vmem:[#allocation8 + $0xacc] ss:$16 sps:$4 sm:$0xff]  }
 0x2b8   :  { %2996 = vmatpush1.bf16.msra.mxu0 %v8586_v44  ;;  %3078 = vmatpush1.bf16.msra.mxu1 %v8589_v47  ;;  %v8634_v44 = vld [vmem:[#allocation8 + $0xac0] ss:$16 sps:$4 sm:$0xff]   ;;  %v8637_v47 = vld [vmem:[#allocation8 + $0xac8] ss:$16 sps:$4 sm:$0xff]  }
 0x2b9   :  { %2997 = vmatprep.subr.bf16.mxu0 %v8594_v48  ;;  %3079 = vmatprep.subr.bf16.mxu1 %v8597_v49  ;;  %v8642_v48 = vld [vmem:[#allocation8 + $0xae4] ss:$16 sps:$4 sm:$0xff]   ;;  %v8645_v49 = vld [vmem:[#allocation8 + $0xaec] ss:$16 sps:$4 sm:$0xff]  }
 0x2bc   :  { %2998 = vmatpush1.bf16.msra.mxu0 %v8592_v50  ;;  %3080 = vmatpush1.bf16.msra.mxu1 %v8595_v51  ;;  %v8640_v50 = vld [vmem:[#allocation8 + $0xae0] ss:$16 sps:$4 sm:$0xff]   ;;  %v8643_v51 = vld [vmem:[#allocation8 + $0xae8] ss:$16 sps:$4 sm:$0xff]  }
 0x2bd   :  { %3008 = vmatprep.subr.bf16.mxu0 %v8600_v52  ;;  %3090 = vmatprep.subr.bf16.mxu1 %v8603_v53  ;;  %v8648_v52 = vld [vmem:[#allocation8 + $0xb04] ss:$16 sps:$4 sm:$0xff]   ;;  %v8651_v53 = vld [vmem:[#allocation8 + $0xb0c] ss:$16 sps:$4 sm:$0xff]  }
 0x352   :  { %v2070_v58 = vpop.f32.mrb[4].mxu0  ;;  %v9890_v59 = vpop.f32.mrb[4].mxu1 }
 0x353   :  { %v8022_v60 = vadd.f32 %v2070_v58, %v1338_v55  ;;  %v2072_v61 = vpop.f32.mrb[5].mxu0  ;;  %v2154_v62 = vpop.f32.mrb[5].mxu1  ;;  %v8646_v55 = vld [vmem:[#allocation8 + $0xb00] ss:$16 sps:$4 sm:$0xff]   ;;  %v8657_v58 = vld [vmem:[#allocation8 + $0xb2c] ss:$16 sps:$4 sm:$0xff]  }
 0x354   :  { %v8023_v63 = vadd.f32 %v2072_v61, %v1342_v56  ;;  %v8025_v0 = vadd.f32 %v2154_v62, %v1350_v57  ;;  %v2074_v2 = vpop.f32.mrb[6].mxu0  ;;  %v2156_v3 = vpop.f32.mrb[6].mxu1  ;;  %v8649_v56 = vld [vmem:[#allocation8 + $0xb08] ss:$16 sps:$4 sm:$0xff]   ;;  %v8654_v57 = vld [vmem:[#allocation8 + $0xb24] ss:$16 sps:$4 sm:$0xff]  }
 0x355   :  { %vm2159_vm4 = vcmp.ge.f32.partialorder %v8022_v60, 0.0  ;;  %v2163_v4 = vmul.f32 0.2, %v8022_v60  ;;  %v2075_v12 = vpop.f32.mrb[7].mxu0  ;;  %v2157_v14 = vpop.f32.mrb[7].mxu1 }
 0x356   :  { %vm2160_vm5 = vcmp.ge.f32.partialorder %v8023_v63, 0.0  ;;  %v2164_v5 = vmul.f32 0.2, %v8023_v63  ;;  %vm2162_vm6 = vcmp.ge.f32.partialorder %v8025_v0, 0.0  ;;  %v2166_v7 = vmul.f32 0.2, %v8025_v0 }
 0x357   :  { %v2167_v8 = vsel %vm2159_vm4, %v8022_v60, %v2163_v4  ;;  %v8652_v60 = vld [vmem:[#allocation8 + $0xb20] ss:$16 sps:$4 sm:$0xff]   ;;  %v8655_v61 = vld [vmem:[#allocation8 + $0xb28] ss:$16 sps:$4 sm:$0xff]   ;;  %v8660_v62 = vld [vmem:[#allocation8 + $0xb44] ss:$16 sps:$4 sm:$0xff]  }
 0x358   :  { %v2168_v15 = vsel %vm2160_vm5, %v8023_v63, %v2164_v5  ;;  %v2170_v19 = vsel %vm2162_vm6, %v8025_v0, %v2166_v7  ;;  %v2171_v20 = vpack.c.bf16 %v2167_v8, %v2167_v8  ;;  %v8663_v63 = vld [vmem:[#allocation8 + $0xb4c] ss:$16 sps:$4 sm:$0xff]   ;;  %v8658_v0 = vld [vmem:[#allocation8 + $0xb40] ss:$16 sps:$4 sm:$0xff]   ;;  %v8661_v2 = vld [vmem:[#allocation8 + $0xb48] ss:$16 sps:$4 sm:$0xff]  }
 0x359   :  { %v2172_v16 = vpack.c.bf16 %v2168_v15, %v2168_v15  ;;  %v2174_v23 = vpack.c.bf16 %v2170_v19, %v2170_v19  ;;  %v8666_v3 = vld [vmem:[#allocation8 + $0xb64] ss:$16 sps:$4 sm:$0xff]   ;;  %v8669_v4 = vld [vmem:[#allocation8 + $0xb6c] ss:$16 sps:$4 sm:$0xff]   ;;  %v8664_v5 = vld [vmem:[#allocation8 + $0xb60] ss:$16 sps:$4 sm:$0xff]  }
 0x35a   :  { %v8667_v7 = vld [vmem:[#allocation8 + $0xb68] ss:$16 sps:$4 sm:$0xff]   ;;  %v8672_v8 = vld [vmem:[#allocation8 + $0xb84] ss:$16 sps:$4 sm:$0xff]   ;;  %v8675_v12 = vld [vmem:[#allocation8 + $0xb8c] ss:$16 sps:$4 sm:$0xff]  }
 0x35b   :  { %2999 = vmatprep.mubr.bf16.mxu0 %v2172_v16  ;;  %3081 = vmatprep.mubr.bf16.mxu1 %v2172_v16  ;;  %v8670_v14 = vld [vmem:[#allocation8 + $0xb80] ss:$16 sps:$4 sm:$0xff]   ;;  %v8673_v15 = vld [vmem:[#allocation8 + $0xb88] ss:$16 sps:$4 sm:$0xff]   ;;  %v8678_v16 = vld [vmem:[#allocation8 + $0xba4] ss:$16 sps:$4 sm:$0xff]  }
 0x35c   :  { %3000 = vmatmul.mubr.bf16.vlgmr.msra.gmra.mrb[8].mxu0 %v2171_v20  ;;  %3082 = vmatmul.mubr.bf16.vlgmr.msra.gmra.mrb[8].mxu1 %v2171_v20  ;;  %v8676_v19 = vld [vmem:[#allocation8 + $0xba0] ss:$16 sps:$4 sm:$0xff]   ;;  %v8679_v20 = vld [vmem:[#allocation8 + $0xba8] ss:$16 sps:$4 sm:$0xff]  }
 0x35d   :  { %3009 = vmatpush1.bf16.msra.mxu0 %v8598_v17  ;;  %3091 = vmatpush1.bf16.msra.mxu1 %v8601_v18  ;;  %v8681_v17 = vld [vmem:[#allocation8 + $0xbac] ss:$16 sps:$4 sm:$0xff]   ;;  %v1346_v18 = vrot.slane %v9882_v54, %v9833_v9  ;;  %v8688_v54 = vld [vmem:[#allocation8 + $0xbe0] ss:$16 sps:$4 sm:$0xff]  }
 0x35e   :  { %3040 = vmatprep.mubr.bf16.mxu0 %v2174_v23  ;;  %3122 = vmatprep.mubr.bf16.mxu1 %v2174_v23 }
 0x35f   :  { %3010 = vmatprep.subr.bf16.mxu0 %v8606_v21  ;;  %3092 = vmatprep.subr.bf16.mxu1 %v8609_v22  ;;  %v8684_v21 = vld [vmem:[#allocation8 + $0xbc4] ss:$16 sps:$4 sm:$0xff]   ;;  %v8687_v22 = vld [vmem:[#allocation8 + $0xbcc] ss:$16 sps:$4 sm:$0xff]   ;;  %v8024_v23 = vadd.f32 %v9890_v59, %v1346_v18  ;;  %v8694_v59 = vld [vmem:[#allocation8 + $0xc00] ss:$16 sps:$4 sm:$0xff]  }
 0x360   :  { %v8759_v18 = vld [vmem:[#allocation8 + $0xd4c] ss:$16 sps:$4 sm:$0xff]  }
 0x361   :  { %3011 = vmatpush1.bf16.msra.mxu0 %v8604_v24  ;;  %3093 = vmatpush1.bf16.msra.mxu1 %v8607_v25  ;;  %v8682_v24 = vld [vmem:[#allocation8 + $0xbc0] ss:$16 sps:$4 sm:$0xff]   ;;  %v8685_v25 = vld [vmem:[#allocation8 + $0xbc8] ss:$16 sps:$4 sm:$0xff]   ;;  %vm2161_vm7 = vcmp.ge.f32.partialorder %v8024_v23, 0.0 }
 0x362   :  { %3012 = vmatprep.subr.bf16.mxu0 %v8612_v26  ;;  %3094 = vmatprep.subr.bf16.mxu1 %v8615_v27  ;;  %v8690_v26 = vld [vmem:[#allocation8 + $0xbe4] ss:$16 sps:$4 sm:$0xff]   ;;  %v8693_v27 = vld [vmem:[#allocation8 + $0xbec] ss:$16 sps:$4 sm:$0xff]  }
 0x365   :  { %3013 = vmatpush1.bf16.msra.mxu0 %v8610_v28  ;;  %3095 = vmatpush1.bf16.msra.mxu1 %v8613_v29  ;;  %v2165_v28 = vmul.f32 0.2, %v8024_v23  ;;  %v8691_v29 = vld [vmem:[#allocation8 + $0xbe8] ss:$16 sps:$4 sm:$0xff]  }
 0x366   :  { %3014 = vmatprep.subr.bf16.mxu0 %v8618_v30  ;;  %3096 = vmatprep.subr.bf16.mxu1 %v8621_v31  ;;  %v8696_v30 = vld [vmem:[#allocation8 + $0xc04] ss:$16 sps:$4 sm:$0xff]   ;;  %v8699_v31 = vld [vmem:[#allocation8 + $0xc0c] ss:$16 sps:$4 sm:$0xff]  }
 0x369   :  { %3015 = vmatpush1.bf16.msra.mxu0 %v8616_v32  ;;  %3097 = vmatpush1.bf16.msra.mxu1 %v8619_v33  ;;  %v2169_v32 = vsel %vm2161_vm7, %v8024_v23, %v2165_v28  ;;  %v8697_v33 = vld [vmem:[#allocation8 + $0xc08] ss:$16 sps:$4 sm:$0xff]   ;;  %v8760_v23 = vld [vmem:[#allocation8 + $0xd60] ss:$16 sps:$4 sm:$0xff]  }
 0x36a   :  { %3016 = vmatprep.subr.bf16.mxu0 %v8624_v34  ;;  %3098 = vmatprep.subr.bf16.mxu1 %v8627_v35  ;;  %v2173_v34 = vpack.c.bf16 %v2169_v32, %v2169_v32  ;;  %v8702_v35 = vld [vmem:[#allocation8 + $0xc24] ss:$16 sps:$4 sm:$0xff]   ;;  %v8769_v28 = vld [vmem:[#allocation8 + $0xd88] ss:$16 sps:$4 sm:$0xff]  }
 0x36b   :  { %v8780_v32 = vld [vmem:[#allocation8 + $0xdc4] ss:$16 sps:$4 sm:$0xff]  }
 0x36d   :  { %3017 = vmatpush1.bf16.msra.mxu0 %v8622_v36  ;;  %3099 = vmatpush1.bf16.msra.mxu1 %v8625_v37  ;;  %v8705_v36 = vld [vmem:[#allocation8 + $0xc2c] ss:$16 sps:$4 sm:$0xff]   ;;  %v8700_v37 = vld [vmem:[#allocation8 + $0xc20] ss:$16 sps:$4 sm:$0xff]  }
 0x36e   :  { %3018 = vmatprep.subr.bf16.mxu0 %v8630_v1  ;;  %3100 = vmatprep.subr.bf16.mxu1 %v8633_v38  ;;  %v8703_v1 = vld [vmem:[#allocation8 + $0xc28] ss:$16 sps:$4 sm:$0xff]   ;;  %v8708_v38 = vld [vmem:[#allocation8 + $0xc44] ss:$16 sps:$4 sm:$0xff]  }
 0x371   :  { %3019 = vmatpush1.bf16.msra.mxu0 %v8628_v39  ;;  %3101 = vmatpush1.bf16.msra.mxu1 %v8631_v40  ;;  %v8711_v39 = vld [vmem:[#allocation8 + $0xc4c] ss:$16 sps:$4 sm:$0xff]   ;;  %v8706_v40 = vld [vmem:[#allocation8 + $0xc40] ss:$16 sps:$4 sm:$0xff]  }
 0x372   :  { %3020 = vmatprep.subr.bf16.mxu0 %v8636_v43  ;;  %3102 = vmatprep.subr.bf16.mxu1 %v8639_v6  ;;  %v8709_v43 = vld [vmem:[#allocation8 + $0xc48] ss:$16 sps:$4 sm:$0xff]   ;;  %v8714_v6 = vld [vmem:[#allocation8 + $0xc64] ss:$16 sps:$4 sm:$0xff]  }
 0x375   :  { %3021 = vmatpush1.bf16.msra.mxu0 %v8634_v44  ;;  %3103 = vmatpush1.bf16.msra.mxu1 %v8637_v47  ;;  %v8717_v44 = vld [vmem:[#allocation8 + $0xc6c] ss:$16 sps:$4 sm:$0xff]   ;;  %v8712_v47 = vld [vmem:[#allocation8 + $0xc60] ss:$16 sps:$4 sm:$0xff]  }
 0x376   :  { %3022 = vmatprep.subr.bf16.mxu0 %v8642_v48  ;;  %3104 = vmatprep.subr.bf16.mxu1 %v8645_v49  ;;  %v8715_v48 = vld [vmem:[#allocation8 + $0xc68] ss:$16 sps:$4 sm:$0xff]   ;;  %v8720_v49 = vld [vmem:[#allocation8 + $0xc84] ss:$16 sps:$4 sm:$0xff]  }
 0x379   :  { %3023 = vmatpush1.bf16.msra.mxu0 %v8640_v50  ;;  %3105 = vmatpush1.bf16.msra.mxu1 %v8643_v51  ;;  %v8723_v50 = vld [vmem:[#allocation8 + $0xc8c] ss:$16 sps:$4 sm:$0xff]   ;;  %v8718_v51 = vld [vmem:[#allocation8 + $0xc80] ss:$16 sps:$4 sm:$0xff]  }
 0x37a   :  { %3024 = vmatprep.subr.bf16.mxu0 %v8648_v52  ;;  %3106 = vmatprep.subr.bf16.mxu1 %v8651_v53  ;;  %v8721_v52 = vld [vmem:[#allocation8 + $0xc88] ss:$16 sps:$4 sm:$0xff]   ;;  %v8726_v53 = vld [vmem:[#allocation8 + $0xca4] ss:$16 sps:$4 sm:$0xff]  }
 0x37d   :  { %3025 = vmatpush1.bf16.msra.mxu0 %v8646_v55  ;;  %3107 = vmatpush1.bf16.msra.mxu1 %v8649_v56  ;;  %v8729_v55 = vld [vmem:[#allocation8 + $0xcac] ss:$16 sps:$4 sm:$0xff]   ;;  %v8724_v56 = vld [vmem:[#allocation8 + $0xca0] ss:$16 sps:$4 sm:$0xff]  }
 0x37e   :  { %3026 = vmatprep.subr.bf16.mxu0 %v8654_v57  ;;  %3108 = vmatprep.subr.bf16.mxu1 %v8657_v58  ;;  %v8727_v57 = vld [vmem:[#allocation8 + $0xca8] ss:$16 sps:$4 sm:$0xff]   ;;  %v8732_v58 = vld [vmem:[#allocation8 + $0xcc4] ss:$16 sps:$4 sm:$0xff]  }
 0x381   :  { %3027 = vmatpush1.bf16.msra.mxu0 %v8652_v60  ;;  %3109 = vmatpush1.bf16.msra.mxu1 %v8655_v61  ;;  %v8735_v60 = vld [vmem:[#allocation8 + $0xccc] ss:$16 sps:$4 sm:$0xff]   ;;  %v8730_v61 = vld [vmem:[#allocation8 + $0xcc0] ss:$16 sps:$4 sm:$0xff]  }
 0x382   :  { %3028 = vmatprep.subr.bf16.mxu0 %v8660_v62  ;;  %3110 = vmatprep.subr.bf16.mxu1 %v8663_v63  ;;  %v8733_v62 = vld [vmem:[#allocation8 + $0xcc8] ss:$16 sps:$4 sm:$0xff]   ;;  %v8738_v63 = vld [vmem:[#allocation8 + $0xce4] ss:$16 sps:$4 sm:$0xff]  }
 0x385   :  { %3029 = vmatpush1.bf16.msra.mxu0 %v8658_v0  ;;  %3111 = vmatpush1.bf16.msra.mxu1 %v8661_v2  ;;  %v8741_v0 = vld [vmem:[#allocation8 + $0xcec] ss:$16 sps:$4 sm:$0xff]   ;;  %v8736_v2 = vld [vmem:[#allocation8 + $0xce0] ss:$16 sps:$4 sm:$0xff]  }
 0x386   :  { %3030 = vmatprep.subr.bf16.mxu0 %v8666_v3  ;;  %3112 = vmatprep.subr.bf16.mxu1 %v8669_v4  ;;  %v8739_v3 = vld [vmem:[#allocation8 + $0xce8] ss:$16 sps:$4 sm:$0xff]   ;;  %v8744_v4 = vld [vmem:[#allocation8 + $0xd04] ss:$16 sps:$4 sm:$0xff]  }
 0x389   :  { %3031 = vmatpush1.bf16.msra.mxu0 %v8664_v5  ;;  %3113 = vmatpush1.bf16.msra.mxu1 %v8667_v7  ;;  %v8747_v5 = vld [vmem:[#allocation8 + $0xd0c] ss:$16 sps:$4 sm:$0xff]   ;;  %v8742_v7 = vld [vmem:[#allocation8 + $0xd00] ss:$16 sps:$4 sm:$0xff]  }
 0x38a   :  { %3032 = vmatprep.subr.bf16.mxu0 %v8672_v8  ;;  %3114 = vmatprep.subr.bf16.mxu1 %v8675_v12  ;;  %v8745_v8 = vld [vmem:[#allocation8 + $0xd08] ss:$16 sps:$4 sm:$0xff]   ;;  %v8750_v12 = vld [vmem:[#allocation8 + $0xd24] ss:$16 sps:$4 sm:$0xff]  }
 0x38d   :  { %3033 = vmatpush1.bf16.msra.mxu0 %v8670_v14  ;;  %3115 = vmatpush1.bf16.msra.mxu1 %v8673_v15  ;;  %v8753_v14 = vld [vmem:[#allocation8 + $0xd2c] ss:$16 sps:$4 sm:$0xff]   ;;  %v8748_v15 = vld [vmem:[#allocation8 + $0xd20] ss:$16 sps:$4 sm:$0xff]  }
 0x38e   :  { %3034 = vmatprep.subr.bf16.mxu0 %v8678_v16  ;;  %3116 = vmatprep.subr.bf16.mxu1 %v8681_v17  ;;  %v8751_v16 = vld [vmem:[#allocation8 + $0xd28] ss:$16 sps:$4 sm:$0xff]   ;;  %v8756_v17 = vld [vmem:[#allocation8 + $0xd44] ss:$16 sps:$4 sm:$0xff]  }
 0x391   :  { %3035 = vmatpush1.bf16.msra.mxu0 %v8676_v19  ;;  %3117 = vmatpush1.bf16.msra.mxu1 %v8679_v20  ;;  %v8754_v19 = vld [vmem:[#allocation8 + $0xd40] ss:$16 sps:$4 sm:$0xff]   ;;  %v8757_v20 = vld [vmem:[#allocation8 + $0xd48] ss:$16 sps:$4 sm:$0xff]  }
 0x392   :  { %3036 = vmatprep.subr.bf16.mxu0 %v8684_v21  ;;  %3118 = vmatprep.subr.bf16.mxu1 %v8687_v22  ;;  %v8762_v21 = vld [vmem:[#allocation8 + $0xd64] ss:$16 sps:$4 sm:$0xff]   ;;  %v8765_v22 = vld [vmem:[#allocation8 + $0xd6c] ss:$16 sps:$4 sm:$0xff]  }
 0x395   :  { %3037 = vmatpush1.bf16.msra.mxu0 %v8682_v24  ;;  %3119 = vmatpush1.bf16.msra.mxu1 %v8685_v25  ;;  %v8763_v24 = vld [vmem:[#allocation8 + $0xd68] ss:$16 sps:$4 sm:$0xff]   ;;  %v8768_v25 = vld [vmem:[#allocation8 + $0xd84] ss:$16 sps:$4 sm:$0xff]  }
 0x396   :  { %3038 = vmatprep.subr.bf16.mxu0 %v8690_v26  ;;  %3120 = vmatprep.subr.bf16.mxu1 %v8693_v27  ;;  %v8771_v26 = vld [vmem:[#allocation8 + $0xd8c] ss:$16 sps:$4 sm:$0xff]   ;;  %v8766_v27 = vld [vmem:[#allocation8 + $0xd80] ss:$16 sps:$4 sm:$0xff]  }
 0x399   :  { %3039 = vmatpush1.bf16.msra.mxu0 %v8688_v54  ;;  %3121 = vmatpush1.bf16.msra.mxu1 %v8691_v29  ;;  %v8774_v54 = vld [vmem:[#allocation8 + $0xda4] ss:$16 sps:$4 sm:$0xff]   ;;  %v8777_v29 = vld [vmem:[#allocation8 + $0xdac] ss:$16 sps:$4 sm:$0xff]  }
 0x39a   :  { %3947 = vmatprep.subr.bf16.mxu0 %v8696_v30  ;;  %4029 = vmatprep.subr.bf16.mxu1 %v8699_v31  ;;  %v8772_v30 = vld [vmem:[#allocation8 + $0xda0] ss:$16 sps:$4 sm:$0xff]   ;;  %v8775_v31 = vld [vmem:[#allocation8 + $0xda8] ss:$16 sps:$4 sm:$0xff]  }
 0x39c   :  { %3041 = vmatmul.mubr.bf16.vlgmr.msra.gmra.mrb[8].mxu0 %v2173_v34  ;;  %3123 = vmatmul.mubr.bf16.vlgmr.msra.gmra.mrb[8].mxu1 %v2173_v34  ;;  %v8781_v34 = vld [vmem:[#allocation8 + $0xdc8] ss:$16 sps:$4 sm:$0xff]  }
 0x39d   :  { %3948 = vmatpush1.bf16.msra.mxu0 %v8694_v59  ;;  %4030 = vmatpush1.bf16.msra.mxu1 %v8697_v33  ;;  %v8783_v59 = vld [vmem:[#allocation8 + $0xdcc] ss:$16 sps:$4 sm:$0xff]   ;;  %v8778_v33 = vld [vmem:[#allocation8 + $0xdc0] ss:$16 sps:$4 sm:$0xff]  }
 0x39e   :  { %3949 = vmatprep.subr.bf16.mxu0 %v8702_v35  ;;  %4031 = vmatprep.subr.bf16.mxu1 %v8705_v36  ;;  %v8784_v35 = vld [vmem:[#allocation8 + $0xde0] ss:$16 sps:$4 sm:$0xff]   ;;  %v8786_v36 = vld [vmem:[#allocation8 + $0xde4] ss:$16 sps:$4 sm:$0xff]  }
 0x3a1   :  { %3950 = vmatpush1.bf16.msra.mxu0 %v8700_v37  ;;  %4032 = vmatpush1.bf16.msra.mxu1 %v8703_v1  ;;  %v8787_v37 = vld [vmem:[#allocation8 + $0xde8] ss:$16 sps:$4 sm:$0xff]   ;;  %v8789_v1 = vld [vmem:[#allocation8 + $0xdec] ss:$16 sps:$4 sm:$0xff]  }
 0x3a2   :  { %3951 = vmatprep.subr.bf16.mxu0 %v8708_v38  ;;  %4033 = vmatprep.subr.bf16.mxu1 %v8711_v39  ;;  %v8792_v38 = vld [vmem:[#allocation8 + $0xe04] ss:$16 sps:$4 sm:$0xff]   ;;  %v8795_v39 = vld [vmem:[#allocation8 + $0xe0c] ss:$16 sps:$4 sm:$0xff]  }
 0x3a5   :  { %3952 = vmatpush1.bf16.msra.mxu0 %v8706_v40  ;;  %4034 = vmatpush1.bf16.msra.mxu1 %v8709_v43  ;;  %v9895_v40 = vld [vmem:[#allocation10 + $0x8] sm:$0xf] }
 0x3a6   :  { %3953 = vmatprep.subr.bf16.mxu0 %v8714_v6  ;;  %4035 = vmatprep.subr.bf16.mxu1 %v8717_v44  ;;  %v2310_v43 = vrot.slane %v9895_v40, %v9835_v10  ;;  %v2314_v6 = vrot.slane %v9895_v40, %v9837_v11  ;;  %v2322_v44 = vrot.slane %v9895_v40, %v9840_v13 }
 0x3a9   :  { %3954 = vmatpush1.bf16.msra.mxu0 %v8712_v47  ;;  %4036 = vmatpush1.bf16.msra.mxu1 %v8715_v48 }
 0x3aa   :  { %3955 = vmatprep.subr.bf16.mxu0 %v8720_v49  ;;  %4037 = vmatprep.subr.bf16.mxu1 %v8723_v50 }
 0x3ad   :  { %3956 = vmatpush1.bf16.msra.mxu0 %v8718_v51  ;;  %4038 = vmatpush1.bf16.msra.mxu1 %v8721_v52 }
 0x3ae   :  { %3957 = vmatprep.subr.bf16.mxu0 %v8726_v53  ;;  %4039 = vmatprep.subr.bf16.mxu1 %v8729_v55 }
 0x3b1   :  { %3958 = vmatpush1.bf16.msra.mxu0 %v8724_v56  ;;  %4040 = vmatpush1.bf16.msra.mxu1 %v8727_v57 }
 0x3b2   :  { %3959 = vmatprep.subr.bf16.mxu0 %v8732_v58  ;;  %4041 = vmatprep.subr.bf16.mxu1 %v8735_v60 }
 0x3b5   :  { %3960 = vmatpush1.bf16.msra.mxu0 %v8730_v61  ;;  %4042 = vmatpush1.bf16.msra.mxu1 %v8733_v62 }
 0x3b6   :  { %3961 = vmatprep.subr.bf16.mxu0 %v8738_v63  ;;  %4043 = vmatprep.subr.bf16.mxu1 %v8741_v0 }
 0x3b9   :  { %3962 = vmatpush1.bf16.msra.mxu0 %v8736_v2  ;;  %4044 = vmatpush1.bf16.msra.mxu1 %v8739_v3 }
 0x3ba   :  { %3963 = vmatprep.subr.bf16.mxu0 %v8744_v4  ;;  %4045 = vmatprep.subr.bf16.mxu1 %v8747_v5 }
 0x3bd   :  { %3964 = vmatpush1.bf16.msra.mxu0 %v8742_v7  ;;  %4046 = vmatpush1.bf16.msra.mxu1 %v8745_v8 }
 0x3be   :  { %3965 = vmatprep.subr.bf16.mxu0 %v8750_v12  ;;  %4047 = vmatprep.subr.bf16.mxu1 %v8753_v14 }
 0x3c1   :  { %3966 = vmatpush1.bf16.msra.mxu0 %v8748_v15  ;;  %4048 = vmatpush1.bf16.msra.mxu1 %v8751_v16  ;;  %v8790_v15 = vld [vmem:[#allocation8 + $0xe00] ss:$16 sps:$4 sm:$0xff]   ;;  %v8793_v16 = vld [vmem:[#allocation8 + $0xe08] ss:$16 sps:$4 sm:$0xff]  }
 0x3c2   :  { %3967 = vmatprep.subr.bf16.mxu0 %v8756_v17  ;;  %4049 = vmatprep.subr.bf16.mxu1 %v8759_v18  ;;  %v8798_v17 = vld [vmem:[#allocation8 + $0xe24] ss:$16 sps:$4 sm:$0xff]   ;;  %v8796_v18 = vld [vmem:[#allocation8 + $0xe20] ss:$16 sps:$4 sm:$0xff]  }
 0x3c5   :  { %3968 = vmatpush1.bf16.msra.mxu0 %v8754_v19  ;;  %4050 = vmatpush1.bf16.msra.mxu1 %v8757_v20  ;;  %v8799_v19 = vld [vmem:[#allocation8 + $0xe28] ss:$16 sps:$4 sm:$0xff]   ;;  %v8804_v20 = vld [vmem:[#allocation8 + $0xe44] ss:$16 sps:$4 sm:$0xff]  }
 0x3c6   :  { %3969 = vmatprep.subr.bf16.mxu0 %v8762_v21  ;;  %4051 = vmatprep.subr.bf16.mxu1 %v8765_v22  ;;  %v8807_v21 = vld [vmem:[#allocation8 + $0xe4c] ss:$16 sps:$4 sm:$0xff]   ;;  %v8802_v22 = vld [vmem:[#allocation8 + $0xe40] ss:$16 sps:$4 sm:$0xff]  }
 0x3c9   :  { %3970 = vmatpush1.bf16.msra.mxu0 %v8760_v23  ;;  %4052 = vmatpush1.bf16.msra.mxu1 %v8763_v24  ;;  %v8805_v23 = vld [vmem:[#allocation8 + $0xe48] ss:$16 sps:$4 sm:$0xff]   ;;  %v8810_v24 = vld [vmem:[#allocation8 + $0xe64] ss:$16 sps:$4 sm:$0xff]  }
 0x3ca   :  { %3971 = vmatprep.subr.bf16.mxu0 %v8768_v25  ;;  %4053 = vmatprep.subr.bf16.mxu1 %v8771_v26  ;;  %v8813_v25 = vld [vmem:[#allocation8 + $0xe6c] ss:$16 sps:$4 sm:$0xff]   ;;  %v8808_v26 = vld [vmem:[#allocation8 + $0xe60] ss:$16 sps:$4 sm:$0xff]  }
 0x3cd   :  { %3972 = vmatpush1.bf16.msra.mxu0 %v8766_v27  ;;  %4054 = vmatpush1.bf16.msra.mxu1 %v8769_v28  ;;  %v8811_v27 = vld [vmem:[#allocation8 + $0xe68] ss:$16 sps:$4 sm:$0xff]   ;;  %v8816_v28 = vld [vmem:[#allocation8 + $0xe84] ss:$16 sps:$4 sm:$0xff]  }
 0x3ce   :  { %3973 = vmatprep.subr.bf16.mxu0 %v8774_v54  ;;  %4055 = vmatprep.subr.bf16.mxu1 %v8777_v29  ;;  %v8819_v54 = vld [vmem:[#allocation8 + $0xe8c] ss:$16 sps:$4 sm:$0xff]   ;;  %v8814_v29 = vld [vmem:[#allocation8 + $0xe80] ss:$16 sps:$4 sm:$0xff]  }
 0x3d1   :  { %3974 = vmatpush1.bf16.msra.mxu0 %v8772_v30  ;;  %4056 = vmatpush1.bf16.msra.mxu1 %v8775_v31  ;;  %v8817_v30 = vld [vmem:[#allocation8 + $0xe88] ss:$16 sps:$4 sm:$0xff]   ;;  %v8822_v31 = vld [vmem:[#allocation8 + $0xea4] ss:$16 sps:$4 sm:$0xff]  }
 0x3d2   :  { %3975 = vmatprep.subr.bf16.mxu0 %v8780_v32  ;;  %4057 = vmatprep.subr.bf16.mxu1 %v8783_v59  ;;  %v8825_v32 = vld [vmem:[#allocation8 + $0xeac] ss:$16 sps:$4 sm:$0xff]   ;;  %v8820_v59 = vld [vmem:[#allocation8 + $0xea0] ss:$16 sps:$4 sm:$0xff]  }
 0x3d5   :  { %3976 = vmatpush1.bf16.msra.mxu0 %v8778_v33  ;;  %4058 = vmatpush1.bf16.msra.mxu1 %v8781_v34  ;;  %v8823_v33 = vld [vmem:[#allocation8 + $0xea8] ss:$16 sps:$4 sm:$0xff]   ;;  %v8828_v34 = vld [vmem:[#allocation8 + $0xec4] ss:$16 sps:$4 sm:$0xff]  }
 0x3d6   :  { %3977 = vmatprep.subr.bf16.mxu0 %v8786_v36  ;;  %4059 = vmatprep.subr.bf16.mxu1 %v8789_v1  ;;  %v8826_v36 = vld [vmem:[#allocation8 + $0xec0] ss:$16 sps:$4 sm:$0xff]   ;;  %v8834_v1 = vld [vmem:[#allocation8 + $0xee4] ss:$16 sps:$4 sm:$0xff]  }
 0x3d9   :  { %3978 = vmatpush1.bf16.msra.mxu0 %v8784_v35  ;;  %4060 = vmatpush1.bf16.msra.mxu1 %v8787_v37  ;;  %v8831_v35 = vld [vmem:[#allocation8 + $0xecc] ss:$16 sps:$4 sm:$0xff]   ;;  %v8829_v37 = vld [vmem:[#allocation8 + $0xec8] ss:$16 sps:$4 sm:$0xff]  }
 0x3da   :  { %3988 = vmatprep.subr.bf16.mxu0 %v8792_v38  ;;  %4070 = vmatprep.subr.bf16.mxu1 %v8795_v39  ;;  %v8837_v38 = vld [vmem:[#allocation8 + $0xeec] ss:$16 sps:$4 sm:$0xff]   ;;  %v8832_v39 = vld [vmem:[#allocation8 + $0xee0] ss:$16 sps:$4 sm:$0xff]  }
 0x46f   :  { %v3042_v47 = vpop.f32.mrb[8].mxu0  ;;  %v9903_v48 = vpop.f32.mrb[8].mxu1 }
 0x470   :  { %v8026_v49 = vadd.f32 %v3042_v47, %v2310_v43  ;;  %v3044_v50 = vpop.f32.mrb[9].mxu0  ;;  %v3126_v51 = vpop.f32.mrb[9].mxu1  ;;  %v8835_v43 = vld [vmem:[#allocation8 + $0xee8] ss:$16 sps:$4 sm:$0xff]   ;;  %v8838_v47 = vld [vmem:[#allocation8 + $0xf00] ss:$16 sps:$4 sm:$0xff]  }
 0x471   :  { %v8027_v52 = vadd.f32 %v3044_v50, %v2314_v6  ;;  %v8029_v53 = vadd.f32 %v3126_v51, %v2322_v44  ;;  %v3046_v55 = vpop.f32.mrb[10].mxu0  ;;  %v3128_v56 = vpop.f32.mrb[10].mxu1  ;;  %v8840_v6 = vld [vmem:[#allocation8 + $0xf04] ss:$16 sps:$4 sm:$0xff]   ;;  %v8843_v44 = vld [vmem:[#allocation8 + $0xf0c] ss:$16 sps:$4 sm:$0xff]  }
 0x472   :  { %vm3131_vm8 = vcmp.ge.f32.partialorder %v8026_v49, 0.0  ;;  %v3135_v57 = vmul.f32 0.2, %v8026_v49  ;;  %v3047_v62 = vpop.f32.mrb[11].mxu0  ;;  %v3129_v63 = vpop.f32.mrb[11].mxu1 }
 0x473   :  { %vm3132_vm9 = vcmp.ge.f32.partialorder %v8027_v52, 0.0  ;;  %v3136_v58 = vmul.f32 0.2, %v8027_v52  ;;  %vm3134_vm10 = vcmp.ge.f32.partialorder %v8029_v53, 0.0  ;;  %v3138_v60 = vmul.f32 0.2, %v8029_v53 }
 0x474   :  { %v3139_v61 = vsel %vm3131_vm8, %v8026_v49, %v3135_v57  ;;  %v8841_v49 = vld [vmem:[#allocation8 + $0xf08] ss:$16 sps:$4 sm:$0xff]   ;;  %v8846_v50 = vld [vmem:[#allocation8 + $0xf24] ss:$16 sps:$4 sm:$0xff]   ;;  %v8849_v51 = vld [vmem:[#allocation8 + $0xf2c] ss:$16 sps:$4 sm:$0xff]   ;;  %v2318_v62 = vrot.slane %v9895_v40, %v9833_v9 }
 0x475   :  { %v3143_v0 = vadd.f32 %v3139_v61, %v9857_v45  ;;  %v3140_v2 = vsel %vm3132_vm9, %v8027_v52, %v3136_v58  ;;  %v3142_v3 = vsel %vm3134_vm10, %v8029_v53, %v3138_v60  ;;  %v8844_v52 = vld [vmem:[#allocation8 + $0xf20] ss:$16 sps:$4 sm:$0xff]   ;;  %v8847_v53 = vld [vmem:[#allocation8 + $0xf28] ss:$16 sps:$4 sm:$0xff]   ;;  %v8852_v55 = vld [vmem:[#allocation8 + $0xf44] ss:$16 sps:$4 sm:$0xff]  }
 0x476   :  { %v3144_v4 = vadd.f32 %v3140_v2, %v9855_v42  ;;  %v3146_v5 = vadd.f32 %v3142_v3, %v9859_v46  ;;  %v8801_v42 = vld [vmem:[#allocation8 + $0xe2c] ss:$16 sps:$4 sm:$0xff]   ;;  %v8850_v57 = vld [vmem:[#allocation8 + $0xf40] ss:$16 sps:$4 sm:$0xff]   ;;  %v8853_v58 = vld [vmem:[#allocation8 + $0xf48] ss:$16 sps:$4 sm:$0xff]  }
 0x477   :  { %v9908_v7 = vmul.f32 0.70710677, %v3143_v0  ;;  %v8855_v56 = vld [vmem:[#allocation8 + $0xf4c] ss:$16 sps:$4 sm:$0xff]   ;;  %v8858_v60 = vld [vmem:[#allocation8 + $0xf64] ss:$16 sps:$4 sm:$0xff]  }
 0x478   :  { %v9910_v8 = vmul.f32 0.70710677, %v3144_v4  ;;  %v9912_v12 = vmul.f32 0.70710677, %v3146_v5  ;;  %v8861_v61 = vld [vmem:[#allocation8 + $0xf6c] ss:$16 sps:$4 sm:$0xff]   ;;  %v8028_v4 = vadd.f32 %v9903_v48, %v2318_v62 }
 0x479   :  { %v3151_v45 = vpack.c.bf16 %v9908_v7, %v9908_v7  ;;  %v8856_v63 = vld [vmem:[#allocation8 + $0xf60] ss:$16 sps:$4 sm:$0xff]   ;;  %v8859_v0 = vld [vmem:[#allocation8 + $0xf68] ss:$16 sps:$4 sm:$0xff]   ;;  %v8864_v2 = vld [vmem:[#allocation8 + $0xf84] ss:$16 sps:$4 sm:$0xff]  }
 0x47a   :  { %v3152_v14 = vpack.c.bf16 %v9910_v8, %v9910_v8  ;;  %v3154_v46 = vpack.c.bf16 %v9912_v12, %v9912_v12  ;;  %v8867_v3 = vld [vmem:[#allocation8 + $0xf8c] ss:$16 sps:$4 sm:$0xff]   ;;  %v8862_v5 = vld [vmem:[#allocation8 + $0xf80] ss:$16 sps:$4 sm:$0xff]   ;;  %vm3133_vm11 = vcmp.ge.f32.partialorder %v8028_v4, 0.0 }
 0x47b   :  { %v8868_v40 = vld [vmem:[#allocation8 + $0xfa0] ss:$16 sps:$4 sm:$0xff]   ;;  %v8936_v62 = vld [vmem:[#allocation8 + $0x1104] ss:$16 sps:$4 sm:$0xff]  }
 0x47c   :  { %3979 = vmatprep.mubr.bf16.mxu0 %v3152_v14  ;;  %4061 = vmatprep.mubr.bf16.mxu1 %v3152_v14  ;;  %v8865_v14 = vld [vmem:[#allocation8 + $0xf88] ss:$16 sps:$4 sm:$0xff]   ;;  %v8874_v48 = vld [vmem:[#allocation8 + $0xfc0] ss:$16 sps:$4 sm:$0xff]  }
 0x47d   :  { %3980 = vmatmul.mubr.bf16.vlgmr.msra.gmra.mrb[12].mxu0 %v3151_v45  ;;  %4062 = vmatmul.mubr.bf16.vlgmr.msra.gmra.mrb[12].mxu1 %v3151_v45  ;;  %v3137_v45 = vmul.f32 0.2, %v8028_v4 }
 0x47e   :  { %3989 = vmatpush1.bf16.msra.mxu0 %v8790_v15  ;;  %4071 = vmatpush1.bf16.msra.mxu1 %v8793_v16  ;;  %v8870_v15 = vld [vmem:[#allocation8 + $0xfa4] ss:$16 sps:$4 sm:$0xff]   ;;  %v8873_v16 = vld [vmem:[#allocation8 + $0xfac] ss:$16 sps:$4 sm:$0xff]  }
 0x47f   :  { %4020 = vmatprep.mubr.bf16.mxu0 %v3154_v46  ;;  %4102 = vmatprep.mubr.bf16.mxu1 %v3154_v46  ;;  %v8879_v46 = vld [vmem:[#allocation8 + $0xfcc] ss:$16 sps:$4 sm:$0xff]  }
 0x480   :  { %3990 = vmatprep.subr.bf16.mxu0 %v8798_v17  ;;  %4072 = vmatprep.subr.bf16.mxu1 %v8801_v42  ;;  %v8871_v17 = vld [vmem:[#allocation8 + $0xfa8] ss:$16 sps:$4 sm:$0xff]   ;;  %v8876_v42 = vld [vmem:[#allocation8 + $0xfc4] ss:$16 sps:$4 sm:$0xff]  }
 0x482   :  { %3991 = vmatpush1.bf16.msra.mxu0 %v8796_v18  ;;  %4073 = vmatpush1.bf16.msra.mxu1 %v8799_v19  ;;  %v3141_v18 = vsel %vm3133_vm11, %v8028_v4, %v3137_v45  ;;  %v8877_v19 = vld [vmem:[#allocation8 + $0xfc8] ss:$16 sps:$4 sm:$0xff]   ;;  %v8945_v4 = vld [vmem:[#allocation8 + $0x112c] ss:$16 sps:$4 sm:$0xff]   ;;  %v8946_v45 = vld [vmem:[#allocation8 + $0x1140] ss:$16 sps:$4 sm:$0xff]  }
 0x483   :  { %3992 = vmatprep.subr.bf16.mxu0 %v8804_v20  ;;  %4074 = vmatprep.subr.bf16.mxu1 %v8807_v21  ;;  %v3145_v20 = vadd.f32 %v3141_v18, %v9853_v41  ;;  %v8882_v21 = vld [vmem:[#allocation8 + $0xfe4] ss:$16 sps:$4 sm:$0xff]   ;;  %v8955_v18 = vld [vmem:[#allocation8 + $0x1168] ss:$16 sps:$4 sm:$0xff]  }
 0x486   :  { %3993 = vmatpush1.bf16.msra.mxu0 %v8802_v22  ;;  %4075 = vmatpush1.bf16.msra.mxu1 %v8805_v23  ;;  %v8885_v22 = vld [vmem:[#allocation8 + $0xfec] ss:$16 sps:$4 sm:$0xff]   ;;  %v8880_v23 = vld [vmem:[#allocation8 + $0xfe0] ss:$16 sps:$4 sm:$0xff]  }
 0x487   :  { %3994 = vmatprep.subr.bf16.mxu0 %v8810_v24  ;;  %4076 = vmatprep.subr.bf16.mxu1 %v8813_v25  ;;  %v8883_v24 = vld [vmem:[#allocation8 + $0xfe8] ss:$16 sps:$4 sm:$0xff]   ;;  %v9924_v25 = vmul.f32 0.70710677, %v3145_v20  ;;  %v8958_v20 = vld [vmem:[#allocation8 + $0x1180] ss:$16 sps:$4 sm:$0xff]  }
 0x489   :  { %v3153_v41 = vpack.c.bf16 %v9924_v25, %v9924_v25 }
 0x48a   :  { %3995 = vmatpush1.bf16.msra.mxu0 %v8808_v26  ;;  %4077 = vmatpush1.bf16.msra.mxu1 %v8811_v27  ;;  %v8888_v26 = vld [vmem:[#allocation8 + $0x1004] ss:$16 sps:$4 sm:$0xff]   ;;  %v8891_v27 = vld [vmem:[#allocation8 + $0x100c] ss:$16 sps:$4 sm:$0xff]  }
 0x48b   :  { %3996 = vmatprep.subr.bf16.mxu0 %v8816_v28  ;;  %4078 = vmatprep.subr.bf16.mxu1 %v8819_v54  ;;  %v8886_v28 = vld [vmem:[#allocation8 + $0x1000] ss:$16 sps:$4 sm:$0xff]   ;;  %v8889_v54 = vld [vmem:[#allocation8 + $0x1008] ss:$16 sps:$4 sm:$0xff]  }
 0x48e   :  { %3997 = vmatpush1.bf16.msra.mxu0 %v8814_v29  ;;  %4079 = vmatpush1.bf16.msra.mxu1 %v8817_v30  ;;  %v8894_v29 = vld [vmem:[#allocation8 + $0x1024] ss:$16 sps:$4 sm:$0xff]   ;;  %v8897_v30 = vld [vmem:[#allocation8 + $0x102c] ss:$16 sps:$4 sm:$0xff]  }
 0x48f   :  { %3998 = vmatprep.subr.bf16.mxu0 %v8822_v31  ;;  %4080 = vmatprep.subr.bf16.mxu1 %v8825_v32  ;;  %v8892_v31 = vld [vmem:[#allocation8 + $0x1020] ss:$16 sps:$4 sm:$0xff]   ;;  %v8895_v32 = vld [vmem:[#allocation8 + $0x1028] ss:$16 sps:$4 sm:$0xff]  }
 0x492   :  { %3999 = vmatpush1.bf16.msra.mxu0 %v8820_v59  ;;  %4081 = vmatpush1.bf16.msra.mxu1 %v8823_v33  ;;  %v8900_v59 = vld [vmem:[#allocation8 + $0x1044] ss:$16 sps:$4 sm:$0xff]   ;;  %v8903_v33 = vld [vmem:[#allocation8 + $0x104c] ss:$16 sps:$4 sm:$0xff]  }
 0x493   :  { %4000 = vmatprep.subr.bf16.mxu0 %v8828_v34  ;;  %4082 = vmatprep.subr.bf16.mxu1 %v8831_v35  ;;  %v8898_v34 = vld [vmem:[#allocation8 + $0x1040] ss:$16 sps:$4 sm:$0xff]   ;;  %v8901_v35 = vld [vmem:[#allocation8 + $0x1048] ss:$16 sps:$4 sm:$0xff]  }
 0x496   :  { %4001 = vmatpush1.bf16.msra.mxu0 %v8826_v36  ;;  %4083 = vmatpush1.bf16.msra.mxu1 %v8829_v37  ;;  %v8906_v36 = vld [vmem:[#allocation8 + $0x1064] ss:$16 sps:$4 sm:$0xff]   ;;  %v8909_v37 = vld [vmem:[#allocation8 + $0x106c] ss:$16 sps:$4 sm:$0xff]  }
 0x497   :  { %4002 = vmatprep.subr.bf16.mxu0 %v8834_v1  ;;  %4084 = vmatprep.subr.bf16.mxu1 %v8837_v38  ;;  %v8904_v1 = vld [vmem:[#allocation8 + $0x1060] ss:$16 sps:$4 sm:$0xff]   ;;  %v8907_v38 = vld [vmem:[#allocation8 + $0x1068] ss:$16 sps:$4 sm:$0xff]  }
 0x49a   :  { %4003 = vmatpush1.bf16.msra.mxu0 %v8832_v39  ;;  %4085 = vmatpush1.bf16.msra.mxu1 %v8835_v43  ;;  %v8912_v39 = vld [vmem:[#allocation8 + $0x1084] ss:$16 sps:$4 sm:$0xff]   ;;  %v8915_v43 = vld [vmem:[#allocation8 + $0x108c] ss:$16 sps:$4 sm:$0xff]  }
 0x49b   :  { %4004 = vmatprep.subr.bf16.mxu0 %v8840_v6  ;;  %4086 = vmatprep.subr.bf16.mxu1 %v8843_v44  ;;  %v8910_v6 = vld [vmem:[#allocation8 + $0x1080] ss:$16 sps:$4 sm:$0xff]   ;;  %v8913_v44 = vld [vmem:[#allocation8 + $0x1088] ss:$16 sps:$4 sm:$0xff]  }
 0x49e   :  { %4005 = vmatpush1.bf16.msra.mxu0 %v8838_v47  ;;  %4087 = vmatpush1.bf16.msra.mxu1 %v8841_v49  ;;  %v8918_v47 = vld [vmem:[#allocation8 + $0x10a4] ss:$16 sps:$4 sm:$0xff]   ;;  %v8921_v49 = vld [vmem:[#allocation8 + $0x10ac] ss:$16 sps:$4 sm:$0xff]  }
 0x49f   :  { %4006 = vmatprep.subr.bf16.mxu0 %v8846_v50  ;;  %4088 = vmatprep.subr.bf16.mxu1 %v8849_v51  ;;  %v8916_v50 = vld [vmem:[#allocation8 + $0x10a0] ss:$16 sps:$4 sm:$0xff]   ;;  %v8919_v51 = vld [vmem:[#allocation8 + $0x10a8] ss:$16 sps:$4 sm:$0xff]  }
 0x4a2   :  { %4007 = vmatpush1.bf16.msra.mxu0 %v8844_v52  ;;  %4089 = vmatpush1.bf16.msra.mxu1 %v8847_v53  ;;  %v8924_v52 = vld [vmem:[#allocation8 + $0x10c4] ss:$16 sps:$4 sm:$0xff]   ;;  %v8927_v53 = vld [vmem:[#allocation8 + $0x10cc] ss:$16 sps:$4 sm:$0xff]  }
 0x4a3   :  { %4008 = vmatprep.subr.bf16.mxu0 %v8852_v55  ;;  %4090 = vmatprep.subr.bf16.mxu1 %v8855_v56  ;;  %v8922_v55 = vld [vmem:[#allocation8 + $0x10c0] ss:$16 sps:$4 sm:$0xff]   ;;  %v8925_v56 = vld [vmem:[#allocation8 + $0x10c8] ss:$16 sps:$4 sm:$0xff]  }
 0x4a6   :  { %4009 = vmatpush1.bf16.msra.mxu0 %v8850_v57  ;;  %4091 = vmatpush1.bf16.msra.mxu1 %v8853_v58  ;;  %v8930_v57 = vld [vmem:[#allocation8 + $0x10e4] ss:$16 sps:$4 sm:$0xff]   ;;  %v8933_v58 = vld [vmem:[#allocation8 + $0x10ec] ss:$16 sps:$4 sm:$0xff]  }
 0x4a7   :  { %4010 = vmatprep.subr.bf16.mxu0 %v8858_v60  ;;  %4092 = vmatprep.subr.bf16.mxu1 %v8861_v61  ;;  %v8928_v60 = vld [vmem:[#allocation8 + $0x10e0] ss:$16 sps:$4 sm:$0xff]   ;;  %v8931_v61 = vld [vmem:[#allocation8 + $0x10e8] ss:$16 sps:$4 sm:$0xff]  }
 0x4aa   :  { %4011 = vmatpush1.bf16.msra.mxu0 %v8856_v63  ;;  %4093 = vmatpush1.bf16.msra.mxu1 %v8859_v0  ;;  %v8939_v63 = vld [vmem:[#allocation8 + $0x110c] ss:$16 sps:$4 sm:$0xff]   ;;  %v8934_v0 = vld [vmem:[#allocation8 + $0x1100] ss:$16 sps:$4 sm:$0xff]  }
 0x4ab   :  { %4012 = vmatprep.subr.bf16.mxu0 %v8864_v2  ;;  %4094 = vmatprep.subr.bf16.mxu1 %v8867_v3  ;;  %v8937_v2 = vld [vmem:[#allocation8 + $0x1108] ss:$16 sps:$4 sm:$0xff]   ;;  %v8942_v3 = vld [vmem:[#allocation8 + $0x1124] ss:$16 sps:$4 sm:$0xff]  }
 0x4ae   :  { %4013 = vmatpush1.bf16.msra.mxu0 %v8862_v5  ;;  %4095 = vmatpush1.bf16.msra.mxu1 %v8865_v14  ;;  %v8940_v5 = vld [vmem:[#allocation8 + $0x1120] ss:$16 sps:$4 sm:$0xff]   ;;  %v8943_v14 = vld [vmem:[#allocation8 + $0x1128] ss:$16 sps:$4 sm:$0xff]  }
 0x4af   :  { %4014 = vmatprep.subr.bf16.mxu0 %v8870_v15  ;;  %4096 = vmatprep.subr.bf16.mxu1 %v8873_v16  ;;  %v8948_v15 = vld [vmem:[#allocation8 + $0x1144] ss:$16 sps:$4 sm:$0xff]   ;;  %v8951_v16 = vld [vmem:[#allocation8 + $0x114c] ss:$16 sps:$4 sm:$0xff]  }
 0x4b2   :  { %4015 = vmatpush1.bf16.msra.mxu0 %v8868_v40  ;;  %4097 = vmatpush1.bf16.msra.mxu1 %v8871_v17  ;;  %v8949_v40 = vld [vmem:[#allocation8 + $0x1148] ss:$16 sps:$4 sm:$0xff]   ;;  %v8954_v17 = vld [vmem:[#allocation8 + $0x1164] ss:$16 sps:$4 sm:$0xff]  }
 0x4b3   :  { %4016 = vmatprep.subr.bf16.mxu0 %v8876_v42  ;;  %4098 = vmatprep.subr.bf16.mxu1 %v8879_v46  ;;  %v8957_v42 = vld [vmem:[#allocation8 + $0x116c] ss:$16 sps:$4 sm:$0xff]   ;;  %v8952_v46 = vld [vmem:[#allocation8 + $0x1160] ss:$16 sps:$4 sm:$0xff]  }
 0x4b6   :  { %4017 = vmatpush1.bf16.msra.mxu0 %v8874_v48  ;;  %4099 = vmatpush1.bf16.msra.mxu1 %v8877_v19  ;;  %v8960_v48 = vld [vmem:[#allocation8 + $0x1184] ss:$16 sps:$4 sm:$0xff]   ;;  %v8963_v19 = vld [vmem:[#allocation8 + $0x118c] ss:$16 sps:$4 sm:$0xff]  }
 0x4b7   :  { %4018 = vmatprep.subr.bf16.mxu0 %v8882_v21  ;;  %4100 = vmatprep.subr.bf16.mxu1 %v8885_v22  ;;  %v8961_v21 = vld [vmem:[#allocation8 + $0x1188] ss:$16 sps:$4 sm:$0xff]   ;;  %v8966_v22 = vld [vmem:[#allocation8 + $0x11a4] ss:$16 sps:$4 sm:$0xff]  }
 0x4ba   :  { %4019 = vmatpush1.bf16.msra.mxu0 %v8880_v23  ;;  %4101 = vmatpush1.bf16.msra.mxu1 %v8883_v24  ;;  %v8969_v23 = vld [vmem:[#allocation8 + $0x11ac] ss:$16 sps:$4 sm:$0xff]   ;;  %v8964_v24 = vld [vmem:[#allocation8 + $0x11a0] ss:$16 sps:$4 sm:$0xff]  }
 0x4bb   :  { %4919 = vmatprep.subr.bf16.mxu0 %v8888_v26  ;;  %5001 = vmatprep.subr.bf16.mxu1 %v8891_v27  ;;  %v8967_v26 = vld [vmem:[#allocation8 + $0x11a8] ss:$16 sps:$4 sm:$0xff]   ;;  %v8972_v27 = vld [vmem:[#allocation8 + $0x11c4] ss:$16 sps:$4 sm:$0xff]  }
 0x4bd   :  { %4021 = vmatmul.mubr.bf16.vlgmr.msra.gmra.mrb[12].mxu0 %v3153_v41  ;;  %4103 = vmatmul.mubr.bf16.vlgmr.msra.gmra.mrb[12].mxu1 %v3153_v41  ;;  %v8973_v41 = vld [vmem:[#allocation8 + $0x11c8] ss:$16 sps:$4 sm:$0xff]  }
 0x4be   :  { %4920 = vmatpush1.bf16.msra.mxu0 %v8886_v28  ;;  %5002 = vmatpush1.bf16.msra.mxu1 %v8889_v54  ;;  %v8975_v28 = vld [vmem:[#allocation8 + $0x11cc] ss:$16 sps:$4 sm:$0xff]   ;;  %v8970_v54 = vld [vmem:[#allocation8 + $0x11c0] ss:$16 sps:$4 sm:$0xff]  }
 0x4bf   :  { %4921 = vmatprep.subr.bf16.mxu0 %v8894_v29  ;;  %5003 = vmatprep.subr.bf16.mxu1 %v8897_v30  ;;  %v8978_v29 = vld [vmem:[#allocation8 + $0x11e4] ss:$16 sps:$4 sm:$0xff]   ;;  %v8981_v30 = vld [vmem:[#allocation8 + $0x11ec] ss:$16 sps:$4 sm:$0xff]  }
 0x4c2   :  { %4922 = vmatpush1.bf16.msra.mxu0 %v8892_v31  ;;  %5004 = vmatpush1.bf16.msra.mxu1 %v8895_v32  ;;  %v8976_v31 = vld [vmem:[#allocation8 + $0x11e0] ss:$16 sps:$4 sm:$0xff]   ;;  %v8979_v32 = vld [vmem:[#allocation8 + $0x11e8] ss:$16 sps:$4 sm:$0xff]  }
 0x4c3   :  { %4923 = vmatprep.subr.bf16.mxu0 %v8900_v59  ;;  %5005 = vmatprep.subr.bf16.mxu1 %v8903_v33  ;;  %v8984_v59 = vld [vmem:[#allocation8 + $0x1204] ss:$16 sps:$4 sm:$0xff]   ;;  %v8987_v33 = vld [vmem:[#allocation8 + $0x120c] ss:$16 sps:$4 sm:$0xff]  }
 0x4c6   :  { %4924 = vmatpush1.bf16.msra.mxu0 %v8898_v34  ;;  %5006 = vmatpush1.bf16.msra.mxu1 %v8901_v35  ;;  %v9928_v34 = vld [vmem:[#allocation10 + $0xc] sm:$0xf] }
 0x4c7   :  { %4925 = vmatprep.subr.bf16.mxu0 %v8906_v36  ;;  %5007 = vmatprep.subr.bf16.mxu1 %v8909_v37  ;;  %v3290_v35 = vrot.slane %v9928_v34, %v9835_v10  ;;  %v3294_v36 = vrot.slane %v9928_v34, %v9837_v11  ;;  %v3302_v37 = vrot.slane %v9928_v34, %v9840_v13 }
 0x4ca   :  { %4926 = vmatpush1.bf16.msra.mxu0 %v8904_v1  ;;  %5008 = vmatpush1.bf16.msra.mxu1 %v8907_v38 }
 0x4cb   :  { %4927 = vmatprep.subr.bf16.mxu0 %v8912_v39  ;;  %5009 = vmatprep.subr.bf16.mxu1 %v8915_v43 }
 0x4ce   :  { %4928 = vmatpush1.bf16.msra.mxu0 %v8910_v6  ;;  %5010 = vmatpush1.bf16.msra.mxu1 %v8913_v44 }
 0x4cf   :  { %4929 = vmatprep.subr.bf16.mxu0 %v8918_v47  ;;  %5011 = vmatprep.subr.bf16.mxu1 %v8921_v49 }
 0x4d2   :  { %4930 = vmatpush1.bf16.msra.mxu0 %v8916_v50  ;;  %5012 = vmatpush1.bf16.msra.mxu1 %v8919_v51 }
 0x4d3   :  { %4931 = vmatprep.subr.bf16.mxu0 %v8924_v52  ;;  %5013 = vmatprep.subr.bf16.mxu1 %v8927_v53 }
 0x4d6   :  { %4932 = vmatpush1.bf16.msra.mxu0 %v8922_v55  ;;  %5014 = vmatpush1.bf16.msra.mxu1 %v8925_v56 }
 0x4d7   :  { %4933 = vmatprep.subr.bf16.mxu0 %v8930_v57  ;;  %5015 = vmatprep.subr.bf16.mxu1 %v8933_v58 }
 0x4da   :  { %4934 = vmatpush1.bf16.msra.mxu0 %v8928_v60  ;;  %5016 = vmatpush1.bf16.msra.mxu1 %v8931_v61  ;;  %v8982_v61 = vld [vmem:[#allocation8 + $0x1200] ss:$16 sps:$4 sm:$0xff]  }
 0x4db   :  { %4935 = vmatprep.subr.bf16.mxu0 %v8936_v62  ;;  %5017 = vmatprep.subr.bf16.mxu1 %v8939_v63  ;;  %v8985_v62 = vld [vmem:[#allocation8 + $0x1208] ss:$16 sps:$4 sm:$0xff]  }
 0x4de   :  { %4936 = vmatpush1.bf16.msra.mxu0 %v8934_v0  ;;  %5018 = vmatpush1.bf16.msra.mxu1 %v8937_v2  ;;  %v8990_v2 = vld [vmem:[#allocation8 + $0x1224] ss:$16 sps:$4 sm:$0xff]  }
 0x4df   :  { %4937 = vmatprep.subr.bf16.mxu0 %v8942_v3  ;;  %5019 = vmatprep.subr.bf16.mxu1 %v8945_v4  ;;  %v8993_v3 = vld [vmem:[#allocation8 + $0x122c] ss:$16 sps:$4 sm:$0xff]  }
 0x4e2   :  { %4938 = vmatpush1.bf16.msra.mxu0 %v8940_v5  ;;  %5020 = vmatpush1.bf16.msra.mxu1 %v8943_v14  ;;  %v8988_v5 = vld [vmem:[#allocation8 + $0x1220] ss:$16 sps:$4 sm:$0xff]   ;;  %v8991_v14 = vld [vmem:[#allocation8 + $0x1228] ss:$16 sps:$4 sm:$0xff]  }
 0x4e3   :  { %4939 = vmatprep.subr.bf16.mxu0 %v8948_v15  ;;  %5021 = vmatprep.subr.bf16.mxu1 %v8951_v16  ;;  %v8996_v15 = vld [vmem:[#allocation8 + $0x1244] ss:$16 sps:$4 sm:$0xff]   ;;  %v8999_v16 = vld [vmem:[#allocation8 + $0x124c] ss:$16 sps:$4 sm:$0xff]  }
 0x4e6   :  { %4940 = vmatpush1.bf16.msra.mxu0 %v8946_v45  ;;  %5022 = vmatpush1.bf16.msra.mxu1 %v8949_v40  ;;  %v8994_v45 = vld [vmem:[#allocation8 + $0x1240] ss:$16 sps:$4 sm:$0xff]   ;;  %v8997_v40 = vld [vmem:[#allocation8 + $0x1248] ss:$16 sps:$4 sm:$0xff]  }
 0x4e7   :  { %4941 = vmatprep.subr.bf16.mxu0 %v8954_v17  ;;  %5023 = vmatprep.subr.bf16.mxu1 %v8957_v42  ;;  %v9002_v17 = vld [vmem:[#allocation8 + $0x1264] ss:$16 sps:$4 sm:$0xff]   ;;  %v9005_v42 = vld [vmem:[#allocation8 + $0x126c] ss:$16 sps:$4 sm:$0xff]  }
 0x4ea   :  { %4942 = vmatpush1.bf16.msra.mxu0 %v8952_v46  ;;  %5024 = vmatpush1.bf16.msra.mxu1 %v8955_v18  ;;  %v9000_v46 = vld [vmem:[#allocation8 + $0x1260] ss:$16 sps:$4 sm:$0xff]   ;;  %v9003_v18 = vld [vmem:[#allocation8 + $0x1268] ss:$16 sps:$4 sm:$0xff]  }
 0x4eb   :  { %4943 = vmatprep.subr.bf16.mxu0 %v8960_v48  ;;  %5025 = vmatprep.subr.bf16.mxu1 %v8963_v19  ;;  %v9008_v48 = vld [vmem:[#allocation8 + $0x1284] ss:$16 sps:$4 sm:$0xff]   ;;  %v9011_v19 = vld [vmem:[#allocation8 + $0x128c] ss:$16 sps:$4 sm:$0xff]  }
 0x4ee   :  { %4944 = vmatpush1.bf16.msra.mxu0 %v8958_v20  ;;  %5026 = vmatpush1.bf16.msra.mxu1 %v8961_v21  ;;  %v9006_v20 = vld [vmem:[#allocation8 + $0x1280] ss:$16 sps:$4 sm:$0xff]   ;;  %v9009_v21 = vld [vmem:[#allocation8 + $0x1288] ss:$16 sps:$4 sm:$0xff]  }
 0x4ef   :  { %4945 = vmatprep.subr.bf16.mxu0 %v8966_v22  ;;  %5027 = vmatprep.subr.bf16.mxu1 %v8969_v23  ;;  %v9014_v22 = vld [vmem:[#allocation8 + $0x12a4] ss:$16 sps:$4 sm:$0xff]   ;;  %v9017_v23 = vld [vmem:[#allocation8 + $0x12ac] ss:$16 sps:$4 sm:$0xff]  }
 0x4f2   :  { %4946 = vmatpush1.bf16.msra.mxu0 %v8964_v24  ;;  %5028 = vmatpush1.bf16.msra.mxu1 %v8967_v26  ;;  %v9012_v24 = vld [vmem:[#allocation8 + $0x12a0] ss:$16 sps:$4 sm:$0xff]   ;;  %v9015_v26 = vld [vmem:[#allocation8 + $0x12a8] ss:$16 sps:$4 sm:$0xff]  }
 0x4f3   :  { %4947 = vmatprep.subr.bf16.mxu0 %v8972_v27  ;;  %5029 = vmatprep.subr.bf16.mxu1 %v8975_v28  ;;  %v9020_v27 = vld [vmem:[#allocation8 + $0x12c4] ss:$16 sps:$4 sm:$0xff]   ;;  %v9023_v28 = vld [vmem:[#allocation8 + $0x12cc] ss:$16 sps:$4 sm:$0xff]  }
 0x4f6   :  { %4948 = vmatpush1.bf16.msra.mxu0 %v8970_v54  ;;  %5030 = vmatpush1.bf16.msra.mxu1 %v8973_v41  ;;  %v9018_v54 = vld [vmem:[#allocation8 + $0x12c0] ss:$16 sps:$4 sm:$0xff]   ;;  %v9021_v41 = vld [vmem:[#allocation8 + $0x12c8] ss:$16 sps:$4 sm:$0xff]  }
 0x4f7   :  { %4949 = vmatprep.subr.bf16.mxu0 %v8978_v29  ;;  %5031 = vmatprep.subr.bf16.mxu1 %v8981_v30  ;;  %v9026_v29 = vld [vmem:[#allocation8 + $0x12e4] ss:$16 sps:$4 sm:$0xff]   ;;  %v9029_v30 = vld [vmem:[#allocation8 + $0x12ec] ss:$16 sps:$4 sm:$0xff]  }
 0x4fa   :  { %4950 = vmatpush1.bf16.msra.mxu0 %v8976_v31  ;;  %5032 = vmatpush1.bf16.msra.mxu1 %v8979_v32  ;;  %v9024_v31 = vld [vmem:[#allocation8 + $0x12e0] ss:$16 sps:$4 sm:$0xff]   ;;  %v9027_v32 = vld [vmem:[#allocation8 + $0x12e8] ss:$16 sps:$4 sm:$0xff]  }
 0x4fb   :  { %4960 = vmatprep.subr.bf16.mxu0 %v8984_v59  ;;  %5042 = vmatprep.subr.bf16.mxu1 %v8987_v33  ;;  %v9032_v59 = vld [vmem:[#allocation8 + $0x1304] ss:$16 sps:$4 sm:$0xff]   ;;  %v9035_v33 = vld [vmem:[#allocation8 + $0x130c] ss:$16 sps:$4 sm:$0xff]  }
 0x590   :  { %v4022_v1 = vpop.f32.mrb[12].mxu0  ;;  %v9936_v38 = vpop.f32.mrb[12].mxu1 }
 0x591   :  { %v8030_v39 = vadd.f32 %v4022_v1, %v3290_v35  ;;  %v4024_v43 = vpop.f32.mrb[13].mxu0  ;;  %v4106_v6 = vpop.f32.mrb[13].mxu1  ;;  %v9030_v35 = vld [vmem:[#allocation8 + $0x1300] ss:$16 sps:$4 sm:$0xff]   ;;  %v9041_v1 = vld [vmem:[#allocation8 + $0x132c] ss:$16 sps:$4 sm:$0xff]  }
 0x592   :  { %v8031_v44 = vadd.f32 %v4024_v43, %v3294_v36  ;;  %v8033_v47 = vadd.f32 %v4106_v6, %v3302_v37  ;;  %v4026_v49 = vpop.f32.mrb[14].mxu0  ;;  %v4108_v50 = vpop.f32.mrb[14].mxu1  ;;  %v9033_v36 = vld [vmem:[#allocation8 + $0x1308] ss:$16 sps:$4 sm:$0xff]   ;;  %v9038_v37 = vld [vmem:[#allocation8 + $0x1324] ss:$16 sps:$4 sm:$0xff]  }
 0x593   :  { %vm4111_vm12 = vcmp.ge.f32.partialorder %v8030_v39, 0.0  ;;  %v4115_v51 = vmul.f32 0.2, %v8030_v39  ;;  %v4027_v56 = vpop.f32.mrb[15].mxu0  ;;  %v4109_v57 = vpop.f32.mrb[15].mxu1 }
 0x594   :  { %vm4112_vm13 = vcmp.ge.f32.partialorder %v8031_v44, 0.0  ;;  %v4116_v52 = vmul.f32 0.2, %v8031_v44  ;;  %vm4114_vm14 = vcmp.ge.f32.partialorder %v8033_v47, 0.0  ;;  %v4118_v53 = vmul.f32 0.2, %v8033_v47 }
 0x595   :  { %v4119_v55 = vsel %vm4111_vm12, %v8030_v39, %v4115_v51  ;;  %v9036_v39 = vld [vmem:[#allocation8 + $0x1320] ss:$16 sps:$4 sm:$0xff]   ;;  %v9039_v43 = vld [vmem:[#allocation8 + $0x1328] ss:$16 sps:$4 sm:$0xff]   ;;  %v9044_v6 = vld [vmem:[#allocation8 + $0x1344] ss:$16 sps:$4 sm:$0xff]  }
 0x596   :  { %v4120_v58 = vsel %vm4112_vm13, %v8031_v44, %v4116_v52  ;;  %v4122_v63 = vsel %vm4114_vm14, %v8033_v47, %v4118_v53  ;;  %v4123_v0 = vpack.c.bf16 %v4119_v55, %v4119_v55  ;;  %v9047_v44 = vld [vmem:[#allocation8 + $0x134c] ss:$16 sps:$4 sm:$0xff]   ;;  %v9042_v47 = vld [vmem:[#allocation8 + $0x1340] ss:$16 sps:$4 sm:$0xff]   ;;  %v9045_v49 = vld [vmem:[#allocation8 + $0x1348] ss:$16 sps:$4 sm:$0xff]  }
 0x597   :  { %v4124_v60 = vpack.c.bf16 %v4120_v58, %v4120_v58  ;;  %v4126_v4 = vpack.c.bf16 %v4122_v63, %v4122_v63  ;;  %v9050_v50 = vld [vmem:[#allocation8 + $0x1364] ss:$16 sps:$4 sm:$0xff]   ;;  %v9053_v51 = vld [vmem:[#allocation8 + $0x136c] ss:$16 sps:$4 sm:$0xff]   ;;  %v9048_v52 = vld [vmem:[#allocation8 + $0x1360] ss:$16 sps:$4 sm:$0xff]  }
 0x598   :  { %v9051_v53 = vld [vmem:[#allocation8 + $0x1368] ss:$16 sps:$4 sm:$0xff]   ;;  %v9056_v55 = vld [vmem:[#allocation8 + $0x1384] ss:$16 sps:$4 sm:$0xff]   ;;  %v9059_v56 = vld [vmem:[#allocation8 + $0x138c] ss:$16 sps:$4 sm:$0xff]  }
 0x599   :  { %4951 = vmatprep.mubr.bf16.mxu0 %v4124_v60  ;;  %5033 = vmatprep.mubr.bf16.mxu1 %v4124_v60  ;;  %v9054_v57 = vld [vmem:[#allocation8 + $0x1380] ss:$16 sps:$4 sm:$0xff]   ;;  %v9057_v58 = vld [vmem:[#allocation8 + $0x1388] ss:$16 sps:$4 sm:$0xff]   ;;  %v9062_v60 = vld [vmem:[#allocation8 + $0x13a4] ss:$16 sps:$4 sm:$0xff]  }
 0x59a   :  { %4952 = vmatmul.mubr.bf16.vlgmr.msra.gmra.mrb[16].mxu0 %v4123_v0  ;;  %5034 = vmatmul.mubr.bf16.vlgmr.msra.gmra.mrb[16].mxu1 %v4123_v0  ;;  %v9060_v63 = vld [vmem:[#allocation8 + $0x13a0] ss:$16 sps:$4 sm:$0xff]   ;;  %v9063_v0 = vld [vmem:[#allocation8 + $0x13a8] ss:$16 sps:$4 sm:$0xff]   ;;  %vm7110_vm12 = vcmask 7168  }
 0x59b   :  { %4961 = vmatpush1.bf16.msra.mxu0 %v8982_v61  ;;  %5043 = vmatpush1.bf16.msra.mxu1 %v8985_v62  ;;  %v9065_v61 = vld [vmem:[#allocation8 + $0x13ac] ss:$16 sps:$4 sm:$0xff]   ;;  %v3298_v62 = vrot.slane %v9928_v34, %v9833_v9  ;;  %v9072_v34 = vld [vmem:[#allocation8 + $0x13e0] ss:$16 sps:$4 sm:$0xff]  }
 0x59c   :  { %4992 = vmatprep.mubr.bf16.mxu0 %v4126_v4  ;;  %5074 = vmatprep.mubr.bf16.mxu1 %v4126_v4 }
 0x59d   :  { %4962 = vmatprep.subr.bf16.mxu0 %v8990_v2  ;;  %5044 = vmatprep.subr.bf16.mxu1 %v8993_v3  ;;  %v9068_v2 = vld [vmem:[#allocation8 + $0x13c4] ss:$16 sps:$4 sm:$0xff]   ;;  %v9071_v3 = vld [vmem:[#allocation8 + $0x13cc] ss:$16 sps:$4 sm:$0xff]   ;;  %v8032_v4 = vadd.f32 %v9936_v38, %v3298_v62  ;;  %v9078_v38 = vld [vmem:[#allocation8 + $0x1400] ss:$16 sps:$4 sm:$0xff]  }
 0x59e   :  { %v9143_v62 = vld [vmem:[#allocation8 + $0x154c] ss:$16 sps:$4 sm:$0xff]  }
 0x59f   :  { %4963 = vmatpush1.bf16.msra.mxu0 %v8988_v5  ;;  %5045 = vmatpush1.bf16.msra.mxu1 %v8991_v14  ;;  %v9066_v5 = vld [vmem:[#allocation8 + $0x13c0] ss:$16 sps:$4 sm:$0xff]   ;;  %v9069_v14 = vld [vmem:[#allocation8 + $0x13c8] ss:$16 sps:$4 sm:$0xff]   ;;  %vm4113_vm15 = vcmp.ge.f32.partialorder %v8032_v4, 0.0 }
 0x5a0   :  { %4964 = vmatprep.subr.bf16.mxu0 %v8996_v15  ;;  %5046 = vmatprep.subr.bf16.mxu1 %v8999_v16  ;;  %v9074_v15 = vld [vmem:[#allocation8 + $0x13e4] ss:$16 sps:$4 sm:$0xff]   ;;  %v9077_v16 = vld [vmem:[#allocation8 + $0x13ec] ss:$16 sps:$4 sm:$0xff]  }
 0x5a3   :  { %4965 = vmatpush1.bf16.msra.mxu0 %v8994_v45  ;;  %5047 = vmatpush1.bf16.msra.mxu1 %v8997_v40  ;;  %v4117_v45 = vmul.f32 0.2, %v8032_v4  ;;  %v9075_v40 = vld [vmem:[#allocation8 + $0x13e8] ss:$16 sps:$4 sm:$0xff]  }
 0x5a4   :  { %4966 = vmatprep.subr.bf16.mxu0 %v9002_v17  ;;  %5048 = vmatprep.subr.bf16.mxu1 %v9005_v42  ;;  %v9080_v17 = vld [vmem:[#allocation8 + $0x1404] ss:$16 sps:$4 sm:$0xff]   ;;  %v9083_v42 = vld [vmem:[#allocation8 + $0x140c] ss:$16 sps:$4 sm:$0xff]  }
 0x5a7   :  { %4967 = vmatpush1.bf16.msra.mxu0 %v9000_v46  ;;  %5049 = vmatpush1.bf16.msra.mxu1 %v9003_v18  ;;  %v4121_v46 = vsel %vm4113_vm15, %v8032_v4, %v4117_v45  ;;  %v9081_v18 = vld [vmem:[#allocation8 + $0x1408] ss:$16 sps:$4 sm:$0xff]   ;;  %v9144_v4 = vld [vmem:[#allocation8 + $0x1560] ss:$16 sps:$4 sm:$0xff]  }
 0x5a8   :  { %4968 = vmatprep.subr.bf16.mxu0 %v9008_v48  ;;  %5050 = vmatprep.subr.bf16.mxu1 %v9011_v19  ;;  %v4125_v48 = vpack.c.bf16 %v4121_v46, %v4121_v46  ;;  %v9086_v19 = vld [vmem:[#allocation8 + $0x1424] ss:$16 sps:$4 sm:$0xff]   ;;  %v9153_v45 = vld [vmem:[#allocation8 + $0x1588] ss:$16 sps:$4 sm:$0xff]  }
 0x5a9   :  { %v9164_v46 = vld [vmem:[#allocation8 + $0x15c4] ss:$16 sps:$4 sm:$0xff]  }
 0x5ab   :  { %4969 = vmatpush1.bf16.msra.mxu0 %v9006_v20  ;;  %5051 = vmatpush1.bf16.msra.mxu1 %v9009_v21  ;;  %v9089_v20 = vld [vmem:[#allocation8 + $0x142c] ss:$16 sps:$4 sm:$0xff]   ;;  %v9084_v21 = vld [vmem:[#allocation8 + $0x1420] ss:$16 sps:$4 sm:$0xff]  }
 0x5ac   :  { %4970 = vmatprep.subr.bf16.mxu0 %v9014_v22  ;;  %5052 = vmatprep.subr.bf16.mxu1 %v9017_v23  ;;  %v9087_v22 = vld [vmem:[#allocation8 + $0x1428] ss:$16 sps:$4 sm:$0xff]   ;;  %v9092_v23 = vld [vmem:[#allocation8 + $0x1444] ss:$16 sps:$4 sm:$0xff]  }
 0x5af   :  { %4971 = vmatpush1.bf16.msra.mxu0 %v9012_v24  ;;  %5053 = vmatpush1.bf16.msra.mxu1 %v9015_v26  ;;  %v9095_v24 = vld [vmem:[#allocation8 + $0x144c] ss:$16 sps:$4 sm:$0xff]   ;;  %v9090_v26 = vld [vmem:[#allocation8 + $0x1440] ss:$16 sps:$4 sm:$0xff]  }
 0x5b0   :  { %4972 = vmatprep.subr.bf16.mxu0 %v9020_v27  ;;  %5054 = vmatprep.subr.bf16.mxu1 %v9023_v28  ;;  %v9093_v27 = vld [vmem:[#allocation8 + $0x1448] ss:$16 sps:$4 sm:$0xff]   ;;  %v9098_v28 = vld [vmem:[#allocation8 + $0x1464] ss:$16 sps:$4 sm:$0xff]  }
 0x5b3   :  { %4973 = vmatpush1.bf16.msra.mxu0 %v9018_v54  ;;  %5055 = vmatpush1.bf16.msra.mxu1 %v9021_v41  ;;  %v9101_v54 = vld [vmem:[#allocation8 + $0x146c] ss:$16 sps:$4 sm:$0xff]   ;;  %v9096_v41 = vld [vmem:[#allocation8 + $0x1460] ss:$16 sps:$4 sm:$0xff]  }
 0x5b4   :  { %4974 = vmatprep.subr.bf16.mxu0 %v9026_v29  ;;  %5056 = vmatprep.subr.bf16.mxu1 %v9029_v30  ;;  %v9099_v29 = vld [vmem:[#allocation8 + $0x1468] ss:$16 sps:$4 sm:$0xff]   ;;  %v9104_v30 = vld [vmem:[#allocation8 + $0x1484] ss:$16 sps:$4 sm:$0xff]  }
 0x5b7   :  { %4975 = vmatpush1.bf16.msra.mxu0 %v9024_v31  ;;  %5057 = vmatpush1.bf16.msra.mxu1 %v9027_v32  ;;  %v9107_v31 = vld [vmem:[#allocation8 + $0x148c] ss:$16 sps:$4 sm:$0xff]   ;;  %v9102_v32 = vld [vmem:[#allocation8 + $0x1480] ss:$16 sps:$4 sm:$0xff]  }
 0x5b8   :  { %4976 = vmatprep.subr.bf16.mxu0 %v9032_v59  ;;  %5058 = vmatprep.subr.bf16.mxu1 %v9035_v33  ;;  %v9105_v59 = vld [vmem:[#allocation8 + $0x1488] ss:$16 sps:$4 sm:$0xff]   ;;  %v9110_v33 = vld [vmem:[#allocation8 + $0x14a4] ss:$16 sps:$4 sm:$0xff]  }
 0x5bb   :  { %4977 = vmatpush1.bf16.msra.mxu0 %v9030_v35  ;;  %5059 = vmatpush1.bf16.msra.mxu1 %v9033_v36  ;;  %v9113_v35 = vld [vmem:[#allocation8 + $0x14ac] ss:$16 sps:$4 sm:$0xff]   ;;  %v9108_v36 = vld [vmem:[#allocation8 + $0x14a0] ss:$16 sps:$4 sm:$0xff]  }
 0x5bc   :  { %4978 = vmatprep.subr.bf16.mxu0 %v9038_v37  ;;  %5060 = vmatprep.subr.bf16.mxu1 %v9041_v1  ;;  %v9111_v37 = vld [vmem:[#allocation8 + $0x14a8] ss:$16 sps:$4 sm:$0xff]   ;;  %v9116_v1 = vld [vmem:[#allocation8 + $0x14c4] ss:$16 sps:$4 sm:$0xff]  }
 0x5bf   :  { %4979 = vmatpush1.bf16.msra.mxu0 %v9036_v39  ;;  %5061 = vmatpush1.bf16.msra.mxu1 %v9039_v43  ;;  %v9119_v39 = vld [vmem:[#allocation8 + $0x14cc] ss:$16 sps:$4 sm:$0xff]   ;;  %v9114_v43 = vld [vmem:[#allocation8 + $0x14c0] ss:$16 sps:$4 sm:$0xff]  }
 0x5c0   :  { %4980 = vmatprep.subr.bf16.mxu0 %v9044_v6  ;;  %5062 = vmatprep.subr.bf16.mxu1 %v9047_v44  ;;  %v9117_v6 = vld [vmem:[#allocation8 + $0x14c8] ss:$16 sps:$4 sm:$0xff]   ;;  %v9122_v44 = vld [vmem:[#allocation8 + $0x14e4] ss:$16 sps:$4 sm:$0xff]  }
 0x5c3   :  { %4981 = vmatpush1.bf16.msra.mxu0 %v9042_v47  ;;  %5063 = vmatpush1.bf16.msra.mxu1 %v9045_v49  ;;  %v9125_v47 = vld [vmem:[#allocation8 + $0x14ec] ss:$16 sps:$4 sm:$0xff]   ;;  %v9120_v49 = vld [vmem:[#allocation8 + $0x14e0] ss:$16 sps:$4 sm:$0xff]  }
 0x5c4   :  { %4982 = vmatprep.subr.bf16.mxu0 %v9050_v50  ;;  %5064 = vmatprep.subr.bf16.mxu1 %v9053_v51  ;;  %v9123_v50 = vld [vmem:[#allocation8 + $0x14e8] ss:$16 sps:$4 sm:$0xff]   ;;  %v9128_v51 = vld [vmem:[#allocation8 + $0x1504] ss:$16 sps:$4 sm:$0xff]  }
 0x5c7   :  { %4983 = vmatpush1.bf16.msra.mxu0 %v9048_v52  ;;  %5065 = vmatpush1.bf16.msra.mxu1 %v9051_v53  ;;  %v9131_v52 = vld [vmem:[#allocation8 + $0x150c] ss:$16 sps:$4 sm:$0xff]   ;;  %v9126_v53 = vld [vmem:[#allocation8 + $0x1500] ss:$16 sps:$4 sm:$0xff]  }
 0x5c8   :  { %4984 = vmatprep.subr.bf16.mxu0 %v9056_v55  ;;  %5066 = vmatprep.subr.bf16.mxu1 %v9059_v56  ;;  %v9129_v55 = vld [vmem:[#allocation8 + $0x1508] ss:$16 sps:$4 sm:$0xff]   ;;  %v9134_v56 = vld [vmem:[#allocation8 + $0x1524] ss:$16 sps:$4 sm:$0xff]  }
 0x5cb   :  { %4985 = vmatpush1.bf16.msra.mxu0 %v9054_v57  ;;  %5067 = vmatpush1.bf16.msra.mxu1 %v9057_v58  ;;  %v9137_v57 = vld [vmem:[#allocation8 + $0x152c] ss:$16 sps:$4 sm:$0xff]   ;;  %v9132_v58 = vld [vmem:[#allocation8 + $0x1520] ss:$16 sps:$4 sm:$0xff]  }
 0x5cc   :  { %4986 = vmatprep.subr.bf16.mxu0 %v9062_v60  ;;  %5068 = vmatprep.subr.bf16.mxu1 %v9065_v61  ;;  %v9135_v60 = vld [vmem:[#allocation8 + $0x1528] ss:$16 sps:$4 sm:$0xff]   ;;  %v9140_v61 = vld [vmem:[#allocation8 + $0x1544] ss:$16 sps:$4 sm:$0xff]  }
 0x5cf   :  { %4987 = vmatpush1.bf16.msra.mxu0 %v9060_v63  ;;  %5069 = vmatpush1.bf16.msra.mxu1 %v9063_v0  ;;  %v9138_v63 = vld [vmem:[#allocation8 + $0x1540] ss:$16 sps:$4 sm:$0xff]   ;;  %v9141_v0 = vld [vmem:[#allocation8 + $0x1548] ss:$16 sps:$4 sm:$0xff]  }
 0x5d0   :  { %4988 = vmatprep.subr.bf16.mxu0 %v9068_v2  ;;  %5070 = vmatprep.subr.bf16.mxu1 %v9071_v3  ;;  %v9146_v2 = vld [vmem:[#allocation8 + $0x1564] ss:$16 sps:$4 sm:$0xff]   ;;  %v9149_v3 = vld [vmem:[#allocation8 + $0x156c] ss:$16 sps:$4 sm:$0xff]  }
 0x5d3   :  { %4989 = vmatpush1.bf16.msra.mxu0 %v9066_v5  ;;  %5071 = vmatpush1.bf16.msra.mxu1 %v9069_v14  ;;  %v9147_v5 = vld [vmem:[#allocation8 + $0x1568] ss:$16 sps:$4 sm:$0xff]   ;;  %v9152_v14 = vld [vmem:[#allocation8 + $0x1584] ss:$16 sps:$4 sm:$0xff]  }
 0x5d4   :  { %4990 = vmatprep.subr.bf16.mxu0 %v9074_v15  ;;  %5072 = vmatprep.subr.bf16.mxu1 %v9077_v16  ;;  %v9155_v15 = vld [vmem:[#allocation8 + $0x158c] ss:$16 sps:$4 sm:$0xff]   ;;  %v9150_v16 = vld [vmem:[#allocation8 + $0x1580] ss:$16 sps:$4 sm:$0xff]  }
 0x5d7   :  { %4991 = vmatpush1.bf16.msra.mxu0 %v9072_v34  ;;  %5073 = vmatpush1.bf16.msra.mxu1 %v9075_v40  ;;  %v9158_v34 = vld [vmem:[#allocation8 + $0x15a4] ss:$16 sps:$4 sm:$0xff]   ;;  %v9161_v40 = vld [vmem:[#allocation8 + $0x15ac] ss:$16 sps:$4 sm:$0xff]  }
 0x5d8   :  { %5891 = vmatprep.subr.bf16.mxu0 %v9080_v17  ;;  %5973 = vmatprep.subr.bf16.mxu1 %v9083_v42  ;;  %v9156_v17 = vld [vmem:[#allocation8 + $0x15a0] ss:$16 sps:$4 sm:$0xff]   ;;  %v9159_v42 = vld [vmem:[#allocation8 + $0x15a8] ss:$16 sps:$4 sm:$0xff]  }
 0x5da   :  { %4993 = vmatmul.mubr.bf16.vlgmr.msra.gmra.mrb[16].mxu0 %v4125_v48  ;;  %5075 = vmatmul.mubr.bf16.vlgmr.msra.gmra.mrb[16].mxu1 %v4125_v48  ;;  %v9165_v48 = vld [vmem:[#allocation8 + $0x15c8] ss:$16 sps:$4 sm:$0xff]  }
 0x5db   :  { %5892 = vmatpush1.bf16.msra.mxu0 %v9078_v38  ;;  %5974 = vmatpush1.bf16.msra.mxu1 %v9081_v18  ;;  %v9167_v38 = vld [vmem:[#allocation8 + $0x15cc] ss:$16 sps:$4 sm:$0xff]   ;;  %v9162_v18 = vld [vmem:[#allocation8 + $0x15c0] ss:$16 sps:$4 sm:$0xff]  }
 0x5dc   :  { %5893 = vmatprep.subr.bf16.mxu0 %v9086_v19  ;;  %5975 = vmatprep.subr.bf16.mxu1 %v9089_v20  ;;  %v9170_v19 = vld [vmem:[#allocation8 + $0x15e4] ss:$16 sps:$4 sm:$0xff]   ;;  %v9173_v20 = vld [vmem:[#allocation8 + $0x15ec] ss:$16 sps:$4 sm:$0xff]  }
 0x5df   :  { %5894 = vmatpush1.bf16.msra.mxu0 %v9084_v21  ;;  %5976 = vmatpush1.bf16.msra.mxu1 %v9087_v22  ;;  %v9168_v21 = vld [vmem:[#allocation8 + $0x15e0] ss:$16 sps:$4 sm:$0xff]   ;;  %v9171_v22 = vld [vmem:[#allocation8 + $0x15e8] ss:$16 sps:$4 sm:$0xff]  }
 0x5e0   :  { %5895 = vmatprep.subr.bf16.mxu0 %v9092_v23  ;;  %5977 = vmatprep.subr.bf16.mxu1 %v9095_v24  ;;  %v9176_v23 = vld [vmem:[#allocation8 + $0x1604] ss:$16 sps:$4 sm:$0xff]   ;;  %v9179_v24 = vld [vmem:[#allocation8 + $0x160c] ss:$16 sps:$4 sm:$0xff]  }
 0x5e3   :  { %5896 = vmatpush1.bf16.msra.mxu0 %v9090_v26  ;;  %5978 = vmatpush1.bf16.msra.mxu1 %v9093_v27  ;;  %v9941_v26 = vld [vmem:[#allocation10 + $0x10] sm:$0xf] }
 0x5e4   :  { %5897 = vmatprep.subr.bf16.mxu0 %v9098_v28  ;;  %5979 = vmatprep.subr.bf16.mxu1 %v9101_v54  ;;  %v4262_v27 = vrot.slane %v9941_v26, %v9835_v10  ;;  %v4266_v28 = vrot.slane %v9941_v26, %v9837_v11  ;;  %v4274_v54 = vrot.slane %v9941_v26, %v9840_v13 }
 0x5e7   :  { %5898 = vmatpush1.bf16.msra.mxu0 %v9096_v41  ;;  %5980 = vmatpush1.bf16.msra.mxu1 %v9099_v29 }
 0x5e8   :  { %5899 = vmatprep.subr.bf16.mxu0 %v9104_v30  ;;  %5981 = vmatprep.subr.bf16.mxu1 %v9107_v31 }
 0x5eb   :  { %5900 = vmatpush1.bf16.msra.mxu0 %v9102_v32  ;;  %5982 = vmatpush1.bf16.msra.mxu1 %v9105_v59 }
 0x5ec   :  { %5901 = vmatprep.subr.bf16.mxu0 %v9110_v33  ;;  %5983 = vmatprep.subr.bf16.mxu1 %v9113_v35 }
 0x5ef   :  { %5902 = vmatpush1.bf16.msra.mxu0 %v9108_v36  ;;  %5984 = vmatpush1.bf16.msra.mxu1 %v9111_v37 }
 0x5f0   :  { %5903 = vmatprep.subr.bf16.mxu0 %v9116_v1  ;;  %5985 = vmatprep.subr.bf16.mxu1 %v9119_v39 }
 0x5f3   :  { %5904 = vmatpush1.bf16.msra.mxu0 %v9114_v43  ;;  %5986 = vmatpush1.bf16.msra.mxu1 %v9117_v6 }
 0x5f4   :  { %5905 = vmatprep.subr.bf16.mxu0 %v9122_v44  ;;  %5987 = vmatprep.subr.bf16.mxu1 %v9125_v47 }
 0x5f7   :  { %5906 = vmatpush1.bf16.msra.mxu0 %v9120_v49  ;;  %5988 = vmatpush1.bf16.msra.mxu1 %v9123_v50  ;;  %v9174_v50 = vld [vmem:[#allocation8 + $0x1600] ss:$16 sps:$4 sm:$0xff]  }
 0x5f8   :  { %5907 = vmatprep.subr.bf16.mxu0 %v9128_v51  ;;  %5989 = vmatprep.subr.bf16.mxu1 %v9131_v52  ;;  %v9177_v51 = vld [vmem:[#allocation8 + $0x1608] ss:$16 sps:$4 sm:$0xff]  }
 0x5fb   :  { %5908 = vmatpush1.bf16.msra.mxu0 %v9126_v53  ;;  %5990 = vmatpush1.bf16.msra.mxu1 %v9129_v55  ;;  %v9182_v55 = vld [vmem:[#allocation8 + $0x1624] ss:$16 sps:$4 sm:$0xff]  }
 0x5fc   :  { %5909 = vmatprep.subr.bf16.mxu0 %v9134_v56  ;;  %5991 = vmatprep.subr.bf16.mxu1 %v9137_v57  ;;  %v9185_v56 = vld [vmem:[#allocation8 + $0x162c] ss:$16 sps:$4 sm:$0xff]  }
 0x5ff   :  { %5910 = vmatpush1.bf16.msra.mxu0 %v9132_v58  ;;  %5992 = vmatpush1.bf16.msra.mxu1 %v9135_v60  ;;  %v9180_v58 = vld [vmem:[#allocation8 + $0x1620] ss:$16 sps:$4 sm:$0xff]   ;;  %v9183_v60 = vld [vmem:[#allocation8 + $0x1628] ss:$16 sps:$4 sm:$0xff]  }
 0x600   :  { %5911 = vmatprep.subr.bf16.mxu0 %v9140_v61  ;;  %5993 = vmatprep.subr.bf16.mxu1 %v9143_v62  ;;  %v9188_v61 = vld [vmem:[#allocation8 + $0x1644] ss:$16 sps:$4 sm:$0xff]   ;;  %v9191_v62 = vld [vmem:[#allocation8 + $0x164c] ss:$16 sps:$4 sm:$0xff]  }
 0x603   :  { %5912 = vmatpush1.bf16.msra.mxu0 %v9138_v63  ;;  %5994 = vmatpush1.bf16.msra.mxu1 %v9141_v0  ;;  %v9186_v63 = vld [vmem:[#allocation8 + $0x1640] ss:$16 sps:$4 sm:$0xff]   ;;  %v9189_v0 = vld [vmem:[#allocation8 + $0x1648] ss:$16 sps:$4 sm:$0xff]  }
 0x604   :  { %5913 = vmatprep.subr.bf16.mxu0 %v9146_v2  ;;  %5995 = vmatprep.subr.bf16.mxu1 %v9149_v3  ;;  %v9194_v2 = vld [vmem:[#allocation8 + $0x1664] ss:$16 sps:$4 sm:$0xff]   ;;  %v9197_v3 = vld [vmem:[#allocation8 + $0x166c] ss:$16 sps:$4 sm:$0xff]  }
 0x607   :  { %5914 = vmatpush1.bf16.msra.mxu0 %v9144_v4  ;;  %5996 = vmatpush1.bf16.msra.mxu1 %v9147_v5  ;;  %v9192_v4 = vld [vmem:[#allocation8 + $0x1660] ss:$16 sps:$4 sm:$0xff]   ;;  %v9195_v5 = vld [vmem:[#allocation8 + $0x1668] ss:$16 sps:$4 sm:$0xff]  }
 0x608   :  { %5915 = vmatprep.subr.bf16.mxu0 %v9152_v14  ;;  %5997 = vmatprep.subr.bf16.mxu1 %v9155_v15  ;;  %v9200_v14 = vld [vmem:[#allocation8 + $0x1684] ss:$16 sps:$4 sm:$0xff]   ;;  %v9203_v15 = vld [vmem:[#allocation8 + $0x168c] ss:$16 sps:$4 sm:$0xff]  }
 0x60b   :  { %5916 = vmatpush1.bf16.msra.mxu0 %v9150_v16  ;;  %5998 = vmatpush1.bf16.msra.mxu1 %v9153_v45  ;;  %v9198_v16 = vld [vmem:[#allocation8 + $0x1680] ss:$16 sps:$4 sm:$0xff]   ;;  %v9201_v45 = vld [vmem:[#allocation8 + $0x1688] ss:$16 sps:$4 sm:$0xff]  }
 0x60c   :  { %5917 = vmatprep.subr.bf16.mxu0 %v9158_v34  ;;  %5999 = vmatprep.subr.bf16.mxu1 %v9161_v40  ;;  %v9206_v34 = vld [vmem:[#allocation8 + $0x16a4] ss:$16 sps:$4 sm:$0xff]   ;;  %v9209_v40 = vld [vmem:[#allocation8 + $0x16ac] ss:$16 sps:$4 sm:$0xff]  }
 0x60f   :  { %5918 = vmatpush1.bf16.msra.mxu0 %v9156_v17  ;;  %6000 = vmatpush1.bf16.msra.mxu1 %v9159_v42  ;;  %v9204_v17 = vld [vmem:[#allocation8 + $0x16a0] ss:$16 sps:$4 sm:$0xff]   ;;  %v9207_v42 = vld [vmem:[#allocation8 + $0x16a8] ss:$16 sps:$4 sm:$0xff]  }
 0x610   :  { %5919 = vmatprep.subr.bf16.mxu0 %v9164_v46  ;;  %6001 = vmatprep.subr.bf16.mxu1 %v9167_v38  ;;  %v9212_v46 = vld [vmem:[#allocation8 + $0x16c4] ss:$16 sps:$4 sm:$0xff]   ;;  %v9215_v38 = vld [vmem:[#allocation8 + $0x16cc] ss:$16 sps:$4 sm:$0xff]  }
 0x613   :  { %5920 = vmatpush1.bf16.msra.mxu0 %v9162_v18  ;;  %6002 = vmatpush1.bf16.msra.mxu1 %v9165_v48  ;;  %v9210_v18 = vld [vmem:[#allocation8 + $0x16c0] ss:$16 sps:$4 sm:$0xff]   ;;  %v9213_v48 = vld [vmem:[#allocation8 + $0x16c8] ss:$16 sps:$4 sm:$0xff]  }
 0x614   :  { %5921 = vmatprep.subr.bf16.mxu0 %v9170_v19  ;;  %6003 = vmatprep.subr.bf16.mxu1 %v9173_v20  ;;  %v9218_v19 = vld [vmem:[#allocation8 + $0x16e4] ss:$16 sps:$4 sm:$0xff]   ;;  %v9221_v20 = vld [vmem:[#allocation8 + $0x16ec] ss:$16 sps:$4 sm:$0xff]  }
 0x617   :  { %5922 = vmatpush1.bf16.msra.mxu0 %v9168_v21  ;;  %6004 = vmatpush1.bf16.msra.mxu1 %v9171_v22  ;;  %v9216_v21 = vld [vmem:[#allocation8 + $0x16e0] ss:$16 sps:$4 sm:$0xff]   ;;  %v9219_v22 = vld [vmem:[#allocation8 + $0x16e8] ss:$16 sps:$4 sm:$0xff]  }
 0x618   :  { %5932 = vmatprep.subr.bf16.mxu0 %v9176_v23  ;;  %6014 = vmatprep.subr.bf16.mxu1 %v9179_v24  ;;  %v9224_v23 = vld [vmem:[#allocation8 + $0x1704] ss:$16 sps:$4 sm:$0xff]   ;;  %v9227_v24 = vld [vmem:[#allocation8 + $0x170c] ss:$16 sps:$4 sm:$0xff]  }
 0x6ad   :  { %v4994_v41 = vpop.f32.mrb[16].mxu0  ;;  %v9949_v29 = vpop.f32.mrb[16].mxu1 }
 0x6ae   :  { %v8034_v30 = vadd.f32 %v4994_v41, %v4262_v27  ;;  %v4996_v31 = vpop.f32.mrb[17].mxu0  ;;  %v5078_v32 = vpop.f32.mrb[17].mxu1  ;;  %v9222_v27 = vld [vmem:[#allocation8 + $0x1700] ss:$16 sps:$4 sm:$0xff]   ;;  %v9233_v41 = vld [vmem:[#allocation8 + $0x172c] ss:$16 sps:$4 sm:$0xff]  }
 0x6af   :  { %v8035_v59 = vadd.f32 %v4996_v31, %v4266_v28  ;;  %v8037_v33 = vadd.f32 %v5078_v32, %v4274_v54  ;;  %v4998_v35 = vpop.f32.mrb[18].mxu0  ;;  %v5080_v36 = vpop.f32.mrb[18].mxu1  ;;  %v9225_v28 = vld [vmem:[#allocation8 + $0x1708] ss:$16 sps:$4 sm:$0xff]   ;;  %v9230_v54 = vld [vmem:[#allocation8 + $0x1724] ss:$16 sps:$4 sm:$0xff]  }
 0x6b0   :  { %vm5083_vm0 = vcmp.ge.f32.partialorder %v8034_v30, 0.0  ;;  %v5087_v37 = vmul.f32 0.2, %v8034_v30  ;;  %v4999_v6 = vpop.f32.mrb[19].mxu0  ;;  %v5081_v44 = vpop.f32.mrb[19].mxu1 }
 0x6b1   :  { %vm5084_vm1 = vcmp.ge.f32.partialorder %v8035_v59, 0.0  ;;  %v5088_v1 = vmul.f32 0.2, %v8035_v59  ;;  %vm5086_vm2 = vcmp.ge.f32.partialorder %v8037_v33, 0.0  ;;  %v5090_v39 = vmul.f32 0.2, %v8037_v33 }
 0x6b2   :  { %v5091_v43 = vsel %vm5083_vm0, %v8034_v30, %v5087_v37  ;;  %v9228_v30 = vld [vmem:[#allocation8 + $0x1720] ss:$16 sps:$4 sm:$0xff]   ;;  %v9231_v31 = vld [vmem:[#allocation8 + $0x1728] ss:$16 sps:$4 sm:$0xff]   ;;  %v9236_v32 = vld [vmem:[#allocation8 + $0x1744] ss:$16 sps:$4 sm:$0xff]  }
 0x6b3   :  { %v5092_v47 = vsel %vm5084_vm1, %v8035_v59, %v5088_v1  ;;  %v5094_v52 = vsel %vm5086_vm2, %v8037_v33, %v5090_v39  ;;  %v5095_v53 = vpack.c.bf16 %v5091_v43, %v5091_v43  ;;  %v9239_v59 = vld [vmem:[#allocation8 + $0x174c] ss:$16 sps:$4 sm:$0xff]   ;;  %v9234_v33 = vld [vmem:[#allocation8 + $0x1740] ss:$16 sps:$4 sm:$0xff]   ;;  %v9237_v35 = vld [vmem:[#allocation8 + $0x1748] ss:$16 sps:$4 sm:$0xff]  }
 0x6b4   :  { %v5096_v49 = vpack.c.bf16 %v5092_v47, %v5092_v47  ;;  %v5098_v57 = vpack.c.bf16 %v5094_v52, %v5094_v52  ;;  %v9242_v36 = vld [vmem:[#allocation8 + $0x1764] ss:$16 sps:$4 sm:$0xff]   ;;  %v9245_v37 = vld [vmem:[#allocation8 + $0x176c] ss:$16 sps:$4 sm:$0xff]   ;;  %v9240_v1 = vld [vmem:[#allocation8 + $0x1760] ss:$16 sps:$4 sm:$0xff]  }
 0x6b5   :  { %v9243_v39 = vld [vmem:[#allocation8 + $0x1768] ss:$16 sps:$4 sm:$0xff]   ;;  %v9248_v43 = vld [vmem:[#allocation8 + $0x1784] ss:$16 sps:$4 sm:$0xff]   ;;  %v9251_v6 = vld [vmem:[#allocation8 + $0x178c] ss:$16 sps:$4 sm:$0xff]  }
 0x6b6   :  { %5923 = vmatprep.mubr.bf16.mxu0 %v5096_v49  ;;  %6005 = vmatprep.mubr.bf16.mxu1 %v5096_v49  ;;  %v9246_v44 = vld [vmem:[#allocation8 + $0x1780] ss:$16 sps:$4 sm:$0xff]   ;;  %v9249_v47 = vld [vmem:[#allocation8 + $0x1788] ss:$16 sps:$4 sm:$0xff]   ;;  %v9254_v49 = vld [vmem:[#allocation8 + $0x17a4] ss:$16 sps:$4 sm:$0xff]  }
 0x6b7   :  { %5924 = vmatmul.mubr.bf16.vlgmr.msra.gmra.mrb[20].mxu0 %v5095_v53  ;;  %6006 = vmatmul.mubr.bf16.vlgmr.msra.gmra.mrb[20].mxu1 %v5095_v53  ;;  %v9252_v52 = vld [vmem:[#allocation8 + $0x17a0] ss:$16 sps:$4 sm:$0xff]   ;;  %v9255_v53 = vld [vmem:[#allocation8 + $0x17a8] ss:$16 sps:$4 sm:$0xff]  }
 0x6b8   :  { %5933 = vmatpush1.bf16.msra.mxu0 %v9174_v50  ;;  %6015 = vmatpush1.bf16.msra.mxu1 %v9177_v51  ;;  %v9257_v50 = vld [vmem:[#allocation8 + $0x17ac] ss:$16 sps:$4 sm:$0xff]   ;;  %v4270_v51 = vrot.slane %v9941_v26, %v9833_v9  ;;  %v9264_v26 = vld [vmem:[#allocation8 + $0x17e0] ss:$16 sps:$4 sm:$0xff]  }
 0x6b9   :  { %5964 = vmatprep.mubr.bf16.mxu0 %v5098_v57  ;;  %6046 = vmatprep.mubr.bf16.mxu1 %v5098_v57 }
 0x6ba   :  { %5934 = vmatprep.subr.bf16.mxu0 %v9182_v55  ;;  %6016 = vmatprep.subr.bf16.mxu1 %v9185_v56  ;;  %v9260_v55 = vld [vmem:[#allocation8 + $0x17c4] ss:$16 sps:$4 sm:$0xff]   ;;  %v9263_v56 = vld [vmem:[#allocation8 + $0x17cc] ss:$16 sps:$4 sm:$0xff]   ;;  %v8036_v57 = vadd.f32 %v9949_v29, %v4270_v51  ;;  %v9270_v29 = vld [vmem:[#allocation11] ss:$16 sps:$4 sm:$0xff]  }
 0x6bb   :  { %v9335_v51 = vld [vmem:[#allocation11 + $0x14c] ss:$16 sps:$4 sm:$0xff]  }
 0x6bc   :  { %5935 = vmatpush1.bf16.msra.mxu0 %v9180_v58  ;;  %6017 = vmatpush1.bf16.msra.mxu1 %v9183_v60  ;;  %v9258_v58 = vld [vmem:[#allocation8 + $0x17c0] ss:$16 sps:$4 sm:$0xff]   ;;  %v9261_v60 = vld [vmem:[#allocation8 + $0x17c8] ss:$16 sps:$4 sm:$0xff]   ;;  %vm5085_vm3 = vcmp.ge.f32.partialorder %v8036_v57, 0.0 }
 0x6bd   :  { %5936 = vmatprep.subr.bf16.mxu0 %v9188_v61  ;;  %6018 = vmatprep.subr.bf16.mxu1 %v9191_v62  ;;  %v9266_v61 = vld [vmem:[#allocation8 + $0x17e4] ss:$16 sps:$4 sm:$0xff]   ;;  %v9269_v62 = vld [vmem:[#allocation8 + $0x17ec] ss:$16 sps:$4 sm:$0xff]  }
 0x6c0   :  { %5937 = vmatpush1.bf16.msra.mxu0 %v9186_v63  ;;  %6019 = vmatpush1.bf16.msra.mxu1 %v9189_v0  ;;  %v5089_v63 = vmul.f32 0.2, %v8036_v57  ;;  %v9267_v0 = vld [vmem:[#allocation8 + $0x17e8] ss:$16 sps:$4 sm:$0xff]  }
 0x6c1   :  { %5938 = vmatprep.subr.bf16.mxu0 %v9194_v2  ;;  %6020 = vmatprep.subr.bf16.mxu1 %v9197_v3  ;;  %v9272_v2 = vld [vmem:[#allocation11 + $0x4] ss:$16 sps:$4 sm:$0xff]   ;;  %v9275_v3 = vld [vmem:[#allocation11 + $0xc] ss:$16 sps:$4 sm:$0xff]  }
 0x6c4   :  { %5939 = vmatpush1.bf16.msra.mxu0 %v9192_v4  ;;  %6021 = vmatpush1.bf16.msra.mxu1 %v9195_v5  ;;  %v5093_v4 = vsel %vm5085_vm3, %v8036_v57, %v5089_v63  ;;  %v9273_v5 = vld [vmem:[#allocation11 + $0x8] ss:$16 sps:$4 sm:$0xff]   ;;  %v9336_v57 = vld [vmem:[#allocation11 + $0x160] ss:$16 sps:$4 sm:$0xff]  }
 0x6c5   :  { %5940 = vmatprep.subr.bf16.mxu0 %v9200_v14  ;;  %6022 = vmatprep.subr.bf16.mxu1 %v9203_v15  ;;  %v5097_v14 = vpack.c.bf16 %v5093_v4, %v5093_v4  ;;  %v9278_v15 = vld [vmem:[#allocation11 + $0x24] ss:$16 sps:$4 sm:$0xff]   ;;  %v9345_v63 = vld [vmem:[#allocation11 + $0x188] ss:$16 sps:$4 sm:$0xff]  }
 0x6c6   :  { %v9356_v4 = vld [vmem:[#allocation11 + $0x1c4] ss:$16 sps:$4 sm:$0xff]  }
 0x6c8   :  { %5941 = vmatpush1.bf16.msra.mxu0 %v9198_v16  ;;  %6023 = vmatpush1.bf16.msra.mxu1 %v9201_v45  ;;  %v9281_v16 = vld [vmem:[#allocation11 + $0x2c] ss:$16 sps:$4 sm:$0xff]   ;;  %v9276_v45 = vld [vmem:[#allocation11 + $0x20] ss:$16 sps:$4 sm:$0xff]  }
 0x6c9   :  { %5942 = vmatprep.subr.bf16.mxu0 %v9206_v34  ;;  %6024 = vmatprep.subr.bf16.mxu1 %v9209_v40  ;;  %v9279_v34 = vld [vmem:[#allocation11 + $0x28] ss:$16 sps:$4 sm:$0xff]   ;;  %v9284_v40 = vld [vmem:[#allocation11 + $0x44] ss:$16 sps:$4 sm:$0xff]  }
 0x6cc   :  { %5943 = vmatpush1.bf16.msra.mxu0 %v9204_v17  ;;  %6025 = vmatpush1.bf16.msra.mxu1 %v9207_v42  ;;  %v9287_v17 = vld [vmem:[#allocation11 + $0x4c] ss:$16 sps:$4 sm:$0xff]   ;;  %v9282_v42 = vld [vmem:[#allocation11 + $0x40] ss:$16 sps:$4 sm:$0xff]  }
 0x6cd   :  { %5944 = vmatprep.subr.bf16.mxu0 %v9212_v46  ;;  %6026 = vmatprep.subr.bf16.mxu1 %v9215_v38  ;;  %v9285_v46 = vld [vmem:[#allocation11 + $0x48] ss:$16 sps:$4 sm:$0xff]   ;;  %v9290_v38 = vld [vmem:[#allocation11 + $0x64] ss:$16 sps:$4 sm:$0xff]  }
 0x6d0   :  { %5945 = vmatpush1.bf16.msra.mxu0 %v9210_v18  ;;  %6027 = vmatpush1.bf16.msra.mxu1 %v9213_v48  ;;  %v9293_v18 = vld [vmem:[#allocation11 + $0x6c] ss:$16 sps:$4 sm:$0xff]   ;;  %v9288_v48 = vld [vmem:[#allocation11 + $0x60] ss:$16 sps:$4 sm:$0xff]  }
 0x6d1   :  { %5946 = vmatprep.subr.bf16.mxu0 %v9218_v19  ;;  %6028 = vmatprep.subr.bf16.mxu1 %v9221_v20  ;;  %v9291_v19 = vld [vmem:[#allocation11 + $0x68] ss:$16 sps:$4 sm:$0xff]   ;;  %v9296_v20 = vld [vmem:[#allocation11 + $0x84] ss:$16 sps:$4 sm:$0xff]  }
 0x6d4   :  { %5947 = vmatpush1.bf16.msra.mxu0 %v9216_v21  ;;  %6029 = vmatpush1.bf16.msra.mxu1 %v9219_v22  ;;  %v9299_v21 = vld [vmem:[#allocation11 + $0x8c] ss:$16 sps:$4 sm:$0xff]   ;;  %v9294_v22 = vld [vmem:[#allocation11 + $0x80] ss:$16 sps:$4 sm:$0xff]  }
 0x6d5   :  { %5948 = vmatprep.subr.bf16.mxu0 %v9224_v23  ;;  %6030 = vmatprep.subr.bf16.mxu1 %v9227_v24  ;;  %v9297_v23 = vld [vmem:[#allocation11 + $0x88] ss:$16 sps:$4 sm:$0xff]   ;;  %v9302_v24 = vld [vmem:[#allocation11 + $0xa4] ss:$16 sps:$4 sm:$0xff]  }
 0x6d8   :  { %5949 = vmatpush1.bf16.msra.mxu0 %v9222_v27  ;;  %6031 = vmatpush1.bf16.msra.mxu1 %v9225_v28  ;;  %v9305_v27 = vld [vmem:[#allocation11 + $0xac] ss:$16 sps:$4 sm:$0xff]   ;;  %v9300_v28 = vld [vmem:[#allocation11 + $0xa0] ss:$16 sps:$4 sm:$0xff]  }
 0x6d9   :  { %5950 = vmatprep.subr.bf16.mxu0 %v9230_v54  ;;  %6032 = vmatprep.subr.bf16.mxu1 %v9233_v41  ;;  %v9303_v54 = vld [vmem:[#allocation11 + $0xa8] ss:$16 sps:$4 sm:$0xff]   ;;  %v9308_v41 = vld [vmem:[#allocation11 + $0xc4] ss:$16 sps:$4 sm:$0xff]  }
 0x6dc   :  { %5951 = vmatpush1.bf16.msra.mxu0 %v9228_v30  ;;  %6033 = vmatpush1.bf16.msra.mxu1 %v9231_v31  ;;  %v9311_v30 = vld [vmem:[#allocation11 + $0xcc] ss:$16 sps:$4 sm:$0xff]   ;;  %v9306_v31 = vld [vmem:[#allocation11 + $0xc0] ss:$16 sps:$4 sm:$0xff]  }
 0x6dd   :  { %5952 = vmatprep.subr.bf16.mxu0 %v9236_v32  ;;  %6034 = vmatprep.subr.bf16.mxu1 %v9239_v59  ;;  %v9309_v32 = vld [vmem:[#allocation11 + $0xc8] ss:$16 sps:$4 sm:$0xff]   ;;  %v9314_v59 = vld [vmem:[#allocation11 + $0xe4] ss:$16 sps:$4 sm:$0xff]  }
 0x6e0   :  { %5953 = vmatpush1.bf16.msra.mxu0 %v9234_v33  ;;  %6035 = vmatpush1.bf16.msra.mxu1 %v9237_v35  ;;  %v9317_v33 = vld [vmem:[#allocation11 + $0xec] ss:$16 sps:$4 sm:$0xff]   ;;  %v9312_v35 = vld [vmem:[#allocation11 + $0xe0] ss:$16 sps:$4 sm:$0xff]  }
 0x6e1   :  { %5954 = vmatprep.subr.bf16.mxu0 %v9242_v36  ;;  %6036 = vmatprep.subr.bf16.mxu1 %v9245_v37  ;;  %v9315_v36 = vld [vmem:[#allocation11 + $0xe8] ss:$16 sps:$4 sm:$0xff]   ;;  %v9320_v37 = vld [vmem:[#allocation11 + $0x104] ss:$16 sps:$4 sm:$0xff]  }
 0x6e4   :  { %5955 = vmatpush1.bf16.msra.mxu0 %v9240_v1  ;;  %6037 = vmatpush1.bf16.msra.mxu1 %v9243_v39  ;;  %v9323_v1 = vld [vmem:[#allocation11 + $0x10c] ss:$16 sps:$4 sm:$0xff]   ;;  %v9318_v39 = vld [vmem:[#allocation11 + $0x100] ss:$16 sps:$4 sm:$0xff]  }
 0x6e5   :  { %5956 = vmatprep.subr.bf16.mxu0 %v9248_v43  ;;  %6038 = vmatprep.subr.bf16.mxu1 %v9251_v6  ;;  %v9321_v43 = vld [vmem:[#allocation11 + $0x108] ss:$16 sps:$4 sm:$0xff]   ;;  %v9326_v6 = vld [vmem:[#allocation11 + $0x124] ss:$16 sps:$4 sm:$0xff]  }
 0x6e8   :  { %5957 = vmatpush1.bf16.msra.mxu0 %v9246_v44  ;;  %6039 = vmatpush1.bf16.msra.mxu1 %v9249_v47  ;;  %v9329_v44 = vld [vmem:[#allocation11 + $0x12c] ss:$16 sps:$4 sm:$0xff]   ;;  %v9324_v47 = vld [vmem:[#allocation11 + $0x120] ss:$16 sps:$4 sm:$0xff]  }
 0x6e9   :  { %5958 = vmatprep.subr.bf16.mxu0 %v9254_v49  ;;  %6040 = vmatprep.subr.bf16.mxu1 %v9257_v50  ;;  %v9327_v49 = vld [vmem:[#allocation11 + $0x128] ss:$16 sps:$4 sm:$0xff]   ;;  %v9332_v50 = vld [vmem:[#allocation11 + $0x144] ss:$16 sps:$4 sm:$0xff]  }
 0x6ec   :  { %5959 = vmatpush1.bf16.msra.mxu0 %v9252_v52  ;;  %6041 = vmatpush1.bf16.msra.mxu1 %v9255_v53  ;;  %v9330_v52 = vld [vmem:[#allocation11 + $0x140] ss:$16 sps:$4 sm:$0xff]   ;;  %v9333_v53 = vld [vmem:[#allocation11 + $0x148] ss:$16 sps:$4 sm:$0xff]  }
 0x6ed   :  { %5960 = vmatprep.subr.bf16.mxu0 %v9260_v55  ;;  %6042 = vmatprep.subr.bf16.mxu1 %v9263_v56  ;;  %v9338_v55 = vld [vmem:[#allocation11 + $0x164] ss:$16 sps:$4 sm:$0xff]   ;;  %v9341_v56 = vld [vmem:[#allocation11 + $0x16c] ss:$16 sps:$4 sm:$0xff]  }
 0x6f0   :  { %5961 = vmatpush1.bf16.msra.mxu0 %v9258_v58  ;;  %6043 = vmatpush1.bf16.msra.mxu1 %v9261_v60  ;;  %v9339_v58 = vld [vmem:[#allocation11 + $0x168] ss:$16 sps:$4 sm:$0xff]   ;;  %v9344_v60 = vld [vmem:[#allocation11 + $0x184] ss:$16 sps:$4 sm:$0xff]  }
 0x6f1   :  { %5962 = vmatprep.subr.bf16.mxu0 %v9266_v61  ;;  %6044 = vmatprep.subr.bf16.mxu1 %v9269_v62  ;;  %v9347_v61 = vld [vmem:[#allocation11 + $0x18c] ss:$16 sps:$4 sm:$0xff]   ;;  %v9342_v62 = vld [vmem:[#allocation11 + $0x180] ss:$16 sps:$4 sm:$0xff]  }
 0x6f4   :  { %5963 = vmatpush1.bf16.msra.mxu0 %v9264_v26  ;;  %6045 = vmatpush1.bf16.msra.mxu1 %v9267_v0  ;;  %v9350_v26 = vld [vmem:[#allocation11 + $0x1a4] ss:$16 sps:$4 sm:$0xff]   ;;  %v9353_v0 = vld [vmem:[#allocation11 + $0x1ac] ss:$16 sps:$4 sm:$0xff]  }
 0x6f5   :  { %6895 = vmatprep.subr.bf16.mxu0 %v9272_v2  ;;  %6977 = vmatprep.subr.bf16.mxu1 %v9275_v3  ;;  %v9348_v2 = vld [vmem:[#allocation11 + $0x1a0] ss:$16 sps:$4 sm:$0xff]   ;;  %v9351_v3 = vld [vmem:[#allocation11 + $0x1a8] ss:$16 sps:$4 sm:$0xff]  }
 0x6f7   :  { %5965 = vmatmul.mubr.bf16.vlgmr.msra.gmra.mrb[20].mxu0 %v5097_v14  ;;  %6047 = vmatmul.mubr.bf16.vlgmr.msra.gmra.mrb[20].mxu1 %v5097_v14  ;;  %v9357_v14 = vld [vmem:[#allocation11 + $0x1c8] ss:$16 sps:$4 sm:$0xff]  }
 0x6f8   :  { %6896 = vmatpush1.bf16.msra.mxu0 %v9270_v29  ;;  %6978 = vmatpush1.bf16.msra.mxu1 %v9273_v5  ;;  %v9359_v29 = vld [vmem:[#allocation11 + $0x1cc] ss:$16 sps:$4 sm:$0xff]   ;;  %v9354_v5 = vld [vmem:[#allocation11 + $0x1c0] ss:$16 sps:$4 sm:$0xff]  }
 0x6f9   :  { %6897 = vmatprep.subr.bf16.mxu0 %v9278_v15  ;;  %6979 = vmatprep.subr.bf16.mxu1 %v9281_v16  ;;  %v9362_v15 = vld [vmem:[#allocation11 + $0x1e4] ss:$16 sps:$4 sm:$0xff]   ;;  %v9365_v16 = vld [vmem:[#allocation11 + $0x1ec] ss:$16 sps:$4 sm:$0xff]  }
 0x6fc   :  { %6898 = vmatpush1.bf16.msra.mxu0 %v9276_v45  ;;  %6980 = vmatpush1.bf16.msra.mxu1 %v9279_v34  ;;  %v9360_v45 = vld [vmem:[#allocation11 + $0x1e0] ss:$16 sps:$4 sm:$0xff]   ;;  %v9363_v34 = vld [vmem:[#allocation11 + $0x1e8] ss:$16 sps:$4 sm:$0xff]  }
 0x6fd   :  { %6899 = vmatprep.subr.bf16.mxu0 %v9284_v40  ;;  %6981 = vmatprep.subr.bf16.mxu1 %v9287_v17  ;;  %v9368_v40 = vld [vmem:[#allocation11 + $0x204] ss:$16 sps:$4 sm:$0xff]   ;;  %v9371_v17 = vld [vmem:[#allocation11 + $0x20c] ss:$16 sps:$4 sm:$0xff]  }
 0x700   :  { %6900 = vmatpush1.bf16.msra.mxu0 %v9282_v42  ;;  %6982 = vmatpush1.bf16.msra.mxu1 %v9285_v46  ;;  %v5229_v42 = vld [vmem:[#allocation10 + $0x14] sm:$0xf] }
 0x701   :  { %6901 = vmatprep.subr.bf16.mxu0 %v9290_v38  ;;  %6983 = vmatprep.subr.bf16.mxu1 %v9293_v18  ;;  %v5234_v46 = vrot.slane %v5229_v42, %v9835_v10  ;;  %v5242_v38 = vrot.slane %v5229_v42, %v9833_v9  ;;  %v5238_v18 = vrot.slane %v5229_v42, %v9837_v11 }
 0x704   :  { %6902 = vmatpush1.bf16.msra.mxu0 %v9288_v48  ;;  %6984 = vmatpush1.bf16.msra.mxu1 %v9291_v19  ;;  %v5246_v48 = vrot.slane %v5229_v42, %v9840_v13  ;;  %v9395_v42 = vld [vmem:[#allocation11 + $0x28c] ss:$16 sps:$4 sm:$0xff]  }
 0x705   :  { %6903 = vmatprep.subr.bf16.mxu0 %v9296_v20  ;;  %6985 = vmatprep.subr.bf16.mxu1 %v9299_v21 }
 0x708   :  { %6904 = vmatpush1.bf16.msra.mxu0 %v9294_v22  ;;  %6986 = vmatpush1.bf16.msra.mxu1 %v9297_v23 }
 0x709   :  { %6905 = vmatprep.subr.bf16.mxu0 %v9302_v24  ;;  %6987 = vmatprep.subr.bf16.mxu1 %v9305_v27 }
 0x70c   :  { %6906 = vmatpush1.bf16.msra.mxu0 %v9300_v28  ;;  %6988 = vmatpush1.bf16.msra.mxu1 %v9303_v54 }
 0x70d   :  { %6907 = vmatprep.subr.bf16.mxu0 %v9308_v41  ;;  %6989 = vmatprep.subr.bf16.mxu1 %v9311_v30  ;;  %v6075_v30 = vld [vmem:[#allocation3] sm:$0xf] }
 0x710   :  { %6908 = vmatpush1.bf16.msra.mxu0 %v9306_v31  ;;  %6990 = vmatpush1.bf16.msra.mxu1 %v9309_v32 }
 0x711   :  { %6909 = vmatprep.subr.bf16.mxu0 %v9314_v59  ;;  %6991 = vmatprep.subr.bf16.mxu1 %v9317_v33 }
 0x714   :  { %6910 = vmatpush1.bf16.msra.mxu0 %v9312_v35  ;;  %6992 = vmatpush1.bf16.msra.mxu1 %v9315_v36 }
 0x715   :  { %6911 = vmatprep.subr.bf16.mxu0 %v9320_v37  ;;  %6993 = vmatprep.subr.bf16.mxu1 %v9323_v1 }
 0x718   :  { %6912 = vmatpush1.bf16.msra.mxu0 %v9318_v39  ;;  %6994 = vmatpush1.bf16.msra.mxu1 %v9321_v43  ;;  %v6080_v39 = vrot.slane %v6075_v30, %v9835_v10  ;;  %v6088_v43 = vrot.slane %v6075_v30, %v9833_v9 }
 0x719   :  { %6913 = vmatprep.subr.bf16.mxu0 %v9326_v6  ;;  %6995 = vmatprep.subr.bf16.mxu1 %v9329_v44 }
 0x71c   :  { %6914 = vmatpush1.bf16.msra.mxu0 %v9324_v47  ;;  %6996 = vmatpush1.bf16.msra.mxu1 %v9327_v49 }
 0x71d   :  { %6915 = vmatprep.subr.bf16.mxu0 %v9332_v50  ;;  %6997 = vmatprep.subr.bf16.mxu1 %v9335_v51 }
 0x720   :  { %6916 = vmatpush1.bf16.msra.mxu0 %v9330_v52  ;;  %6998 = vmatpush1.bf16.msra.mxu1 %v9333_v53  ;;  %v6084_v52 = vrot.slane %v6075_v30, %v9837_v11 }
 0x721   :  { %6917 = vmatprep.subr.bf16.mxu0 %v9338_v55  ;;  %6999 = vmatprep.subr.bf16.mxu1 %v9341_v56  ;;  %v6092_v56 = vrot.slane %v6075_v30, %v9840_v13  ;;  %v9416_v30 = vld [vmem:[#allocation11 + $0x304] ss:$16 sps:$4 sm:$0xff]  }
 0x724   :  { %6918 = vmatpush1.bf16.msra.mxu0 %v9336_v57  ;;  %7000 = vmatpush1.bf16.msra.mxu1 %v9339_v58 }
 0x725   :  { %6919 = vmatprep.subr.bf16.mxu0 %v9344_v60  ;;  %7001 = vmatprep.subr.bf16.mxu1 %v9347_v61 }
 0x728   :  { %6920 = vmatpush1.bf16.msra.mxu0 %v9342_v62  ;;  %7002 = vmatpush1.bf16.msra.mxu1 %v9345_v63  ;;  %v9366_v63 = vld [vmem:[#allocation11 + $0x200] ss:$16 sps:$4 sm:$0xff]  }
 0x729   :  { %6921 = vmatprep.subr.bf16.mxu0 %v9350_v26  ;;  %7003 = vmatprep.subr.bf16.mxu1 %v9353_v0  ;;  %v9369_v26 = vld [vmem:[#allocation11 + $0x208] ss:$16 sps:$4 sm:$0xff]  }
 0x72c   :  { %6922 = vmatpush1.bf16.msra.mxu0 %v9348_v2  ;;  %7004 = vmatpush1.bf16.msra.mxu1 %v9351_v3  ;;  %v9372_v3 = vld [vmem:[#allocation11 + $0x220] ss:$16 sps:$4 sm:$0xff]  }
 0x72d   :  { %6923 = vmatprep.subr.bf16.mxu0 %v9356_v4  ;;  %7005 = vmatprep.subr.bf16.mxu1 %v9359_v29  ;;  %v9375_v4 = vld [vmem:[#allocation11 + $0x228] ss:$16 sps:$4 sm:$0xff]   ;;  %v9380_v29 = vld [vmem:[#allocation11 + $0x244] ss:$16 sps:$4 sm:$0xff]  }
 0x730   :  { %6924 = vmatpush1.bf16.msra.mxu0 %v9354_v5  ;;  %7006 = vmatpush1.bf16.msra.mxu1 %v9357_v14  ;;  %v9383_v5 = vld [vmem:[#allocation11 + $0x24c] ss:$16 sps:$4 sm:$0xff]   ;;  %v9378_v14 = vld [vmem:[#allocation11 + $0x240] ss:$16 sps:$4 sm:$0xff]  }
 0x731   :  { %6925 = vmatprep.subr.bf16.mxu0 %v9362_v15  ;;  %7007 = vmatprep.subr.bf16.mxu1 %v9365_v16  ;;  %v9381_v15 = vld [vmem:[#allocation11 + $0x248] ss:$16 sps:$4 sm:$0xff]   ;;  %v9386_v16 = vld [vmem:[#allocation11 + $0x264] ss:$16 sps:$4 sm:$0xff]  }
 0x734   :  { %6926 = vmatpush1.bf16.msra.mxu0 %v9360_v45  ;;  %7008 = vmatpush1.bf16.msra.mxu1 %v9363_v34  ;;  %v9389_v45 = vld [vmem:[#allocation11 + $0x26c] ss:$16 sps:$4 sm:$0xff]   ;;  %v9384_v34 = vld [vmem:[#allocation11 + $0x260] ss:$16 sps:$4 sm:$0xff]  }
 0x735   :  { %6936 = vmatprep.subr.bf16.mxu0 %v9368_v40  ;;  %7018 = vmatprep.subr.bf16.mxu1 %v9371_v17  ;;  %v9387_v40 = vld [vmem:[#allocation11 + $0x268] ss:$16 sps:$4 sm:$0xff]   ;;  %v9392_v17 = vld [vmem:[#allocation11 + $0x284] ss:$16 sps:$4 sm:$0xff]  }
 0x7ca   :  { %v5966_v19 = vpop.f32.mrb[20].mxu0  ;;  %v6048_v20 = vpop.f32.mrb[20].mxu1 }
 0x7cb   :  { %v8038_v21 = vadd.f32 %v5966_v19, %v5234_v46  ;;  %v8040_v22 = vadd.f32 %v6048_v20, %v5242_v38  ;;  %v5968_v23 = vpop.f32.mrb[21].mxu0  ;;  %v6050_v24 = vpop.f32.mrb[21].mxu1  ;;  %v9390_v46 = vld [vmem:[#allocation11 + $0x280] ss:$16 sps:$4 sm:$0xff]   ;;  %v9393_v38 = vld [vmem:[#allocation11 + $0x288] ss:$16 sps:$4 sm:$0xff]  }
 0x7cc   :  { %v8039_v27 = vadd.f32 %v5968_v23, %v5238_v18  ;;  %v8041_v28 = vadd.f32 %v6050_v24, %v5246_v48  ;;  %v5970_v54 = vpop.f32.mrb[22].mxu0  ;;  %v6052_v41 = vpop.f32.mrb[22].mxu1  ;;  %v9398_v18 = vld [vmem:[#allocation11 + $0x2a4] ss:$16 sps:$4 sm:$0xff]   ;;  %v9401_v48 = vld [vmem:[#allocation11 + $0x2ac] ss:$16 sps:$4 sm:$0xff]  }
 0x7cd   :  { %vm6055_vm4 = vcmp.ge.f32.partialorder %v8038_v21, 0.0  ;;  %v6059_v31 = vmul.f32 0.2, %v8038_v21  ;;  %vm6057_vm5 = vcmp.ge.f32.partialorder %v8040_v22, 0.0  ;;  %v6061_v32 = vmul.f32 0.2, %v8040_v22 }
 0x7ce   :  { %vm6056_vm6 = vcmp.ge.f32.partialorder %v8039_v27, 0.0  ;;  %v6060_v59 = vmul.f32 0.2, %v8039_v27  ;;  %vm6058_vm7 = vcmp.ge.f32.partialorder %v8041_v28, 0.0  ;;  %v6062_v33 = vmul.f32 0.2, %v8041_v28 }
 0x7cf   :  { %v6063_v35 = vsel %vm6055_vm4, %v8038_v21, %v6059_v31  ;;  %v6065_v36 = vsel %vm6057_vm5, %v8040_v22, %v6061_v32  ;;  %v5971_v37 = vpop.f32.mrb[23].mxu0  ;;  %v6053_v1 = vpop.f32.mrb[23].mxu1  ;;  %v9396_v19 = vld [vmem:[#allocation11 + $0x2a0] ss:$16 sps:$4 sm:$0xff]   ;;  %v9399_v20 = vld [vmem:[#allocation11 + $0x2a8] ss:$16 sps:$4 sm:$0xff]  }
 0x7d0   :  { %v6067_v6 = vadd.f32 %v6063_v35, %v9908_v7  ;;  %v6069_v44 = vadd.f32 %v6065_v36, %v9924_v25  ;;  %v6064_v47 = vsel %vm6056_vm6, %v8039_v27, %v6060_v59  ;;  %v6066_v49 = vsel %vm6058_vm7, %v8041_v28, %v6062_v33  ;;  %v9404_v21 = vld [vmem:[#allocation11 + $0x2c4] ss:$16 sps:$4 sm:$0xff]   ;;  %v9407_v22 = vld [vmem:[#allocation11 + $0x2cc] ss:$16 sps:$4 sm:$0xff]   ;;  %v9402_v23 = vld [vmem:[#allocation11 + $0x2c0] ss:$16 sps:$4 sm:$0xff]  }
 0x7d1   :  { %v6068_v50 = vadd.f32 %v6064_v47, %v9910_v8  ;;  %v6070_v51 = vadd.f32 %v6066_v49, %v9912_v12  ;;  %v9374_v8 = vld [vmem:[#allocation11 + $0x224] ss:$16 sps:$4 sm:$0xff]   ;;  %v9377_v12 = vld [vmem:[#allocation11 + $0x22c] ss:$16 sps:$4 sm:$0xff]   ;;  %v9405_v24 = vld [vmem:[#allocation11 + $0x2c8] ss:$16 sps:$4 sm:$0xff]  }
 0x7d2   :  { %v6071_v53 = vmul.f32 0.70710677, %v6067_v6  ;;  %v6073_v55 = vmul.f32 0.70710677, %v6069_v44  ;;  %v9410_v27 = vld [vmem:[#allocation11 + $0x2e4] ss:$16 sps:$4 sm:$0xff]  }
 0x7d3   :  { %v6072_v57 = vmul.f32 0.70710677, %v6068_v50  ;;  %v6074_v58 = vmul.f32 0.70710677, %v6070_v51  ;;  %v9413_v28 = vld [vmem:[#allocation11 + $0x2ec] ss:$16 sps:$4 sm:$0xff]  }
 0x7d4   :  { %v6097_v60 = vadd.f32 %v6080_v39, %v6071_v53  ;;  %v9966_v61 = vadd.f32 %v6088_v43, %v6073_v55  ;;  %v9408_v54 = vld [vmem:[#allocation11 + $0x2e0] ss:$16 sps:$4 sm:$0xff]   ;;  %v9411_v41 = vld [vmem:[#allocation11 + $0x2e8] ss:$16 sps:$4 sm:$0xff]   ;;  %v9419_v31 = vld [vmem:[#allocation11 + $0x30c] ss:$16 sps:$4 sm:$0xff]  }
 0x7d5   :  { %v6098_v7 = vadd.f32 %v6084_v52, %v6072_v57  ;;  %v6100_v62 = vadd.f32 %v6092_v56, %v6074_v58  ;;  %v9414_v32 = vld [vmem:[#allocation11 + $0x300] ss:$16 sps:$4 sm:$0xff]   ;;  %v9417_v59 = vld [vmem:[#allocation11 + $0x308] ss:$16 sps:$4 sm:$0xff]   ;;  %v9422_v33 = vld [vmem:[#allocation11 + $0x324] ss:$16 sps:$4 sm:$0xff]  }
 0x7d6   :  { %v6101_v0 = vpack.c.bf16 %v6097_v60, %v6097_v60  ;;  %v9425_v35 = vld [vmem:[#allocation11 + $0x32c] ss:$16 sps:$4 sm:$0xff]   ;;  %v9420_v36 = vld [vmem:[#allocation11 + $0x320] ss:$16 sps:$4 sm:$0xff]   ;;  %v9423_v37 = vld [vmem:[#allocation11 + $0x328] ss:$16 sps:$4 sm:$0xff]  }
 0x7d7   :  { %v6102_v25 = vpack.c.bf16 %v6098_v7, %v6098_v7  ;;  %v6104_v2 = vpack.c.bf16 %v6100_v62, %v6100_v62  ;;  %v9428_v1 = vld [vmem:[#allocation11 + $0x344] ss:$16 sps:$4 sm:$0xff]   ;;  %v9431_v39 = vld [vmem:[#allocation11 + $0x34c] ss:$16 sps:$4 sm:$0xff]   ;;  %v9426_v43 = vld [vmem:[#allocation11 + $0x340] ss:$16 sps:$4 sm:$0xff]  }
 0x7d8   :  { %v9429_v6 = vld [vmem:[#allocation11 + $0x348] ss:$16 sps:$4 sm:$0xff]   ;;  %v9434_v44 = vld [vmem:[#allocation11 + $0x364] ss:$16 sps:$4 sm:$0xff]   ;;  %v9437_v47 = vld [vmem:[#allocation11 + $0x36c] ss:$16 sps:$4 sm:$0xff]  }
 0x7d9   :  { %6927 = vmatprep.mubr.bf16.mxu0 %v6102_v25  ;;  %7009 = vmatprep.mubr.bf16.mxu1 %v6102_v25  ;;  %v9432_v49 = vld [vmem:[#allocation11 + $0x360] ss:$16 sps:$4 sm:$0xff]   ;;  %v9435_v50 = vld [vmem:[#allocation11 + $0x368] ss:$16 sps:$4 sm:$0xff]   ;;  %v9440_v51 = vld [vmem:[#allocation11 + $0x384] ss:$16 sps:$4 sm:$0xff]  }
 0x7da   :  { %6928 = vmatmul.mubr.bf16.vlgmr.msra.gmra.mrb[24].mxu0 %v6101_v0  ;;  %7010 = vmatmul.mubr.bf16.vlgmr.msra.gmra.mrb[24].mxu1 %v6101_v0  ;;  %v9443_v52 = vld [vmem:[#allocation11 + $0x38c] ss:$16 sps:$4 sm:$0xff]   ;;  %v9438_v53 = vld [vmem:[#allocation11 + $0x380] ss:$16 sps:$4 sm:$0xff]   ;;  %v9441_v55 = vld [vmem:[#allocation11 + $0x388] ss:$16 sps:$4 sm:$0xff]  }
 0x7db   :  { %6937 = vmatpush1.bf16.msra.mxu0 %v9366_v63  ;;  %7019 = vmatpush1.bf16.msra.mxu1 %v9369_v26  ;;  %v9446_v56 = vld [vmem:[#allocation11 + $0x3a4] ss:$16 sps:$4 sm:$0xff]   ;;  %v9449_v57 = vld [vmem:[#allocation11 + $0x3ac] ss:$16 sps:$4 sm:$0xff]   ;;  %v9444_v58 = vld [vmem:[#allocation11 + $0x3a0] ss:$16 sps:$4 sm:$0xff]  }
 0x7dc   :  { %6968 = vmatprep.mubr.bf16.mxu0 %v6104_v2  ;;  %7050 = vmatprep.mubr.bf16.mxu1 %v6104_v2  ;;  %v9447_v60 = vld [vmem:[#allocation11 + $0x3a8] ss:$16 sps:$4 sm:$0xff]   ;;  %v9452_v7 = vld [vmem:[#allocation11 + $0x3c4] ss:$16 sps:$4 sm:$0xff]   ;;  %v9455_v62 = vld [vmem:[#allocation11 + $0x3cc] ss:$16 sps:$4 sm:$0xff]   ;;  %v6103_v2 = vpack.c.bf16 %v9966_v61, %v9966_v61 }
 0x7dd   :  { %6938 = vmatprep.subr.bf16.mxu0 %v9374_v8  ;;  %7020 = vmatprep.subr.bf16.mxu1 %v9377_v12  ;;  %v9450_v25 = vld [vmem:[#allocation11 + $0x3c0] ss:$16 sps:$4 sm:$0xff]   ;;  %v9453_v63 = vld [vmem:[#allocation11 + $0x3c8] ss:$16 sps:$4 sm:$0xff]   ;;  %v9458_v26 = vld [vmem:[#allocation11 + $0x3e4] ss:$16 sps:$4 sm:$0xff]  }
 0x7de   :  { %v9461_v0 = vld [vmem:[#allocation11 + $0x3ec] ss:$16 sps:$4 sm:$0xff]   ;;  %v9456_v8 = vld [vmem:[#allocation11 + $0x3e0] ss:$16 sps:$4 sm:$0xff]   ;;  %v9459_v12 = vld [vmem:[#allocation11 + $0x3e8] ss:$16 sps:$4 sm:$0xff]  }
 0x7df   :  { %6939 = vmatpush1.bf16.msra.mxu0 %v9372_v3  ;;  %7021 = vmatpush1.bf16.msra.mxu1 %v9375_v4  ;;  %v6233_v3 = vld [vmem:[#allocation13] sm:$0xf] }
 0x7e0   :  { %6940 = vmatprep.subr.bf16.mxu0 %v9380_v29  ;;  %7022 = vmatprep.subr.bf16.mxu1 %v9383_v5  ;;  %v6238_v4 = vrot.slane %v6233_v3, %v9835_v10  ;;  %v6246_v29 = vrot.slane %v6233_v3, %v9833_v9  ;;  %v6242_v5 = vrot.slane %v6233_v3, %v9837_v11 }
 0x7e3   :  { %6941 = vmatpush1.bf16.msra.mxu0 %v9378_v14  ;;  %7023 = vmatpush1.bf16.msra.mxu1 %v9381_v15  ;;  %v6250_v14 = vrot.slane %v6233_v3, %v9840_v13  ;;  %v7071_v15 = vld [vmem:[#allocation14] sm:$0xf] }
 0x7e4   :  { %6942 = vmatprep.subr.bf16.mxu0 %v9386_v16  ;;  %7024 = vmatprep.subr.bf16.mxu1 %v9389_v45 }
 0x7e7   :  { %6943 = vmatpush1.bf16.msra.mxu0 %v9384_v34  ;;  %7025 = vmatpush1.bf16.msra.mxu1 %v9387_v40 }
 0x7e8   :  { %6944 = vmatprep.subr.bf16.mxu0 %v9392_v17  ;;  %7026 = vmatprep.subr.bf16.mxu1 %v9395_v42 }
 0x7eb   :  { %6945 = vmatpush1.bf16.msra.mxu0 %v9390_v46  ;;  %7027 = vmatpush1.bf16.msra.mxu1 %v9393_v38 }
 0x7ec   :  { %6946 = vmatprep.subr.bf16.mxu0 %v9398_v18  ;;  %7028 = vmatprep.subr.bf16.mxu1 %v9401_v48  ;;  %v7076_v48 = vrot.slane %v7071_v15, %v9835_v10  ;;  %v7088_v10 = vrot.slane %v7071_v15, %v9840_v13 }
 0x7ef   :  { %6947 = vmatpush1.bf16.msra.mxu0 %v9396_v19  ;;  %7029 = vmatpush1.bf16.msra.mxu1 %v9399_v20  ;;  %v7080_v19 = vrot.slane %v7071_v15, %v9837_v11 }
 0x7f0   :  { %6948 = vmatprep.subr.bf16.mxu0 %v9404_v21  ;;  %7030 = vmatprep.subr.bf16.mxu1 %v9407_v22 }
 0x7f3   :  { %6949 = vmatpush1.bf16.msra.mxu0 %v9402_v23  ;;  %7031 = vmatpush1.bf16.msra.mxu1 %v9405_v24 }
 0x7f4   :  { %6950 = vmatprep.subr.bf16.mxu0 %v9410_v27  ;;  %7032 = vmatprep.subr.bf16.mxu1 %v9413_v28 }
 0x7f7   :  { %6951 = vmatpush1.bf16.msra.mxu0 %v9408_v54  ;;  %7033 = vmatpush1.bf16.msra.mxu1 %v9411_v41  ;;  %v7084_v54 = vrot.slane %v7071_v15, %v9833_v9 }
 0x7f8   :  { %6952 = vmatprep.subr.bf16.mxu0 %v9416_v30  ;;  %7034 = vmatprep.subr.bf16.mxu1 %v9419_v31 }
 0x7fb   :  { %6953 = vmatpush1.bf16.msra.mxu0 %v9414_v32  ;;  %7035 = vmatpush1.bf16.msra.mxu1 %v9417_v59 }
 0x7fc   :  { %6954 = vmatprep.subr.bf16.mxu0 %v9422_v33  ;;  %7036 = vmatprep.subr.bf16.mxu1 %v9425_v35 }
 0x7ff   :  { %6955 = vmatpush1.bf16.msra.mxu0 %v9420_v36  ;;  %7037 = vmatpush1.bf16.msra.mxu1 %v9423_v37 }
 0x800   :  { %6956 = vmatprep.subr.bf16.mxu0 %v9428_v1  ;;  %7038 = vmatprep.subr.bf16.mxu1 %v9431_v39  ;;  %v8017_v1 = vld [vmem:[#allocation2] ss:$0 sm:$0xff] }
 0x803   :  { %6957 = vmatpush1.bf16.msra.mxu0 %v9426_v43  ;;  %7039 = vmatpush1.bf16.msra.mxu1 %v9429_v6 }
 0x804   :  { %6958 = vmatprep.subr.bf16.mxu0 %v9434_v44  ;;  %7040 = vmatprep.subr.bf16.mxu1 %v9437_v47 }
 0x807   :  { %6959 = vmatpush1.bf16.msra.mxu0 %v9432_v49  ;;  %7041 = vmatpush1.bf16.msra.mxu1 %v9435_v50 }
 0x808   :  { %6960 = vmatprep.subr.bf16.mxu0 %v9440_v51  ;;  %7042 = vmatprep.subr.bf16.mxu1 %v9443_v52 }
 0x80b   :  { %6961 = vmatpush1.bf16.msra.mxu0 %v9438_v53  ;;  %7043 = vmatpush1.bf16.msra.mxu1 %v9441_v55 }
 0x80c   :  { %6962 = vmatprep.subr.bf16.mxu0 %v9446_v56  ;;  %7044 = vmatprep.subr.bf16.mxu1 %v9449_v57 }
 0x80f   :  { %6963 = vmatpush1.bf16.msra.mxu0 %v9444_v58  ;;  %7045 = vmatpush1.bf16.msra.mxu1 %v9447_v60 }
 0x810   :  { %6964 = vmatprep.subr.bf16.mxu0 %v9452_v7  ;;  %7046 = vmatprep.subr.bf16.mxu1 %v9455_v62 }
 0x813   :  { %6965 = vmatpush1.bf16.msra.mxu0 %v9450_v25  ;;  %7047 = vmatpush1.bf16.msra.mxu1 %v9453_v63 }
 0x814   :  { %6966 = vmatprep.subr.bf16.mxu0 %v9458_v26  ;;  %7048 = vmatprep.subr.bf16.mxu1 %v9461_v0 }
 0x817   :  { %6967 = vmatpush1.bf16.msra.mxu0 %v9456_v8  ;;  %7049 = vmatpush1.bf16.msra.mxu1 %v9459_v12 }
 0x81a   :  { %6969 = vmatmul.mubr.bf16.vlgmr.msra.gmra.mrb[24].mxu0 %v6103_v2  ;;  %7051 = vmatmul.mubr.bf16.vlgmr.msra.gmra.mrb[24].mxu1 %v6103_v2 }
 0x8ed   :  { %v6970_v16 = vpop.f32.mrb[24].mxu0  ;;  %v7052_v45 = vpop.f32.mrb[24].mxu1 }
 0x8ee   :  { %v8042_v34 = vadd.f32 %v6970_v16, %v6238_v4  ;;  %v8044_v40 = vadd.f32 %v7052_v45, %v6246_v29  ;;  %v6972_v17 = vpop.f32.mrb[25].mxu0  ;;  %v7054_v42 = vpop.f32.mrb[25].mxu1 }
 0x8ef   :  { %v8043_v46 = vadd.f32 %v6972_v17, %v6242_v5  ;;  %v8045_v61 = vadd.f32 %v7054_v42, %v6250_v14  ;;  %v6974_v38 = vpop.f32.mrb[26].mxu0  ;;  %v7056_v18 = vpop.f32.mrb[26].mxu1 }
 0x8f0   :  { %vm7059_vm8 = vcmp.ge.f32.partialorder %v8042_v34, 0.0  ;;  %v7063_v20 = vmul.f32 0.2, %v8042_v34  ;;  %vm7061_vm9 = vcmp.ge.f32.partialorder %v8044_v40, 0.0  ;;  %v7065_v21 = vmul.f32 0.2, %v8044_v40 }
 0x8f1   :  { %vm7060_vm10 = vcmp.ge.f32.partialorder %v8043_v46, 0.0  ;;  %v7064_v22 = vmul.f32 0.2, %v8043_v46  ;;  %v7066_v23 = vmul.f32 0.2, %v8045_v61  ;;  %vm7062_vm11 = vcmp.ge.f32.partialorder %v8045_v61, 0.0 }
 0x8f2   :  { %v7067_v24 = vsel %vm7059_vm8, %v8042_v34, %v7063_v20  ;;  %v6975_v27 = vpop.f32.mrb[27].mxu0  ;;  %v7057_v28 = vpop.f32.mrb[27].mxu1  ;;  %v7069_v30 = vsel %vm7061_vm9, %v8044_v40, %v7065_v21 }
 0x8f3   :  { %v7068_v41 = vsel %vm7060_vm10, %v8043_v46, %v7064_v22  ;;  %v7093_v31 = vmul.f32 %v7076_v48, %v7067_v24  ;;  %v7070_v11 = vsel %vm7062_vm11, %v8045_v61, %v7066_v23  ;;  %v7095_v59 = vmul.f32 %v7084_v54, %v7069_v30 }
 0x8f4   :  { %v7094_v32 = vmul.f32 %v7080_v19, %v7068_v41  ;;  %v7096_v35 = vmul.f32 %v7088_v10, %v7070_v11 }
 0x8f6   :  { %v7097_v33 = vadd.f32 %v7094_v32, %v7093_v31 }
 0x8f8   :  { %v7098_v36 = vadd.f32 %v7097_v33, %v7095_v59 }
 0x8fa   :  { %v7099_v37 = vadd.f32 %v7098_v36, %v7096_v35 }
 0x8fc   :  { %7100 = vadd.xlane.f32.xlu1 %v7099_v37 }
 0x989   :  { %v7101_v39 = vpop.xlane.xlu1 %7100 }
 0x98a   :  { %v7109_v43 = vadd.f32 %v8017_v1, %v7101_v39 }
 0x98c   :  { %7111 = vst.msk [vmem:[%s9991_s10] sm:$0xff] %vm7110_vm12, %v7109_v43 }
 0x98d   :  { %7116 = vsyncpa [#allocation4], 1 }
 0x98e   :  { %7117 = vsyncpa [#allocation6], 1 }
 0x98f   :  { %7118 = vsyncpa [#allocation9], 1 }
 0x990   :  { %7119 = vsyncpa [#allocation12], 1 }
 0x991   :  { %7120 = vsyncpa [#allocation15], 1 }

</bundles_post_ra>
